<compile_context>
chip_gen: v7x
topology: tpu7x:2x2x1
jax: 0.10.0
libtpu: 0.0.40
codegen_flags: <defaults>
</compile_context>

<pallas_src>
import math
import functools

import jax
import jax.numpy as jnp
from jax.experimental import pallas as pl
from jax.experimental.pallas import tpu as pltpu


# ----------------------------- kernel ---------------------------------------

def _layer_norm(x, gamma, beta, eps=1e-12):
    mean = jnp.mean(x, axis=-1, keepdims=True)
    var = jnp.mean((x - mean) ** 2, axis=-1, keepdims=True)
    return (x - mean) * jax.lax.rsqrt(var + eps) * gamma + beta


def _gelu(x):
    # exact erf-based gelu (matches the PyTorch reference `gelu`)
    return 0.5 * x * (1.0 + jax.lax.erf(x / math.sqrt(2.0)))


def transformer_block_kernel(
    # per-step inputs
    x_ref, bias_ref,
    # resident weights / params (weights already in compute_dtype)
    w_qkv_ref, b_qkv_ref, wo_h_ref, bo_ref,
    ln1_g_ref, ln1_b_ref,
    w1_ref, b1_ref, w2_ref, b2_ref,
    ln2_g_ref, ln2_b_ref,
    # output
    out_ref,
    *, n_heads: int, compute_dtype, approx_recip: bool,
):
    x = x_ref[0]                    # (S, D) f32 — one sequence per grid step
    bias = bias_ref[0]              # (1, S) f32 additive mask (0 / -1e30)

    S, D = x.shape
    H = n_heads
    dh = D // H
    scale = 1.0 / math.sqrt(dh)

    xm = x.astype(compute_dtype)

    # --- fused Q/K/V projection: one lane-dense (S, D) @ (D, 3D) MXU matmul ---
    qkv = jnp.dot(xm, w_qkv_ref[...],
                  preferred_element_type=jnp.float32) + b_qkv_ref[...]   # (S, 3D) f32

    q2 = (qkv[:, 0 * D:1 * D] * scale).astype(compute_dtype)
    k2 = qkv[:, 1 * D:2 * D].astype(compute_dtype)
    v2 = qkv[:, 2 * D:3 * D].astype(compute_dtype)

    # Head staging (S, D) -> (H, S, dh).  Slices + stack are used instead of a
    # lane-splitting reshape for guaranteed Mosaic lowering; cost is a small
    # layout copy relative to the matmuls.
    def split_heads(t):
        return jnp.stack([t[:, h * dh:(h + 1) * dh] for h in range(H)], axis=0)

    qh, kh, vh = split_heads(q2), split_heads(k2), split_heads(v2)

    # --- attention: all heads in one batched contraction (contract dh, no K^T) ---
    scores = jnp.einsum('hqd,hkd->hqk', qh, kh,
                        preferred_element_type=jnp.float32)              # (H, S, S)
    scores = scores + bias[None, :, :]                                   # additive mask
    scores = scores - jnp.max(scores, axis=-1, keepdims=True)
    e = jnp.exp(scores)
    p = e * pl.reciprocal(jnp.sum(e, axis=-1, keepdims=True), approx=approx_recip)

    ctx = jnp.einsum('hqk,hkd->hqd', p.astype(compute_dtype), vh,
                     preferred_element_type=jnp.float32)                 # (H, S, dh)

    # --- output projection with head regroup folded in ---
    #   context @ Wo  ==  sum_h ctx[h] @ Wo[h*dh:(h+1)*dh, :]
    sa = jnp.einsum('hsd,hdo->hso', ctx.astype(compute_dtype), wo_h_ref[...],
                    preferred_element_type=jnp.float32)                  # (H, S, D)
    sa = jnp.sum(sa, axis=0) + bo_ref[...]                               # (S, D)
    sa = _layer_norm(sa + x, ln1_g_ref[...], ln1_b_ref[...])

    # --- FFN (lin1 -> gelu -> lin2) + residual + LayerNorm (all f32 elementwise) ---
    h1 = jnp.dot(sa.astype(compute_dtype), w1_ref[...],
                 preferred_element_type=jnp.float32) + b1_ref[...]
    h1 = _gelu(h1)
    ffn = jnp.dot(h1.astype(compute_dtype), w2_ref[...],
                  preferred_element_type=jnp.float32) + b2_ref[...]
    out = _layer_norm(ffn + sa, ln2_g_ref[...], ln2_b_ref[...])

    out_ref[0] = out.astype(out_ref.dtype)


# ----------------------------- wrapper ---------------------------------------

def transformer_block(x, attn_mask, params, *, n_heads,
                      compute_dtype=jnp.bfloat16,
                      vmem_limit_bytes=64 * 1024 * 1024):
    """x: (B, S, D) f32; attn_mask: (B, S) f32 (nonzero = attend).

    compute_dtype=bfloat16 (default) feeds the MXU bf16 operands with f32
    accumulation; pass jnp.float32 for bit-accurate verification.  One
    sequence per grid step (grid=(B,)) so DMA overlaps compute and the batch
    axis shards across v7x's two TensorCores.  Raise vmem_limit_bytes toward
    ~100 MB on v5e/v6e if running larger shapes.
    """
    B, S, D = x.shape
    Hff = params["w1"].shape[1]
    assert D % n_heads == 0
    dh = D // n_heads

    # Fuse q/k/v projections; cast MXU weight operands to compute_dtype HERE
    # (halves weight HBM traffic + VMEM residency).  Biases / LN stay f32.
    w_qkv = jnp.concatenate(
        [params["wq"], params["wk"], params["wv"]], axis=1).astype(compute_dtype)
    b_qkv = jnp.concatenate(
        [params["bq"], params["bk"], params["bv"]], axis=1).astype(jnp.float32)
    wo_h = params["wo"].reshape(n_heads, dh, D).astype(compute_dtype)
    w1 = params["w1"].astype(compute_dtype)
    w2 = params["w2"].astype(compute_dtype)

    # Additive attention bias: 0 where attendable, -1e30 where masked.
    mask_bias = jnp.where(attn_mask == 0.0, -1e30, 0.0).astype(jnp.float32)
    mask_bias = mask_bias.reshape(B, 1, S)

    approx_recip = jnp.dtype(compute_dtype) != jnp.dtype(jnp.float32)

    kernel = functools.partial(
        transformer_block_kernel, n_heads=n_heads,
        compute_dtype=compute_dtype, approx_recip=bool(approx_recip))

    def const_spec(shape, pipeline_mode=None):
        if pipeline_mode is None:
            return pl.BlockSpec(shape, lambda i: (0,) * len(shape))
        return pl.BlockSpec(shape, lambda i: (0,) * len(shape),
                            pipeline_mode=pipeline_mode)

    def run(single_buffer_weights):
        # Large resident weights: request single buffering (no point
        # double-buffering constant-index blocks; saves VMEM, esp. on v7x).
        wmode = pl.Buffered(1) if single_buffer_weights else None
        in_specs = [
            pl.BlockSpec((1, S, D), lambda i: (i, 0, 0)),   # x (one sequence)
            pl.BlockSpec((1, 1, S), lambda i: (i, 0, 0)),   # additive mask bias
            const_spec((D, 3 * D), wmode), const_spec((1, 3 * D)),   # qkv W/b
            const_spec((n_heads, dh, D), wmode), const_spec((1, D)), # Wo(H,dh,D), bo
            const_spec((1, D)), const_spec((1, D)),                   # ln1 g/b
            const_spec((D, Hff), wmode), const_spec((1, Hff)),        # w1, b1
            const_spec((Hff, D), wmode), const_spec((1, D)),          # w2, b2
            const_spec((1, D)), const_spec((1, D)),                   # ln2 g/b
        ]
        out_spec = pl.BlockSpec((1, S, D), lambda i: (i, 0, 0))
        return pl.pallas_call(
            kernel,
            out_shape=jax.ShapeDtypeStruct((B, S, D), x.dtype),
            grid=(B,),
            in_specs=in_specs,
            out_specs=out_spec,
            compiler_params=pltpu.CompilerParams(
                dimension_semantics=("parallel",),
                vmem_limit_bytes=vmem_limit_bytes,
            ),
        )(
            x, mask_bias,
            w_qkv, b_qkv, wo_h, params["bo"],
            params["ln1_g"], params["ln1_b"],
            w1, params["b1"], w2, params["b2"],
            params["ln2_g"], params["ln2_b"],
        )

    try:
        return run(True)
    except Exception:
        # Fallback if this jax version rejects pl.Buffered(1) on input specs.
        return run(False)


# ------------------------- pure-JAX reference ---------------------------------

def transformer_block_ref(x, attn_mask, params, *, n_heads):
    B, S, D = x.shape
    dh = D // n_heads

    def lin(t, w, b):
        return t @ w + b[0]

    q = lin(x, params["wq"], params["bq"]).reshape(B, S, n_heads, dh).transpose(0, 2, 1, 3)
    k = lin(x, params["wk"], params["bk"]).reshape(B, S, n_heads, dh).transpose(0, 2, 1, 3)
    v = lin(x, params["wv"], params["bv"]).reshape(B, S, n_heads, dh).transpose(0, 2, 1, 3)
    q = q / math.sqrt(dh)
    scores = jnp.einsum("bhqd,bhkd->bhqk", q, k)
    m = (attn_mask == 0.0)[:, None, None, :]
    scores = jnp.where(m, -jnp.inf, scores)
    weights = jax.nn.softmax(scores, axis=-1)
    ctx = jnp.einsum("bhqk,bhkd->bhqd", weights, v).transpose(0, 2, 1, 3).reshape(B, S, D)
    sa = lin(ctx, params["wo"], params["bo"])

    def ln(t, g, b):
        mu = jnp.mean(t, axis=-1, keepdims=True)
        var = jnp.mean((t - mu) ** 2, axis=-1, keepdims=True)
        return (t - mu) / jnp.sqrt(var + 1e-12) * g[0] + b[0]

    sa = ln(sa + x, params["ln1_g"], params["ln1_b"])
    h1 = lin(sa, params["w1"], params["b1"])
    h1 = 0.5 * h1 * (1.0 + jax.lax.erf(h1 / math.sqrt(2.0)))
    ffn = lin(h1, params["w2"], params["b2"])
    return ln(ffn + sa, params["ln2_g"], params["ln2_b"])


# ------------------------------ main ------------------------------------------

if __name__ == "__main__":
    B, S, D, Hff, n_heads = 2, 8, 32, 64, 4

    key = jax.random.PRNGKey(0)
    keys = jax.random.split(key, 16)

    def winit(k, shape, scale=0.05):
        return (scale * jax.random.normal(k, shape)).astype(jnp.float32)

    params = {
        "wq": winit(keys[0], (D, D)), "bq": winit(keys[1], (1, D)),
        "wk": winit(keys[2], (D, D)), "bk": winit(keys[3], (1, D)),
        "wv": winit(keys[4], (D, D)), "bv": winit(keys[5], (1, D)),
        "wo": winit(keys[6], (D, D)), "bo": winit(keys[7], (1, D)),
        "ln1_g": jnp.ones((1, D), jnp.float32), "ln1_b": jnp.zeros((1, D), jnp.float32),
        "w1": winit(keys[8], (D, Hff)), "b1": winit(keys[9], (1, Hff)),
        "w2": winit(keys[10], (Hff, D)), "b2": winit(keys[11], (1, D)),
        "ln2_g": jnp.ones((1, D), jnp.float32), "ln2_b": jnp.zeros((1, D), jnp.float32),
    }

    x = jax.random.normal(keys[12], (B, S, D), dtype=jnp.float32)
    # Partially-masked second sequence (exercises masking; no fully-masked row).
    attn_mask = jnp.ones((B, S), dtype=jnp.float32).at[1, 6:].set(0.0)

    ref = transformer_block_ref(x, attn_mask, params, n_heads=n_heads)

    # 1) exact-math path (f32 MXU operands) — tight check vs. f32 reference.
    out_f32 = transformer_block(x, attn_mask, params, n_heads=n_heads,
                                compute_dtype=jnp.float32)
    out_f32 = jax.block_until_ready(out_f32)
    assert out_f32.shape == (B, S, D)
    assert jnp.allclose(out_f32, ref, atol=1e-4, rtol=1e-4), "f32 path mismatch"

    # 2) default fast path (bf16 MXU operands, f32 accumulation/softmax/LN).
    out_bf16 = transformer_block(x, attn_mask, params, n_heads=n_heads)
    out_bf16 = jax.block_until_ready(out_bf16)
    assert out_bf16.shape == (B, S, D)
    assert bool(jnp.all(jnp.isfinite(out_bf16)))
    assert jnp.allclose(out_bf16, ref, atol=5e-2, rtol=5e-2), "bf16 path mismatch"

    print("KERNEL_OK")
</pallas_src>

<mosaic_0001>
module attributes {stable_mosaic.version = 11 : i64} {
  func.func @transformer_block_kernel(%arg0: i32, %arg1: memref<1x8x32xf32, #tpu.memory_space<vmem>>, %arg2: memref<1x1x8xf32, #tpu.memory_space<vmem>>, %arg3: memref<32x96xf32, #tpu.memory_space<vmem>>, %arg4: memref<1x96xf32, #tpu.memory_space<vmem>>, %arg5: memref<4x8x32xf32, #tpu.memory_space<vmem>>, %arg6: memref<1x32xf32, #tpu.memory_space<vmem>>, %arg7: memref<1x32xf32, #tpu.memory_space<vmem>>, %arg8: memref<1x32xf32, #tpu.memory_space<vmem>>, %arg9: memref<32x64xf32, #tpu.memory_space<vmem>>, %arg10: memref<1x64xf32, #tpu.memory_space<vmem>>, %arg11: memref<64x32xf32, #tpu.memory_space<vmem>>, %arg12: memref<1x32xf32, #tpu.memory_space<vmem>>, %arg13: memref<1x32xf32, #tpu.memory_space<vmem>>, %arg14: memref<1x32xf32, #tpu.memory_space<vmem>>, %arg15: memref<1x8x32xf32, #tpu.memory_space<vmem>>) attributes {dimension_semantics = [#tpu.dimension_semantics<parallel>], iteration_bounds = array<i64: 2>, scalar_prefetch = 0 : i64, scratch_operands = 0 : i64, tpu.core_type = #tpu.core_type<tc>, window_params = [{transform_indices = @transform_0, window_bounds = array<i64: 1, 8, 32>}, {transform_indices = @transform_1, window_bounds = array<i64: 1, 1, 8>}, {pipeline_mode = #tpu.pipeline_mode<synchronous>, transform_indices = @transform_2, window_bounds = array<i64: 32, 96>}, {pipeline_mode = #tpu.pipeline_mode<synchronous>, transform_indices = @transform_3, window_bounds = array<i64: 1, 96>}, {pipeline_mode = #tpu.pipeline_mode<synchronous>, transform_indices = @transform_4, window_bounds = array<i64: 4, 8, 32>}, {pipeline_mode = #tpu.pipeline_mode<synchronous>, transform_indices = @transform_5, window_bounds = array<i64: 1, 32>}, {pipeline_mode = #tpu.pipeline_mode<synchronous>, transform_indices = @transform_6, window_bounds = array<i64: 1, 32>}, {pipeline_mode = #tpu.pipeline_mode<synchronous>, transform_indices = @transform_7, window_bounds = array<i64: 1, 32>}, {pipeline_mode = #tpu.pipeline_mode<synchronous>, transform_indices = @transform_8, window_bounds = array<i64: 32, 64>}, {pipeline_mode = #tpu.pipeline_mode<synchronous>, transform_indices = @transform_9, window_bounds = array<i64: 1, 64>}, {pipeline_mode = #tpu.pipeline_mode<synchronous>, transform_indices = @transform_10, window_bounds = array<i64: 64, 32>}, {pipeline_mode = #tpu.pipeline_mode<synchronous>, transform_indices = @transform_11, window_bounds = array<i64: 1, 32>}, {pipeline_mode = #tpu.pipeline_mode<synchronous>, transform_indices = @transform_12, window_bounds = array<i64: 1, 32>}, {pipeline_mode = #tpu.pipeline_mode<synchronous>, transform_indices = @transform_13, window_bounds = array<i64: 1, 32>}, {transform_indices = @transform_14, window_bounds = array<i64: 1, 8, 32>}]} {
    %c0 = arith.constant 0 : index
    %c0_0 = arith.constant 0 : index
    %c0_1 = arith.constant 0 : index
    %0 = vector.load %arg1[%c0, %c0_0, %c0_1] : memref<1x8x32xf32, #tpu.memory_space<vmem>>, vector<1x8x32xf32>
    %1 = vector.shape_cast %0 : vector<1x8x32xf32> to vector<8x32xf32>
    %c0_2 = arith.constant 0 : index
    %c0_3 = arith.constant 0 : index
    %c0_4 = arith.constant 0 : index
    %2 = vector.load %arg2[%c0_2, %c0_3, %c0_4] : memref<1x1x8xf32, #tpu.memory_space<vmem>>, vector<1x1x8xf32>
    %3 = vector.shape_cast %2 : vector<1x1x8xf32> to vector<1x8xf32>
    %c0_5 = arith.constant 0 : index
    %c0_6 = arith.constant 0 : index
    %4 = vector.load %arg3[%c0_5, %c0_6] : memref<32x96xf32, #tpu.memory_space<vmem>>, vector<32x96xf32>
    %cst = arith.constant dense<0.000000e+00> : vector<8x96xf32>
    %5 = tpu.matmul %1, %4, %cst {dimension_numbers = #tpu.dot_dimension_numbers<[1], [0], [0], [1], [0, 0, 1, 1], [], []>} : vector<8x32xf32>, vector<32x96xf32>, vector<8x96xf32> -> vector<8x96xf32>
    %c0_7 = arith.constant 0 : index
    %c0_8 = arith.constant 0 : index
    %6 = vector.load %arg4[%c0_7, %c0_8] : memref<1x96xf32, #tpu.memory_space<vmem>>, vector<1x96xf32>
    %7 = vector.broadcast %6 : vector<1x96xf32> to vector<8x96xf32>
    %8 = arith.addf %5, %7 : vector<8x96xf32>
    %9 = vector.extract_strided_slice %8 {offsets = [0, 0], sizes = [8, 32], strides = [1, 1]} : vector<8x96xf32> to vector<8x32xf32>
    %cst_9 = arith.constant 0.353553385 : f32
    %10 = vector.broadcast %cst_9 : f32 to vector<8x32xf32>
    %11 = arith.mulf %9, %10 : vector<8x32xf32>
    %12 = vector.extract_strided_slice %8 {offsets = [0, 32], sizes = [8, 32], strides = [1, 1]} : vector<8x96xf32> to vector<8x32xf32>
    %13 = vector.extract_strided_slice %8 {offsets = [0, 64], sizes = [8, 32], strides = [1, 1]} : vector<8x96xf32> to vector<8x32xf32>
    %14 = vector.extract_strided_slice %11 {offsets = [0, 0], sizes = [8, 8], strides = [1, 1]} : vector<8x32xf32> to vector<8x8xf32>
    %15 = vector.extract_strided_slice %11 {offsets = [0, 8], sizes = [8, 8], strides = [1, 1]} : vector<8x32xf32> to vector<8x8xf32>
    %16 = vector.extract_strided_slice %11 {offsets = [0, 16], sizes = [8, 8], strides = [1, 1]} : vector<8x32xf32> to vector<8x8xf32>
    %17 = vector.extract_strided_slice %11 {offsets = [0, 24], sizes = [8, 8], strides = [1, 1]} : vector<8x32xf32> to vector<8x8xf32>
    %18 = vector.shape_cast %14 : vector<8x8xf32> to vector<1x8x8xf32>
    %19 = vector.shape_cast %15 : vector<8x8xf32> to vector<1x8x8xf32>
    %20 = vector.shape_cast %16 : vector<8x8xf32> to vector<1x8x8xf32>
    %21 = vector.shape_cast %17 : vector<8x8xf32> to vector<1x8x8xf32>
    %22 = tpu.concatenate %18, %19, %20, %21 in 0 : vector<1x8x8xf32>, vector<1x8x8xf32>, vector<1x8x8xf32>, vector<1x8x8xf32> -> vector<4x8x8xf32>
    %23 = vector.extract_strided_slice %12 {offsets = [0, 0], sizes = [8, 8], strides = [1, 1]} : vector<8x32xf32> to vector<8x8xf32>
    %24 = vector.extract_strided_slice %12 {offsets = [0, 8], sizes = [8, 8], strides = [1, 1]} : vector<8x32xf32> to vector<8x8xf32>
    %25 = vector.extract_strided_slice %12 {offsets = [0, 16], sizes = [8, 8], strides = [1, 1]} : vector<8x32xf32> to vector<8x8xf32>
    %26 = vector.extract_strided_slice %12 {offsets = [0, 24], sizes = [8, 8], strides = [1, 1]} : vector<8x32xf32> to vector<8x8xf32>
    %27 = vector.shape_cast %23 : vector<8x8xf32> to vector<1x8x8xf32>
    %28 = vector.shape_cast %24 : vector<8x8xf32> to vector<1x8x8xf32>
    %29 = vector.shape_cast %25 : vector<8x8xf32> to vector<1x8x8xf32>
    %30 = vector.shape_cast %26 : vector<8x8xf32> to vector<1x8x8xf32>
    %31 = tpu.concatenate %27, %28, %29, %30 in 0 : vector<1x8x8xf32>, vector<1x8x8xf32>, vector<1x8x8xf32>, vector<1x8x8xf32> -> vector<4x8x8xf32>
    %32 = vector.extract_strided_slice %13 {offsets = [0, 0], sizes = [8, 8], strides = [1, 1]} : vector<8x32xf32> to vector<8x8xf32>
    %33 = vector.extract_strided_slice %13 {offsets = [0, 8], sizes = [8, 8], strides = [1, 1]} : vector<8x32xf32> to vector<8x8xf32>
    %34 = vector.extract_strided_slice %13 {offsets = [0, 16], sizes = [8, 8], strides = [1, 1]} : vector<8x32xf32> to vector<8x8xf32>
    %35 = vector.extract_strided_slice %13 {offsets = [0, 24], sizes = [8, 8], strides = [1, 1]} : vector<8x32xf32> to vector<8x8xf32>
    %36 = vector.shape_cast %32 : vector<8x8xf32> to vector<1x8x8xf32>
    %37 = vector.shape_cast %33 : vector<8x8xf32> to vector<1x8x8xf32>
    %38 = vector.shape_cast %34 : vector<8x8xf32> to vector<1x8x8xf32>
    %39 = vector.shape_cast %35 : vector<8x8xf32> to vector<1x8x8xf32>
    %40 = tpu.concatenate %36, %37, %38, %39 in 0 : vector<1x8x8xf32>, vector<1x8x8xf32>, vector<1x8x8xf32>, vector<1x8x8xf32> -> vector<4x8x8xf32>
    "tpu.trace_start"() <{level = 10 : i32, message = "hqd,hkd->hqk"}> : () -> ()
    %cst_10 = arith.constant dense<0.000000e+00> : vector<4x8x8xf32>
    %41 = tpu.matmul %22, %31, %cst_10 {dimension_numbers = #tpu.dot_dimension_numbers<[2], [2], [1], [1], [0, 0, 0, 1, 1, 1], [0], [0]>} : vector<4x8x8xf32>, vector<4x8x8xf32>, vector<4x8x8xf32> -> vector<4x8x8xf32>
    "tpu.trace_stop"() : () -> ()
    %42 = vector.shape_cast %3 : vector<1x8xf32> to vector<1x1x8xf32>
    %43 = vector.broadcast %42 : vector<1x1x8xf32> to vector<4x8x8xf32>
    %44 = arith.addf %41, %43 : vector<4x8x8xf32>
    %cst_11 = arith.constant dense<0xFF800000> : vector<4x8xf32>
    %45 = vector.multi_reduction <maximumf>, %44, %cst_11 [2] : vector<4x8x8xf32> to vector<4x8xf32>
    %46 = vector.shape_cast %45 : vector<4x8xf32> to vector<4x8x1xf32>
    %47 = vector.broadcast %46 : vector<4x8x1xf32> to vector<4x8x8xf32>
    %48 = arith.subf %44, %47 : vector<4x8x8xf32>
    %49 = math.exp %48 : vector<4x8x8xf32>
    %cst_12 = arith.constant dense<0.000000e+00> : vector<4x8xf32>
    %50 = vector.multi_reduction <add>, %49, %cst_12 [2] : vector<4x8x8xf32> to vector<4x8xf32>
    %51 = vector.shape_cast %50 : vector<4x8xf32> to vector<4x8x1xf32>
    %52 = tpu.reciprocal %51 : vector<4x8x1xf32> -> vector<4x8x1xf32>
    %53 = vector.broadcast %52 : vector<4x8x1xf32> to vector<4x8x8xf32>
    %54 = arith.mulf %49, %53 : vector<4x8x8xf32>
    "tpu.trace_start"() <{level = 10 : i32, message = "hqk,hkd->hqd"}> : () -> ()
    %cst_13 = arith.constant dense<0.000000e+00> : vector<4x8x8xf32>
    %55 = tpu.matmul %54, %40, %cst_13 {dimension_numbers = #tpu.dot_dimension_numbers<[2], [1], [1], [2], [0, 0, 0, 1, 1, 2], [0], [0]>} : vector<4x8x8xf32>, vector<4x8x8xf32>, vector<4x8x8xf32> -> vector<4x8x8xf32>
    "tpu.trace_stop"() : () -> ()
    %c0_14 = arith.constant 0 : index
    %c0_15 = arith.constant 0 : index
    %c0_16 = arith.constant 0 : index
    %56 = vector.load %arg5[%c0_14, %c0_15, %c0_16] : memref<4x8x32xf32, #tpu.memory_space<vmem>>, vector<4x8x32xf32>
    "tpu.trace_start"() <{level = 10 : i32, message = "hsd,hdo->hso"}> : () -> ()
    %cst_17 = arith.constant dense<0.000000e+00> : vector<4x8x32xf32>
    %57 = tpu.matmul %55, %56, %cst_17 {dimension_numbers = #tpu.dot_dimension_numbers<[2], [1], [1], [2], [0, 0, 0, 1, 1, 2], [0], [0]>} : vector<4x8x8xf32>, vector<4x8x32xf32>, vector<4x8x32xf32> -> vector<4x8x32xf32>
    "tpu.trace_stop"() : () -> ()
    %cst_18 = arith.constant dense<0.000000e+00> : vector<8x32xf32>
    %58 = vector.multi_reduction <add>, %57, %cst_18 [0] : vector<4x8x32xf32> to vector<8x32xf32>
    %c0_19 = arith.constant 0 : index
    %c0_20 = arith.constant 0 : index
    %59 = vector.load %arg6[%c0_19, %c0_20] : memref<1x32xf32, #tpu.memory_space<vmem>>, vector<1x32xf32>
    %60 = vector.broadcast %59 : vector<1x32xf32> to vector<8x32xf32>
    %61 = arith.addf %58, %60 : vector<8x32xf32>
    %62 = arith.addf %61, %1 : vector<8x32xf32>
    %c0_21 = arith.constant 0 : index
    %c0_22 = arith.constant 0 : index
    %63 = vector.load %arg7[%c0_21, %c0_22] : memref<1x32xf32, #tpu.memory_space<vmem>>, vector<1x32xf32>
    %c0_23 = arith.constant 0 : index
    %c0_24 = arith.constant 0 : index
    %64 = vector.load %arg8[%c0_23, %c0_24] : memref<1x32xf32, #tpu.memory_space<vmem>>, vector<1x32xf32>
    %cst_25 = arith.constant dense<0.000000e+00> : vector<8xf32>
    %65 = vector.multi_reduction <add>, %62, %cst_25 [1] : vector<8x32xf32> to vector<8xf32>
    %66 = vector.shape_cast %65 : vector<8xf32> to vector<8x1xf32>
    %cst_26 = arith.constant 3.200000e+01 : f32
    %67 = vector.broadcast %cst_26 : f32 to vector<8x1xf32>
    %68 = arith.divf %66, %67 : vector<8x1xf32>
    %69 = vector.broadcast %68 : vector<8x1xf32> to vector<8x32xf32>
    %70 = arith.subf %62, %69 : vector<8x32xf32>
    %71 = arith.mulf %70, %70 : vector<8x32xf32>
    %cst_27 = arith.constant dense<0.000000e+00> : vector<8xf32>
    %72 = vector.multi_reduction <add>, %71, %cst_27 [1] : vector<8x32xf32> to vector<8xf32>
    %73 = vector.shape_cast %72 : vector<8xf32> to vector<8x1xf32>
    %cst_28 = arith.constant 3.200000e+01 : f32
    %74 = vector.broadcast %cst_28 : f32 to vector<8x1xf32>
    %75 = arith.divf %73, %74 : vector<8x1xf32>
    %76 = vector.broadcast %68 : vector<8x1xf32> to vector<8x32xf32>
    %77 = arith.subf %62, %76 : vector<8x32xf32>
    %cst_29 = arith.constant 9.99999996E-13 : f32
    %78 = vector.broadcast %cst_29 : f32 to vector<8x1xf32>
    %79 = arith.addf %75, %78 : vector<8x1xf32>
    %80 = math.rsqrt %79 : vector<8x1xf32>
    %81 = vector.broadcast %80 : vector<8x1xf32> to vector<8x32xf32>
    %82 = arith.mulf %77, %81 : vector<8x32xf32>
    %83 = vector.broadcast %63 : vector<1x32xf32> to vector<8x32xf32>
    %84 = arith.mulf %82, %83 : vector<8x32xf32>
    %85 = vector.broadcast %64 : vector<1x32xf32> to vector<8x32xf32>
    %86 = arith.addf %84, %85 : vector<8x32xf32>
    %c0_30 = arith.constant 0 : index
    %c0_31 = arith.constant 0 : index
    %87 = vector.load %arg9[%c0_30, %c0_31] : memref<32x64xf32, #tpu.memory_space<vmem>>, vector<32x64xf32>
    %cst_32 = arith.constant dense<0.000000e+00> : vector<8x64xf32>
    %88 = tpu.matmul %86, %87, %cst_32 {dimension_numbers = #tpu.dot_dimension_numbers<[1], [0], [0], [1], [0, 0, 1, 1], [], []>} : vector<8x32xf32>, vector<32x64xf32>, vector<8x64xf32> -> vector<8x64xf32>
    %c0_33 = arith.constant 0 : index
    %c0_34 = arith.constant 0 : index
    %89 = vector.load %arg10[%c0_33, %c0_34] : memref<1x64xf32, #tpu.memory_space<vmem>>, vector<1x64xf32>
    %90 = vector.broadcast %89 : vector<1x64xf32> to vector<8x64xf32>
    %91 = arith.addf %88, %90 : vector<8x64xf32>
    %cst_35 = arith.constant 5.000000e-01 : f32
    %92 = vector.broadcast %cst_35 : f32 to vector<8x64xf32>
    %93 = arith.mulf %92, %91 : vector<8x64xf32>
    %cst_36 = arith.constant 1.41421354 : f32
    %94 = vector.broadcast %cst_36 : f32 to vector<8x64xf32>
    %95 = arith.divf %91, %94 : vector<8x64xf32>
    %96 = math.erf %95 : vector<8x64xf32>
    %cst_37 = arith.constant 1.000000e+00 : f32
    %97 = vector.broadcast %cst_37 : f32 to vector<8x64xf32>
    %98 = arith.addf %97, %96 : vector<8x64xf32>
    %99 = arith.mulf %93, %98 : vector<8x64xf32>
    %c0_38 = arith.constant 0 : index
    %c0_39 = arith.constant 0 : index
    %100 = vector.load %arg11[%c0_38, %c0_39] : memref<64x32xf32, #tpu.memory_space<vmem>>, vector<64x32xf32>
    %cst_40 = arith.constant dense<0.000000e+00> : vector<8x32xf32>
    %101 = tpu.matmul %99, %100, %cst_40 {dimension_numbers = #tpu.dot_dimension_numbers<[1], [0], [0], [1], [0, 0, 1, 1], [], []>} : vector<8x64xf32>, vector<64x32xf32>, vector<8x32xf32> -> vector<8x32xf32>
    %c0_41 = arith.constant 0 : index
    %c0_42 = arith.constant 0 : index
    %102 = vector.load %arg12[%c0_41, %c0_42] : memref<1x32xf32, #tpu.memory_space<vmem>>, vector<1x32xf32>
    %103 = vector.broadcast %102 : vector<1x32xf32> to vector<8x32xf32>
    %104 = arith.addf %101, %103 : vector<8x32xf32>
    %105 = arith.addf %104, %86 : vector<8x32xf32>
    %c0_43 = arith.constant 0 : index
    %c0_44 = arith.constant 0 : index
    %106 = vector.load %arg13[%c0_43, %c0_44] : memref<1x32xf32, #tpu.memory_space<vmem>>, vector<1x32xf32>
    %c0_45 = arith.constant 0 : index
    %c0_46 = arith.constant 0 : index
    %107 = vector.load %arg14[%c0_45, %c0_46] : memref<1x32xf32, #tpu.memory_space<vmem>>, vector<1x32xf32>
    %cst_47 = arith.constant dense<0.000000e+00> : vector<8xf32>
    %108 = vector.multi_reduction <add>, %105, %cst_47 [1] : vector<8x32xf32> to vector<8xf32>
    %109 = vector.shape_cast %108 : vector<8xf32> to vector<8x1xf32>
    %cst_48 = arith.constant 3.200000e+01 : f32
    %110 = vector.broadcast %cst_48 : f32 to vector<8x1xf32>
    %111 = arith.divf %109, %110 : vector<8x1xf32>
    %112 = vector.broadcast %111 : vector<8x1xf32> to vector<8x32xf32>
    %113 = arith.subf %105, %112 : vector<8x32xf32>
    %114 = arith.mulf %113, %113 : vector<8x32xf32>
    %cst_49 = arith.constant dense<0.000000e+00> : vector<8xf32>
    %115 = vector.multi_reduction <add>, %114, %cst_49 [1] : vector<8x32xf32> to vector<8xf32>
    %116 = vector.shape_cast %115 : vector<8xf32> to vector<8x1xf32>
    %cst_50 = arith.constant 3.200000e+01 : f32
    %117 = vector.broadcast %cst_50 : f32 to vector<8x1xf32>
    %118 = arith.divf %116, %117 : vector<8x1xf32>
    %119 = vector.broadcast %111 : vector<8x1xf32> to vector<8x32xf32>
    %120 = arith.subf %105, %119 : vector<8x32xf32>
    %cst_51 = arith.constant 9.99999996E-13 : f32
    %121 = vector.broadcast %cst_51 : f32 to vector<8x1xf32>
    %122 = arith.addf %118, %121 : vector<8x1xf32>
    %123 = math.rsqrt %122 : vector<8x1xf32>
    %124 = vector.broadcast %123 : vector<8x1xf32> to vector<8x32xf32>
    %125 = arith.mulf %120, %124 : vector<8x32xf32>
    %126 = vector.broadcast %106 : vector<1x32xf32> to vector<8x32xf32>
    %127 = arith.mulf %125, %126 : vector<8x32xf32>
    %128 = vector.broadcast %107 : vector<1x32xf32> to vector<8x32xf32>
    %129 = arith.addf %127, %128 : vector<8x32xf32>
    %c0_52 = arith.constant 0 : index
    %c0_53 = arith.constant 0 : index
    %c0_54 = arith.constant 0 : index
    %130 = vector.load %arg15[%c0_52, %c0_53, %c0_54] : memref<1x8x32xf32, #tpu.memory_space<vmem>>, vector<1x8x32xf32>
    %131 = vector.shape_cast %130 : vector<1x8x32xf32> to vector<8x32xf32>
    %132 = vector.shape_cast %129 : vector<8x32xf32> to vector<1x8x32xf32>
    tpu.vector_store %arg15[%c0_52, %c0_53, %c0_54], %132 {strides = array<i32>} : memref<1x8x32xf32, #tpu.memory_space<vmem>>, vector<1x8x32xf32>,
    return
  }
  func.func @transform_0(%arg0: i32) -> (i32, i32, i32) {
    %c0_i32 = arith.constant 0 : i32
    %c0_i32_0 = arith.constant 0 : i32
    %c0_i32_1 = arith.constant 0 : i32
    return %arg0, %c0_i32, %c0_i32_0 : i32, i32, i32
  }
  func.func @transform_1(%arg0: i32) -> (i32, i32, i32) {
    %c0_i32 = arith.constant 0 : i32
    %c0_i32_0 = arith.constant 0 : i32
    %c0_i32_1 = arith.constant 0 : i32
    return %arg0, %c0_i32, %c0_i32_0 : i32, i32, i32
  }
  func.func @transform_2(%arg0: i32) -> (i32, i32) {
    %c0_i32 = arith.constant 0 : i32
    %c0_i32_0 = arith.constant 0 : i32
    %c0_i32_1 = arith.constant 0 : i32
    return %c0_i32, %c0_i32_0 : i32, i32
  }
  func.func @transform_3(%arg0: i32) -> (i32, i32) {
    %c0_i32 = arith.constant 0 : i32
    %c0_i32_0 = arith.constant 0 : i32
    %c0_i32_1 = arith.constant 0 : i32
    return %c0_i32, %c0_i32_0 : i32, i32
  }
  func.func @transform_4(%arg0: i32) -> (i32, i32, i32) {
    %c0_i32 = arith.constant 0 : i32
    %c0_i32_0 = arith.constant 0 : i32
    %c0_i32_1 = arith.constant 0 : i32
    %c0_i32_2 = arith.constant 0 : i32
    return %c0_i32, %c0_i32_0, %c0_i32_1 : i32, i32, i32
  }
  func.func @transform_5(%arg0: i32) -> (i32, i32) {
    %c0_i32 = arith.constant 0 : i32
    %c0_i32_0 = arith.constant 0 : i32
    %c0_i32_1 = arith.constant 0 : i32
    return %c0_i32, %c0_i32_0 : i32, i32
  }
  func.func @transform_6(%arg0: i32) -> (i32, i32) {
    %c0_i32 = arith.constant 0 : i32
    %c0_i32_0 = arith.constant 0 : i32
    %c0_i32_1 = arith.constant 0 : i32
    return %c0_i32, %c0_i32_0 : i32, i32
  }
  func.func @transform_7(%arg0: i32) -> (i32, i32) {
    %c0_i32 = arith.constant 0 : i32
    %c0_i32_0 = arith.constant 0 : i32
    %c0_i32_1 = arith.constant 0 : i32
    return %c0_i32, %c0_i32_0 : i32, i32
  }
  func.func @transform_8(%arg0: i32) -> (i32, i32) {
    %c0_i32 = arith.constant 0 : i32
    %c0_i32_0 = arith.constant 0 : i32
    %c0_i32_1 = arith.constant 0 : i32
    return %c0_i32, %c0_i32_0 : i32, i32
  }
  func.func @transform_9(%arg0: i32) -> (i32, i32) {
    %c0_i32 = arith.constant 0 : i32
    %c0_i32_0 = arith.constant 0 : i32
    %c0_i32_1 = arith.constant 0 : i32
    return %c0_i32, %c0_i32_0 : i32, i32
  }
  func.func @transform_10(%arg0: i32) -> (i32, i32) {
    %c0_i32 = arith.constant 0 : i32
    %c0_i32_0 = arith.constant 0 : i32
    %c0_i32_1 = arith.constant 0 : i32
    return %c0_i32, %c0_i32_0 : i32, i32
  }
  func.func @transform_11(%arg0: i32) -> (i32, i32) {
    %c0_i32 = arith.constant 0 : i32
    %c0_i32_0 = arith.constant 0 : i32
    %c0_i32_1 = arith.constant 0 : i32
    return %c0_i32, %c0_i32_0 : i32, i32
  }
  func.func @transform_12(%arg0: i32) -> (i32, i32) {
    %c0_i32 = arith.constant 0 : i32
    %c0_i32_0 = arith.constant 0 : i32
    %c0_i32_1 = arith.constant 0 : i32
    return %c0_i32, %c0_i32_0 : i32, i32
  }
  func.func @transform_13(%arg0: i32) -> (i32, i32) {
    %c0_i32 = arith.constant 0 : i32
    %c0_i32_0 = arith.constant 0 : i32
    %c0_i32_1 = arith.constant 0 : i32
    return %c0_i32, %c0_i32_0 : i32, i32
  }
  func.func @transform_14(%arg0: i32) -> (i32, i32, i32) {
    %c0_i32 = arith.constant 0 : i32
    %c0_i32_0 = arith.constant 0 : i32
    %c0_i32_1 = arith.constant 0 : i32
    return %arg0, %c0_i32, %c0_i32_0 : i32, i32, i32
  }
}

module attributes {stable_mosaic.version = 11 : i64} {
  func.func @transformer_block_kernel(%arg0: i32, %arg1: memref<1x8x32xf32, #tpu.memory_space<vmem>>, %arg2: memref<1x1x8xf32, #tpu.memory_space<vmem>>, %arg3: memref<32x96xf32, #tpu.memory_space<vmem>>, %arg4: memref<1x96xf32, #tpu.memory_space<vmem>>, %arg5: memref<4x8x32xf32, #tpu.memory_space<vmem>>, %arg6: memref<1x32xf32, #tpu.memory_space<vmem>>, %arg7: memref<1x32xf32, #tpu.memory_space<vmem>>, %arg8: memref<1x32xf32, #tpu.memory_space<vmem>>, %arg9: memref<32x64xf32, #tpu.memory_space<vmem>>, %arg10: memref<1x64xf32, #tpu.memory_space<vmem>>, %arg11: memref<64x32xf32, #tpu.memory_space<vmem>>, %arg12: memref<1x32xf32, #tpu.memory_space<vmem>>, %arg13: memref<1x32xf32, #tpu.memory_space<vmem>>, %arg14: memref<1x32xf32, #tpu.memory_space<vmem>>, %arg15: memref<1x8x32xf32, #tpu.memory_space<vmem>>) attributes {dimension_semantics = [#tpu.dimension_semantics<parallel>], iteration_bounds = array<i64: 2>, scalar_prefetch = 0 : i64, scratch_operands = 0 : i64, tpu.core_type = #tpu.core_type<tc>, window_params = [{transform_indices = @transform_0, window_bounds = array<i64: 1, 8, 32>}, {transform_indices = @transform_1, window_bounds = array<i64: 1, 1, 8>}, {pipeline_mode = #tpu.pipeline_mode<synchronous>, transform_indices = @transform_2, window_bounds = array<i64: 32, 96>}, {pipeline_mode = #tpu.pipeline_mode<synchronous>, transform_indices = @transform_3, window_bounds = array<i64: 1, 96>}, {pipeline_mode = #tpu.pipeline_mode<synchronous>, transform_indices = @transform_4, window_bounds = array<i64: 4, 8, 32>}, {pipeline_mode = #tpu.pipeline_mode<synchronous>, transform_indices = @transform_5, window_bounds = array<i64: 1, 32>}, {pipeline_mode = #tpu.pipeline_mode<synchronous>, transform_indices = @transform_6, window_bounds = array<i64: 1, 32>}, {pipeline_mode = #tpu.pipeline_mode<synchronous>, transform_indices = @transform_7, window_bounds = array<i64: 1, 32>}, {pipeline_mode = #tpu.pipeline_mode<synchronous>, transform_indices = @transform_8, window_bounds = array<i64: 32, 64>}, {pipeline_mode = #tpu.pipeline_mode<synchronous>, transform_indices = @transform_9, window_bounds = array<i64: 1, 64>}, {pipeline_mode = #tpu.pipeline_mode<synchronous>, transform_indices = @transform_10, window_bounds = array<i64: 64, 32>}, {pipeline_mode = #tpu.pipeline_mode<synchronous>, transform_indices = @transform_11, window_bounds = array<i64: 1, 32>}, {pipeline_mode = #tpu.pipeline_mode<synchronous>, transform_indices = @transform_12, window_bounds = array<i64: 1, 32>}, {pipeline_mode = #tpu.pipeline_mode<synchronous>, transform_indices = @transform_13, window_bounds = array<i64: 1, 32>}, {transform_indices = @transform_14, window_bounds = array<i64: 1, 8, 32>}]} {
    %c0 = arith.constant 0 : index
    %c0_0 = arith.constant 0 : index
    %c0_1 = arith.constant 0 : index
    %0 = vector.load %arg1[%c0, %c0_0, %c0_1] : memref<1x8x32xf32, #tpu.memory_space<vmem>>, vector<1x8x32xf32>
    %1 = vector.shape_cast %0 : vector<1x8x32xf32> to vector<8x32xf32>
    %c0_2 = arith.constant 0 : index
    %c0_3 = arith.constant 0 : index
    %c0_4 = arith.constant 0 : index
    %2 = vector.load %arg2[%c0_2, %c0_3, %c0_4] : memref<1x1x8xf32, #tpu.memory_space<vmem>>, vector<1x1x8xf32>
    %3 = vector.shape_cast %2 : vector<1x1x8xf32> to vector<1x8xf32>
    %c0_5 = arith.constant 0 : index
    %c0_6 = arith.constant 0 : index
    %4 = vector.load %arg3[%c0_5, %c0_6] : memref<32x96xf32, #tpu.memory_space<vmem>>, vector<32x96xf32>
    %cst = arith.constant dense<0.000000e+00> : vector<8x96xf32>
    %5 = tpu.matmul %1, %4, %cst {dimension_numbers = #tpu.dot_dimension_numbers<[1], [0], [0], [1], [0, 0, 1, 1], [], []>} : vector<8x32xf32>, vector<32x96xf32>, vector<8x96xf32> -> vector<8x96xf32>
    %c0_7 = arith.constant 0 : index
    %c0_8 = arith.constant 0 : index
    %6 = vector.load %arg4[%c0_7, %c0_8] : memref<1x96xf32, #tpu.memory_space<vmem>>, vector<1x96xf32>
    %7 = vector.broadcast %6 : vector<1x96xf32> to vector<8x96xf32>
    %8 = arith.addf %5, %7 : vector<8x96xf32>
    %9 = vector.extract_strided_slice %8 {offsets = [0, 0], sizes = [8, 32], strides = [1, 1]} : vector<8x96xf32> to vector<8x32xf32>
    %cst_9 = arith.constant 0.353553385 : f32
    %10 = vector.broadcast %cst_9 : f32 to vector<8x32xf32>
    %11 = arith.mulf %9, %10 : vector<8x32xf32>
    %12 = vector.extract_strided_slice %8 {offsets = [0, 32], sizes = [8, 32], strides = [1, 1]} : vector<8x96xf32> to vector<8x32xf32>
    %13 = vector.extract_strided_slice %8 {offsets = [0, 64], sizes = [8, 32], strides = [1, 1]} : vector<8x96xf32> to vector<8x32xf32>
    %14 = vector.extract_strided_slice %11 {offsets = [0, 0], sizes = [8, 8], strides = [1, 1]} : vector<8x32xf32> to vector<8x8xf32>
    %15 = vector.extract_strided_slice %11 {offsets = [0, 8], sizes = [8, 8], strides = [1, 1]} : vector<8x32xf32> to vector<8x8xf32>
    %16 = vector.extract_strided_slice %11 {offsets = [0, 16], sizes = [8, 8], strides = [1, 1]} : vector<8x32xf32> to vector<8x8xf32>
    %17 = vector.extract_strided_slice %11 {offsets = [0, 24], sizes = [8, 8], strides = [1, 1]} : vector<8x32xf32> to vector<8x8xf32>
    %18 = vector.shape_cast %14 : vector<8x8xf32> to vector<1x8x8xf32>
    %19 = vector.shape_cast %15 : vector<8x8xf32> to vector<1x8x8xf32>
    %20 = vector.shape_cast %16 : vector<8x8xf32> to vector<1x8x8xf32>
    %21 = vector.shape_cast %17 : vector<8x8xf32> to vector<1x8x8xf32>
    %22 = tpu.concatenate %18, %19, %20, %21 in 0 : vector<1x8x8xf32>, vector<1x8x8xf32>, vector<1x8x8xf32>, vector<1x8x8xf32> -> vector<4x8x8xf32>
    %23 = vector.extract_strided_slice %12 {offsets = [0, 0], sizes = [8, 8], strides = [1, 1]} : vector<8x32xf32> to vector<8x8xf32>
    %24 = vector.extract_strided_slice %12 {offsets = [0, 8], sizes = [8, 8], strides = [1, 1]} : vector<8x32xf32> to vector<8x8xf32>
    %25 = vector.extract_strided_slice %12 {offsets = [0, 16], sizes = [8, 8], strides = [1, 1]} : vector<8x32xf32> to vector<8x8xf32>
    %26 = vector.extract_strided_slice %12 {offsets = [0, 24], sizes = [8, 8], strides = [1, 1]} : vector<8x32xf32> to vector<8x8xf32>
    %27 = vector.shape_cast %23 : vector<8x8xf32> to vector<1x8x8xf32>
    %28 = vector.shape_cast %24 : vector<8x8xf32> to vector<1x8x8xf32>
    %29 = vector.shape_cast %25 : vector<8x8xf32> to vector<1x8x8xf32>
    %30 = vector.shape_cast %26 : vector<8x8xf32> to vector<1x8x8xf32>
    %31 = tpu.concatenate %27, %28, %29, %30 in 0 : vector<1x8x8xf32>, vector<1x8x8xf32>, vector<1x8x8xf32>, vector<1x8x8xf32> -> vector<4x8x8xf32>
    %32 = vector.extract_strided_slice %13 {offsets = [0, 0], sizes = [8, 8], strides = [1, 1]} : vector<8x32xf32> to vector<8x8xf32>
    %33 = vector.extract_strided_slice %13 {offsets = [0, 8], sizes = [8, 8], strides = [1, 1]} : vector<8x32xf32> to vector<8x8xf32>
    %34 = vector.extract_strided_slice %13 {offsets = [0, 16], sizes = [8, 8], strides = [1, 1]} : vector<8x32xf32> to vector<8x8xf32>
    %35 = vector.extract_strided_slice %13 {offsets = [0, 24], sizes = [8, 8], strides = [1, 1]} : vector<8x32xf32> to vector<8x8xf32>
    %36 = vector.shape_cast %32 : vector<8x8xf32> to vector<1x8x8xf32>
    %37 = vector.shape_cast %33 : vector<8x8xf32> to vector<1x8x8xf32>
    %38 = vector.shape_cast %34 : vector<8x8xf32> to vector<1x8x8xf32>
    %39 = vector.shape_cast %35 : vector<8x8xf32> to vector<1x8x8xf32>
    %40 = tpu.concatenate %36, %37, %38, %39 in 0 : vector<1x8x8xf32>, vector<1x8x8xf32>, vector<1x8x8xf32>, vector<1x8x8xf32> -> vector<4x8x8xf32>
    "tpu.trace_start"() <{level = 10 : i32, message = "hqd,hkd->hqk"}> : () -> ()
    %cst_10 = arith.constant dense<0.000000e+00> : vector<4x8x8xf32>
    %41 = tpu.matmul %22, %31, %cst_10 {dimension_numbers = #tpu.dot_dimension_numbers<[2], [2], [1], [1], [0, 0, 0, 1, 1, 1], [0], [0]>} : vector<4x8x8xf32>, vector<4x8x8xf32>, vector<4x8x8xf32> -> vector<4x8x8xf32>
    "tpu.trace_stop"() : () -> ()
    %42 = vector.shape_cast %3 : vector<1x8xf32> to vector<1x1x8xf32>
    %43 = vector.broadcast %42 : vector<1x1x8xf32> to vector<4x8x8xf32>
    %44 = arith.addf %41, %43 : vector<4x8x8xf32>
    %cst_11 = arith.constant dense<0xFF800000> : vector<4x8xf32>
    %45 = vector.multi_reduction <maximumf>, %44, %cst_11 [2] : vector<4x8x8xf32> to vector<4x8xf32>
    %46 = vector.shape_cast %45 : vector<4x8xf32> to vector<4x8x1xf32>
    %47 = vector.broadcast %46 : vector<4x8x1xf32> to vector<4x8x8xf32>
    %48 = arith.subf %44, %47 : vector<4x8x8xf32>
    %49 = math.exp %48 : vector<4x8x8xf32>
    %cst_12 = arith.constant dense<0.000000e+00> : vector<4x8xf32>
    %50 = vector.multi_reduction <add>, %49, %cst_12 [2] : vector<4x8x8xf32> to vector<4x8xf32>
    %51 = vector.shape_cast %50 : vector<4x8xf32> to vector<4x8x1xf32>
    %52 = tpu.reciprocal %51 : vector<4x8x1xf32> -> vector<4x8x1xf32>
    %53 = vector.broadcast %52 : vector<4x8x1xf32> to vector<4x8x8xf32>
    %54 = arith.mulf %49, %53 : vector<4x8x8xf32>
    "tpu.trace_start"() <{level = 10 : i32, message = "hqk,hkd->hqd"}> : () -> ()
    %cst_13 = arith.constant dense<0.000000e+00> : vector<4x8x8xf32>
    %55 = tpu.matmul %54, %40, %cst_13 {dimension_numbers = #tpu.dot_dimension_numbers<[2], [1], [1], [2], [0, 0, 0, 1, 1, 2], [0], [0]>} : vector<4x8x8xf32>, vector<4x8x8xf32>, vector<4x8x8xf32> -> vector<4x8x8xf32>
    "tpu.trace_stop"() : () -> ()
    %c0_14 = arith.constant 0 : index
    %c0_15 = arith.constant 0 : index
    %c0_16 = arith.constant 0 : index
    %56 = vector.load %arg5[%c0_14, %c0_15, %c0_16] : memref<4x8x32xf32, #tpu.memory_space<vmem>>, vector<4x8x32xf32>
    "tpu.trace_start"() <{level = 10 : i32, message = "hsd,hdo->hso"}> : () -> ()
    %cst_17 = arith.constant dense<0.000000e+00> : vector<4x8x32xf32>
    %57 = tpu.matmul %55, %56, %cst_17 {dimension_numbers = #tpu.dot_dimension_numbers<[2], [1], [1], [2], [0, 0, 0, 1, 1, 2], [0], [0]>} : vector<4x8x8xf32>, vector<4x8x32xf32>, vector<4x8x32xf32> -> vector<4x8x32xf32>
    "tpu.trace_stop"() : () -> ()
    %cst_18 = arith.constant dense<0.000000e+00> : vector<8x32xf32>
    %58 = vector.multi_reduction <add>, %57, %cst_18 [0] : vector<4x8x32xf32> to vector<8x32xf32>
    %c0_19 = arith.constant 0 : index
    %c0_20 = arith.constant 0 : index
    %59 = vector.load %arg6[%c0_19, %c0_20] : memref<1x32xf32, #tpu.memory_space<vmem>>, vector<1x32xf32>
    %60 = vector.broadcast %59 : vector<1x32xf32> to vector<8x32xf32>
    %61 = arith.addf %58, %60 : vector<8x32xf32>
    %62 = arith.addf %61, %1 : vector<8x32xf32>
    %c0_21 = arith.constant 0 : index
    %c0_22 = arith.constant 0 : index
    %63 = vector.load %arg7[%c0_21, %c0_22] : memref<1x32xf32, #tpu.memory_space<vmem>>, vector<1x32xf32>
    %c0_23 = arith.constant 0 : index
    %c0_24 = arith.constant 0 : index
    %64 = vector.load %arg8[%c0_23, %c0_24] : memref<1x32xf32, #tpu.memory_space<vmem>>, vector<1x32xf32>
    %cst_25 = arith.constant dense<0.000000e+00> : vector<8xf32>
    %65 = vector.multi_reduction <add>, %62, %cst_25 [1] : vector<8x32xf32> to vector<8xf32>
    %66 = vector.shape_cast %65 : vector<8xf32> to vector<8x1xf32>
    %cst_26 = arith.constant 3.200000e+01 : f32
    %67 = vector.broadcast %cst_26 : f32 to vector<8x1xf32>
    %68 = arith.divf %66, %67 : vector<8x1xf32>
    %69 = vector.broadcast %68 : vector<8x1xf32> to vector<8x32xf32>
    %70 = arith.subf %62, %69 : vector<8x32xf32>
    %71 = arith.mulf %70, %70 : vector<8x32xf32>
    %cst_27 = arith.constant dense<0.000000e+00> : vector<8xf32>
    %72 = vector.multi_reduction <add>, %71, %cst_27 [1] : vector<8x32xf32> to vector<8xf32>
    %73 = vector.shape_cast %72 : vector<8xf32> to vector<8x1xf32>
    %cst_28 = arith.constant 3.200000e+01 : f32
    %74 = vector.broadcast %cst_28 : f32 to vector<8x1xf32>
    %75 = arith.divf %73, %74 : vector<8x1xf32>
    %76 = vector.broadcast %68 : vector<8x1xf32> to vector<8x32xf32>
    %77 = arith.subf %62, %76 : vector<8x32xf32>
    %cst_29 = arith.constant 9.99999996E-13 : f32
    %78 = vector.broadcast %cst_29 : f32 to vector<8x1xf32>
    %79 = arith.addf %75, %78 : vector<8x1xf32>
    %80 = math.rsqrt %79 : vector<8x1xf32>
    %81 = vector.broadcast %80 : vector<8x1xf32> to vector<8x32xf32>
    %82 = arith.mulf %77, %81 : vector<8x32xf32>
    %83 = vector.broadcast %63 : vector<1x32xf32> to vector<8x32xf32>
    %84 = arith.mulf %82, %83 : vector<8x32xf32>
    %85 = vector.broadcast %64 : vector<1x32xf32> to vector<8x32xf32>
    %86 = arith.addf %84, %85 : vector<8x32xf32>
    %c0_30 = arith.constant 0 : index
    %c0_31 = arith.constant 0 : index
    %87 = vector.load %arg9[%c0_30, %c0_31] : memref<32x64xf32, #tpu.memory_space<vmem>>, vector<32x64xf32>
    %cst_32 = arith.constant dense<0.000000e+00> : vector<8x64xf32>
    %88 = tpu.matmul %86, %87, %cst_32 {dimension_numbers = #tpu.dot_dimension_numbers<[1], [0], [0], [1], [0, 0, 1, 1], [], []>} : vector<8x32xf32>, vector<32x64xf32>, vector<8x64xf32> -> vector<8x64xf32>
    %c0_33 = arith.constant 0 : index
    %c0_34 = arith.constant 0 : index
    %89 = vector.load %arg10[%c0_33, %c0_34] : memref<1x64xf32, #tpu.memory_space<vmem>>, vector<1x64xf32>
    %90 = vector.broadcast %89 : vector<1x64xf32> to vector<8x64xf32>
    %91 = arith.addf %88, %90 : vector<8x64xf32>
    %cst_35 = arith.constant 5.000000e-01 : f32
    %92 = vector.broadcast %cst_35 : f32 to vector<8x64xf32>
    %93 = arith.mulf %92, %91 : vector<8x64xf32>
    %cst_36 = arith.constant 1.41421354 : f32
    %94 = vector.broadcast %cst_36 : f32 to vector<8x64xf32>
    %95 = arith.divf %91, %94 : vector<8x64xf32>
    %96 = math.erf %95 : vector<8x64xf32>
    %cst_37 = arith.constant 1.000000e+00 : f32
    %97 = vector.broadcast %cst_37 : f32 to vector<8x64xf32>
    %98 = arith.addf %97, %96 : vector<8x64xf32>
    %99 = arith.mulf %93, %98 : vector<8x64xf32>
    %c0_38 = arith.constant 0 : index
    %c0_39 = arith.constant 0 : index
    %100 = vector.load %arg11[%c0_38, %c0_39] : memref<64x32xf32, #tpu.memory_space<vmem>>, vector<64x32xf32>
    %cst_40 = arith.constant dense<0.000000e+00> : vector<8x32xf32>
    %101 = tpu.matmul %99, %100, %cst_40 {dimension_numbers = #tpu.dot_dimension_numbers<[1], [0], [0], [1], [0, 0, 1, 1], [], []>} : vector<8x64xf32>, vector<64x32xf32>, vector<8x32xf32> -> vector<8x32xf32>
    %c0_41 = arith.constant 0 : index
    %c0_42 = arith.constant 0 : index
    %102 = vector.load %arg12[%c0_41, %c0_42] : memref<1x32xf32, #tpu.memory_space<vmem>>, vector<1x32xf32>
    %103 = vector.broadcast %102 : vector<1x32xf32> to vector<8x32xf32>
    %104 = arith.addf %101, %103 : vector<8x32xf32>
    %105 = arith.addf %104, %86 : vector<8x32xf32>
    %c0_43 = arith.constant 0 : index
    %c0_44 = arith.constant 0 : index
    %106 = vector.load %arg13[%c0_43, %c0_44] : memref<1x32xf32, #tpu.memory_space<vmem>>, vector<1x32xf32>
    %c0_45 = arith.constant 0 : index
    %c0_46 = arith.constant 0 : index
    %107 = vector.load %arg14[%c0_45, %c0_46] : memref<1x32xf32, #tpu.memory_space<vmem>>, vector<1x32xf32>
    %cst_47 = arith.constant dense<0.000000e+00> : vector<8xf32>
    %108 = vector.multi_reduction <add>, %105, %cst_47 [1] : vector<8x32xf32> to vector<8xf32>
    %109 = vector.shape_cast %108 : vector<8xf32> to vector<8x1xf32>
    %cst_48 = arith.constant 3.200000e+01 : f32
    %110 = vector.broadcast %cst_48 : f32 to vector<8x1xf32>
    %111 = arith.divf %109, %110 : vector<8x1xf32>
    %112 = vector.broadcast %111 : vector<8x1xf32> to vector<8x32xf32>
    %113 = arith.subf %105, %112 : vector<8x32xf32>
    %114 = arith.mulf %113, %113 : vector<8x32xf32>
    %cst_49 = arith.constant dense<0.000000e+00> : vector<8xf32>
    %115 = vector.multi_reduction <add>, %114, %cst_49 [1] : vector<8x32xf32> to vector<8xf32>
    %116 = vector.shape_cast %115 : vector<8xf32> to vector<8x1xf32>
    %cst_50 = arith.constant 3.200000e+01 : f32
    %117 = vector.broadcast %cst_50 : f32 to vector<8x1xf32>
    %118 = arith.divf %116, %117 : vector<8x1xf32>
    %119 = vector.broadcast %111 : vector<8x1xf32> to vector<8x32xf32>
    %120 = arith.subf %105, %119 : vector<8x32xf32>
    %cst_51 = arith.constant 9.99999996E-13 : f32
    %121 = vector.broadcast %cst_51 : f32 to vector<8x1xf32>
    %122 = arith.addf %118, %121 : vector<8x1xf32>
    %123 = math.rsqrt %122 : vector<8x1xf32>
    %124 = vector.broadcast %123 : vector<8x1xf32> to vector<8x32xf32>
    %125 = arith.mulf %120, %124 : vector<8x32xf32>
    %126 = vector.broadcast %106 : vector<1x32xf32> to vector<8x32xf32>
    %127 = arith.mulf %125, %126 : vector<8x32xf32>
    %128 = vector.broadcast %107 : vector<1x32xf32> to vector<8x32xf32>
    %129 = arith.addf %127, %128 : vector<8x32xf32>
    %c0_52 = arith.constant 0 : index
    %c0_53 = arith.constant 0 : index
    %c0_54 = arith.constant 0 : index
    %130 = vector.load %arg15[%c0_52, %c0_53, %c0_54] : memref<1x8x32xf32, #tpu.memory_space<vmem>>, vector<1x8x32xf32>
    %131 = vector.shape_cast %130 : vector<1x8x32xf32> to vector<8x32xf32>
    %132 = vector.shape_cast %129 : vector<8x32xf32> to vector<1x8x32xf32>
    tpu.vector_store %arg15[%c0_52, %c0_53, %c0_54], %132 {strides = array<i32>} : memref<1x8x32xf32, #tpu.memory_space<vmem>>, vector<1x8x32xf32>,
    return
  }
  func.func @transform_0(%arg0: i32) -> (i32, i32, i32) {
    %c0_i32 = arith.constant 0 : i32
    %c0_i32_0 = arith.constant 0 : i32
    %c0_i32_1 = arith.constant 0 : i32
    return %arg0, %c0_i32, %c0_i32_0 : i32, i32, i32
  }
  func.func @transform_1(%arg0: i32) -> (i32, i32, i32) {
    %c0_i32 = arith.constant 0 : i32
    %c0_i32_0 = arith.constant 0 : i32
    %c0_i32_1 = arith.constant 0 : i32
    return %arg0, %c0_i32, %c0_i32_0 : i32, i32, i32
  }
  func.func @transform_2(%arg0: i32) -> (i32, i32) {
    %c0_i32 = arith.constant 0 : i32
    %c0_i32_0 = arith.constant 0 : i32
    %c0_i32_1 = arith.constant 0 : i32
    return %c0_i32, %c0_i32_0 : i32, i32
  }
  func.func @transform_3(%arg0: i32) -> (i32, i32) {
    %c0_i32 = arith.constant 0 : i32
    %c0_i32_0 = arith.constant 0 : i32
    %c0_i32_1 = arith.constant 0 : i32
    return %c0_i32, %c0_i32_0 : i32, i32
  }
  func.func @transform_4(%arg0: i32) -> (i32, i32, i32) {
    %c0_i32 = arith.constant 0 : i32
    %c0_i32_0 = arith.constant 0 : i32
    %c0_i32_1 = arith.constant 0 : i32
    %c0_i32_2 = arith.constant 0 : i32
    return %c0_i32, %c0_i32_0, %c0_i32_1 : i32, i32, i32
  }
  func.func @transform_5(%arg0: i32) -> (i32, i32) {
    %c0_i32 = arith.constant 0 : i32
    %c0_i32_0 = arith.constant 0 : i32
    %c0_i32_1 = arith.constant 0 : i32
    return %c0_i32, %c0_i32_0 : i32, i32
  }
  func.func @transform_6(%arg0: i32) -> (i32, i32) {
    %c0_i32 = arith.constant 0 : i32
    %c0_i32_0 = arith.constant 0 : i32
    %c0_i32_1 = arith.constant 0 : i32
    return %c0_i32, %c0_i32_0 : i32, i32
  }
  func.func @transform_7(%arg0: i32) -> (i32, i32) {
    %c0_i32 = arith.constant 0 : i32
    %c0_i32_0 = arith.constant 0 : i32
    %c0_i32_1 = arith.constant 0 : i32
    return %c0_i32, %c0_i32_0 : i32, i32
  }
  func.func @transform_8(%arg0: i32) -> (i32, i32) {
    %c0_i32 = arith.constant 0 : i32
    %c0_i32_0 = arith.constant 0 : i32
    %c0_i32_1 = arith.constant 0 : i32
    return %c0_i32, %c0_i32_0 : i32, i32
  }
  func.func @transform_9(%arg0: i32) -> (i32, i32) {
    %c0_i32 = arith.constant 0 : i32
    %c0_i32_0 = arith.constant 0 : i32
    %c0_i32_1 = arith.constant 0 : i32
    return %c0_i32, %c0_i32_0 : i32, i32
  }
  func.func @transform_10(%arg0: i32) -> (i32, i32) {
    %c0_i32 = arith.constant 0 : i32
    %c0_i32_0 = arith.constant 0 : i32
    %c0_i32_1 = arith.constant 0 : i32
    return %c0_i32, %c0_i32_0 : i32, i32
  }
  func.func @transform_11(%arg0: i32) -> (i32, i32) {
    %c0_i32 = arith.constant 0 : i32
    %c0_i32_0 = arith.constant 0 : i32
    %c0_i32_1 = arith.constant 0 : i32
    return %c0_i32, %c0_i32_0 : i32, i32
  }
  func.func @transform_12(%arg0: i32) -> (i32, i32) {
    %c0_i32 = arith.constant 0 : i32
    %c0_i32_0 = arith.constant 0 : i32
    %c0_i32_1 = arith.constant 0 : i32
    return %c0_i32, %c0_i32_0 : i32, i32
  }
  func.func @transform_13(%arg0: i32) -> (i32, i32) {
    %c0_i32 = arith.constant 0 : i32
    %c0_i32_0 = arith.constant 0 : i32
    %c0_i32_1 = arith.constant 0 : i32
    return %c0_i32, %c0_i32_0 : i32, i32
  }
  func.func @transform_14(%arg0: i32) -> (i32, i32, i32) {
    %c0_i32 = arith.constant 0 : i32
    %c0_i32_0 = arith.constant 0 : i32
    %c0_i32_1 = arith.constant 0 : i32
    return %arg0, %c0_i32, %c0_i32_0 : i32, i32, i32
  }
}

</mosaic_0001>

<bundles_post_ra>
// kernel: tpu_custom_call.1
= control target key start
LH: loop header
LB: loop body
LE: loop exit
PB: predicated region body
PF: predicated region fallthrough
CT: control target
= control target key end

     0   :  { %s3858_s0 = inlined_call_operand.hbm [shape: f32[2,8,32], index: 0, kind: input, shape index: {}]   ;;  %s3859_s1 = inlined_call_operand.hbm [shape: f32[2,1,8], index: 1, kind: input, shape index: {}]   ;;  %s3860_s2 = inlined_call_operand.hbm [shape: f32[32,96], index: 2, kind: input, shape index: {}]   ;;  %s3861_s3 = inlined_call_operand.hbm [shape: f32[1,96], index: 3, kind: input, shape index: {}]   ;;  %s3862_s4 = inlined_call_operand.hbm [shape: f32[4,8,32], index: 4, kind: input, shape index: {}]   ;;  %s3863_s5 = inlined_call_operand.hbm [shape: f32[1,32], index: 5, kind: input, shape index: {}]   ;;  %s3864_s6 = inlined_call_operand.hbm [shape: f32[1,32], index: 6, kind: input, shape index: {}]   ;;  %s3865_s7 = inlined_call_operand.hbm [shape: f32[1,32], index: 7, kind: input, shape index: {}]   ;;  %s3866_s8 = inlined_call_operand.hbm [shape: f32[32,64], index: 8, kind: input, shape index: {}]   ;;  %s3867_s9 = inlined_call_operand.hbm [shape: f32[1,64], index: 9, kind: input, shape index: {}]   ;;  %s3868_s10 = inlined_call_operand.hbm [shape: f32[64,32], index: 10, kind: input, shape index: {}]   ;;  %s3869_s11 = inlined_call_operand.hbm [shape: f32[1,32], index: 11, kind: input, shape index: {}]   ;;  %s3870_s12 = inlined_call_operand.hbm [shape: f32[1,32], index: 12, kind: input, shape index: {}]   ;;  %s3871_s13 = inlined_call_operand.hbm [shape: f32[1,32], index: 13, kind: input, shape index: {}]   ;;  %s3872_s14 = inlined_call_operand.hbm [shape: f32[2,8,32], index: 14, kind: output, shape index: {}]  }
   0x1   :  { %3886 = sst [smem:[#allocation39_spill]] %s3858_s0 }
   0x2   :  { %3887 = sst [smem:[#allocation40_spill]] %s3859_s1 }
   0x3   :  { %3888 = sst [smem:[#allocation41_spill]] %s3860_s2 }
   0x4   :  { %3889 = sst [smem:[#allocation42_spill]] %s3861_s3 }
   0x5   :  { %3890 = sst [smem:[#allocation43_spill]] %s3862_s4 }
   0x6   :  { %3891 = sst [smem:[#allocation44_spill]] %s3863_s5 }
   0x7   :  { %3892 = sst [smem:[#allocation45_spill]] %s3864_s6 }
   0x8   :  { %3893 = sst [smem:[#allocation46_spill]] %s3872_s14 }
   0x9   :  { %19 = vsyncpa [#allocation3], 0 }
   0xa   :  { %21 = vsyncpa [#allocation3 + $0x1], 0 }
   0xb   :  { %22 = vsyncpa [#allocation6], 0 }
   0xc   :  { %24 = vsyncpa [#allocation6 + $0x1], 0 }
   0xd   :  { %25 = vsyncpa [#allocation9], 0 }
   0xe   :  { %26 = vsyncpa [#allocation12], 0 }
   0xf   :  { %27 = vsyncpa [#allocation15], 0 }
  0x10   :  { %28 = vsyncpa [#allocation18], 0 }
  0x11   :  { %29 = vsyncpa [#allocation21], 0 }
  0x12   :  { %30 = vsyncpa [#allocation24], 0 }
  0x13   :  { %31 = vsyncpa [#allocation4], 0 }
  0x14   :  { %33 = vsyncpa [#allocation4 + $0x1], 0  ;;  %s3239_s29 = smov 0   ;;  %s3241_s30 = smov 0  }
  0x15   :  { %s3243_s15 = smov 0   ;;  %s3245_s16 = smov 0  }
  0x16 LB: > { %3894 = sst [smem:[#allocation36_spill]] %s3125_s29  ;;  %s3139_s17 = smov [#allocation7]   ;;  %s3137_s16 = sphi %s3245_s16, %s3943_s16   ;;  %s3133_s15 = sphi %s3243_s15, %s3942_s15   ;;  %s3129_s30 = sphi %s3241_s30, %s3941_s30   ;;  %s3125_s29 = sphi %s3239_s29, %s3940_s29  }
  0x17   : > { %s386_s18 = sshll.u32 %s3139_s17, 4  ;;  %s3260_s19 = sadd.s32 4294967295, %s3137_s16   ;;  %s3265_s18 = int_to_ptr.vmem [resolvable:$true] %s386_s18 }
  0x18   : > { %3895 = sst [smem:[#allocation37_spill]] %s3260_s19  ;;  %p2207_p0 = scmp.ge.s32.totalorder %s3137_s16, 1 }
  0x19   : > { %p3882_p1 = scmp.eq.s32.totalorder %s3260_s19, 0  ;;  %p374_p2 = scmp.lt.s32.totalorder %s3137_s16, 3 }
  0x1a   : > { %s3140_s21 = smov [#allocation8]   ;;  %s3141_s24 = smov [#allocation11]  }
  0x1b   : > { %p3267_p3 = pnand %p2207_p0, %p374_p2  ;;  %s400_s22 = sshll.u32 %s3140_s21, 4  ;;  %s3280_s22 = int_to_ptr.vmem [resolvable:$true] %s400_s22 }
  0x1c   : > { %s424_s25 = sshll.u32 %s3141_s24, 4  ;;  %s3899_s2 = sld [smem:[#allocation41_spill]]  ;;  %s3282_s25 = int_to_ptr.vmem [resolvable:$true] %s424_s25 }
  0x1d   : > { %s3896_s20 = scalar_select %p3267_p3, 1, 0 }
  0x1e   : > { %p2493_p5 = pneg %p3267_p3 }
  0x1f   : > { %3897 = sst [smem:[#allocation38_spill]] %s3896_s20 }
  0x20   : > { %p3276_p6 = pnand %p2493_p5, %p3882_p1 }
  0x22   : > { %s2643_s28 = scalar_lea.hbm %s3899_s2, 512  ;;  %p3292_p8 = pneg %p3276_p6 }
  0x23   : > { %p2644_p7 = scmp.ne.s32.totalorder %s3899_s2, %s2643_s28  ;;  %p2650_p11 = scmp.lt.u32.totalorder %s2643_s28, %s3899_s2 }
  0x25   : > { %p2646_p9 = pnand %p3292_p8, %p2644_p7 }
  0x27   : > { %p2647_p10 = pneg %p2646_p9 }
  0x29   : > { %p2652_p12 = pnand %p2650_p11, %p2647_p10 }
  0x2b   : > { %2655 = shalt.err (!%p2652_p12)
}
  0x2c   : > { %s2656_s14 = scalar_lea.vmem %s3265_s18, 512  ;;  %p2664_p5 = scmp.lt.s32.totalorder %s3265_s18, %s3265_s18 }
  0x2d   : > { %p2657_p13 = scmp.ne.s32.totalorder %s3265_s18, %s2656_s14  ;;  %p2665_p4 = scmp.lt.s32.totalorder %s2656_s14, %s2656_s14 }
  0x2f   : > { %p2659_p0 = pnand %p2657_p13, %p3292_p8  ;;  %p2666_p7 = por %p2665_p4, %p2664_p5 }
  0x31   : > { %p2660_p2 = pneg %p2659_p0 }
  0x33   : > { %p2667_p9 = pnand %p2666_p7, %p2660_p2 }
  0x35   : > { %2670 = shalt.err (!%p2667_p9)
}
  0x36   : > { %s3880_s26 = smov 128   ;;  %s3143_s20 = smov 8  }
  0x37   : > { %2496 = dma.hbm_to_vmem [thread:$0]  (!%p3276_p6), %s3899_s2, 512, %s3265_s18, [#allocation6], %s3880_s26, %s3880_s26, %s3143_s20  }
  0x38   : > { %s3901_s3 = sld [smem:[#allocation42_spill]] }
  0x3e   : > { %s2671_s14 = scalar_lea.hbm %s3901_s3, 16 }
  0x3f   : > { %p2672_p4 = scmp.ne.s32.totalorder %s3901_s3, %s2671_s14  ;;  %p2678_p12 = scmp.lt.u32.totalorder %s2671_s14, %s3901_s3 }
  0x41   : > { %p2674_p10 = pnand %p2672_p4, %p3292_p8 }
  0x43   : > { %p2675_p11 = pneg %p2674_p10 }
  0x45   : > { %p2680_p13 = pnand %p2678_p12, %p2675_p11 }
  0x47   : > { %2683 = shalt.err (!%p2680_p13)
}
  0x48   : > { %s2684_s18 = scalar_lea.vmem %s3280_s22, 16  ;;  %s2691_s0 = scalar_lea.vmem %s3280_s22, 32 }
  0x49   : > { %p2685_p0 = scmp.ne.s32.totalorder %s3280_s22, %s2684_s18  ;;  %p2692_p7 = scmp.lt.s32.totalorder %s3280_s22, %s3280_s22 }
  0x4a   : > { %p2693_p9 = scmp.lt.s32.totalorder %s2691_s0, %s2684_s18 }
  0x4b   : > { %p2687_p2 = pnand %p2685_p0, %p3292_p8 }
  0x4c   : > { %p2694_p4 = por %p2693_p9, %p2692_p7 }
  0x4d   : > { %p2688_p5 = pneg %p2687_p2 }
  0x4f   : > { %p2695_p10 = pnand %p2694_p4, %p2688_p5 }
  0x51   : > { %2698 = shalt.err (!%p2695_p10)
}
  0x52   : > { %2499 = dma.hbm_to_vmem [thread:$0]  (!%p3276_p6), %s3901_s3, 16, %s3280_s22, [#allocation9]  }
  0x53   : > { %s3902_s5 = sld [smem:[#allocation44_spill]] }
  0x59   : > { %s2699_s28 = scalar_lea.hbm %s3902_s5, 16 }
  0x5a   : > { %p2700_p11 = scmp.ne.s32.totalorder %s3902_s5, %s2699_s28  ;;  %p2706_p0 = scmp.lt.u32.totalorder %s2699_s28, %s3902_s5 }
  0x5c   : > { %p2702_p12 = pnand %p2700_p11, %p3292_p8 }
  0x5e   : > { %p2703_p13 = pneg %p2702_p12 }
  0x60   : > { %p2708_p2 = pnand %p2706_p0, %p2703_p13 }
  0x62   : > { %2711 = shalt.err (!%p2708_p2)
}
  0x63   : > { %s2712_s22 = scalar_lea.vmem %s3282_s25, 16  ;;  %s2719_s0 = scalar_lea.vmem %s3282_s25, 32 }
  0x64   : > { %p2713_p5 = scmp.ne.s32.totalorder %s3282_s25, %s2712_s22  ;;  %p2720_p4 = scmp.lt.s32.totalorder %s3282_s25, %s3282_s25 }
  0x65   : > { %p2721_p10 = scmp.lt.s32.totalorder %s2719_s0, %s2712_s22 }
  0x66   : > { %p2715_p7 = pnand %p2713_p5, %p3292_p8 }
  0x67   : > { %p2722_p11 = por %p2721_p10, %p2720_p4 }
  0x68   : > { %p2716_p9 = pneg %p2715_p7 }
  0x6a   : > { %p2723_p12 = pnand %p2722_p11, %p2716_p9 }
  0x6c   : > { %2726 = shalt.err (!%p2723_p12)
}
  0x6d   : > { %2505 = dma.hbm_to_vmem [thread:$0]  (!%p3276_p6), %s3902_s5, 16, %s3282_s25, [#allocation12]  }
  0x6e   : > { %s3144_s19 = smov [#allocation14]   ;;  %s3145_s28 = smov [#allocation17]  }
  0x6f   : > { %s446_s27 = sshll.u32 %s3144_s19, 4  ;;  %s470_s17 = sshll.u32 %s3145_s28, 4  ;;  %s447_s27 = int_to_ptr.vmem [resolvable:$true] %s446_s27  ;;  %s471_s17 = int_to_ptr.vmem [resolvable:$true] %s470_s17 }
  0x70   : > { %s2727_s18 = scalar_lea.hbm %s3865_s7, 16 }
  0x71   : > { %p2728_p13 = scmp.ne.s32.totalorder %s3865_s7, %s2727_s18  ;;  %p2734_p5 = scmp.lt.u32.totalorder %s2727_s18, %s3865_s7 }
  0x73   : > { %p2730_p0 = pnand %p2728_p13, %p3292_p8 }
  0x75   : > { %p2731_p2 = pneg %p2730_p0 }
  0x77   : > { %p2736_p7 = pnand %p2734_p5, %p2731_p2 }
  0x79   : > { %2739 = shalt.err (!%p2736_p7)
}
  0x7a   : > { %s2740_s25 = scalar_lea.vmem %s447_s27, 16  ;;  %s2747_s29 = scalar_lea.vmem %s447_s27, 32 }
  0x7b   : > { %p2741_p9 = scmp.ne.s32.totalorder %s447_s27, %s2740_s25  ;;  %p2748_p11 = scmp.lt.s32.totalorder %s447_s27, %s447_s27 }
  0x7c   : > { %p2749_p12 = scmp.lt.s32.totalorder %s2747_s29, %s2740_s25 }
  0x7d   : > { %p2743_p4 = pnand %p2741_p9, %p3292_p8 }
  0x7e   : > { %p2750_p1 = por %p2749_p12, %p2748_p11 }
  0x7f   : > { %p2744_p10 = pneg %p2743_p4 }
  0x81   : > { %p2751_p3 = pnand %p2750_p1, %p2744_p10 }
  0x83   : > { %2754 = shalt.err (!%p2751_p3)
}
  0x84   : > { %2511 = dma.hbm_to_vmem [thread:$0]  (!%p3276_p6), %s3865_s7, 16, %s447_s27, [#allocation15]  }
  0x85   : > { %s2755_s14 = scalar_lea.hbm %s3867_s9, 16 }
  0x86   : > { %p2756_p13 = scmp.ne.s32.totalorder %s3867_s9, %s2755_s14  ;;  %p2762_p3 = scmp.lt.u32.totalorder %s2755_s14, %s3867_s9 }
  0x88   : > { %p2758_p0 = pnand %p2756_p13, %p3292_p8 }
  0x8a   : > { %p2759_p1 = pneg %p2758_p0 }
  0x8c   : > { %p2764_p2 = pnand %p2762_p3, %p2759_p1 }
  0x8e   : > { %2767 = shalt.err (!%p2764_p2)
}
  0x8f   : > { %s2768_s25 = scalar_lea.vmem %s471_s17, 16  ;;  %s2775_s27 = scalar_lea.vmem %s471_s17, 32 }
  0x90   : > { %p2769_p5 = scmp.ne.s32.totalorder %s471_s17, %s2768_s25  ;;  %p2776_p4 = scmp.lt.s32.totalorder %s471_s17, %s471_s17 }
  0x91   : > { %p2777_p10 = scmp.lt.s32.totalorder %s2775_s27, %s2768_s25 }
  0x92   : > { %p2771_p7 = pnand %p2769_p5, %p3292_p8 }
  0x93   : > { %p2778_p11 = por %p2777_p10, %p2776_p4 }
  0x94   : > { %p2772_p9 = pneg %p2771_p7 }
  0x96   : > { %p2779_p12 = pnand %p2778_p11, %p2772_p9 }
  0x98   : > { %2782 = shalt.err (!%p2779_p12)
}
  0x99   : > { %2517 = dma.hbm_to_vmem [thread:$0]  (!%p3276_p6), %s3867_s9, 16, %s471_s17, [#allocation18]  }
  0x9a   : > { %s3146_s28 = smov [#allocation20]   ;;  %s3147_s24 = smov [#allocation10]  }
  0x9b   : > { %s494_s26 = sshll.u32 %s3146_s28, 4  ;;  %s410_s14 = sshll.u32 %s3147_s24, 4  ;;  %s495_s26 = int_to_ptr.vmem [resolvable:$true] %s494_s26  ;;  %s411_s14 = int_to_ptr.vmem [resolvable:$true] %s410_s14 }
  0x9c   : > { %s2783_s0 = scalar_lea.hbm %s3869_s11, 16 }
  0x9d   : > { %p2784_p13 = scmp.ne.s32.totalorder %s3869_s11, %s2783_s0  ;;  %p2790_p3 = scmp.lt.u32.totalorder %s2783_s0, %s3869_s11 }
  0x9f   : > { %p2786_p0 = pnand %p2784_p13, %p3292_p8 }
  0xa1   : > { %p2787_p1 = pneg %p2786_p0 }
  0xa3   : > { %p2792_p2 = pnand %p2790_p3, %p2787_p1 }
  0xa5   : > { %2795 = shalt.err (!%p2792_p2)
}
  0xa6   : > { %s2796_s17 = scalar_lea.vmem %s495_s26, 16  ;;  %s2803_s19 = scalar_lea.vmem %s495_s26, 32 }
  0xa7   : > { %p2797_p5 = scmp.ne.s32.totalorder %s495_s26, %s2796_s17  ;;  %p2804_p4 = scmp.lt.s32.totalorder %s495_s26, %s495_s26 }
  0xa8   : > { %p2805_p10 = scmp.lt.s32.totalorder %s2803_s19, %s2796_s17 }
  0xa9   : > { %p2799_p7 = pnand %p2797_p5, %p3292_p8 }
  0xaa   : > { %p2806_p11 = por %p2805_p10, %p2804_p4 }
  0xab   : > { %p2800_p9 = pneg %p2799_p7 }
  0xad   : > { %p2807_p12 = pnand %p2806_p11, %p2800_p9 }
  0xaf   : > { %2810 = shalt.err (!%p2807_p12)
}
  0xb0   : > { %2523 = dma.hbm_to_vmem [thread:$0]  (!%p3276_p6), %s3869_s11, 16, %s495_s26, [#allocation21]  }
  0xb1   : > { %s3903_s4 = sld [smem:[#allocation43_spill]] }
  0xb7   : > { %s2811_s0 = scalar_lea.hbm %s3903_s4, 512 }
  0xb8   : > { %p2812_p13 = scmp.ne.s32.totalorder %s3903_s4, %s2811_s0  ;;  %p2818_p3 = scmp.lt.u32.totalorder %s2811_s0, %s3903_s4 }
  0xba   : > { %p2814_p0 = pnand %p2812_p13, %p3292_p8 }
  0xbc   : > { %p2815_p1 = pneg %p2814_p0 }
  0xbe   : > { %p2820_p2 = pnand %p2818_p3, %p2815_p1 }
  0xc0   : > { %2823 = shalt.err (!%p2820_p2)
}
  0xc1   : > { %s2824_s17 = scalar_lea.vmem %s411_s14, 512  ;;  %p2832_p4 = scmp.lt.s32.totalorder %s411_s14, %s411_s14 }
  0xc2   : > { %p2825_p5 = scmp.ne.s32.totalorder %s411_s14, %s2824_s17  ;;  %p2833_p10 = scmp.lt.s32.totalorder %s2824_s17, %s2824_s17 }
  0xc4   : > { %p2827_p7 = pnand %p2825_p5, %p3292_p8  ;;  %p2834_p11 = por %p2833_p10, %p2832_p4 }
  0xc6   : > { %p2828_p9 = pneg %p2827_p7 }
  0xc8   : > { %p2835_p12 = pnand %p2834_p11, %p2828_p9 }
  0xca   : > { %2838 = shalt.err (!%p2835_p12)
}
  0xcb   : > { %s3904_s26 = smov 128   ;;  %s3148_s24 = smov [#allocation13]  }
  0xcc   : > { %2502 = dma.hbm_to_vmem [thread:$0]  (!%p3276_p6), %s3903_s4, 512, %s411_s14, [#allocation9], %s3904_s26, %s3904_s26, %s3143_s20  }
  0xcd   : > { %s435_s18 = sshll.u32 %s3148_s24, 4  ;;  %s3149_s22 = smov [#allocation16]   ;;  %s436_s18 = int_to_ptr.vmem [resolvable:$true] %s435_s18 }
  0xce   : > { %s456_s0 = sshll.u32 %s3149_s22, 4  ;;  %s3905_s6 = sld [smem:[#allocation45_spill]]  ;;  %s457_s0 = int_to_ptr.vmem [resolvable:$true] %s456_s0 }
  0xd4   : > { %s2839_s27 = scalar_lea.hbm %s3905_s6, 16 }
  0xd5   : > { %p2840_p13 = scmp.ne.s32.totalorder %s3905_s6, %s2839_s27  ;;  %p2846_p3 = scmp.lt.u32.totalorder %s2839_s27, %s3905_s6 }
  0xd7   : > { %p2842_p0 = pnand %p2840_p13, %p3292_p8 }
  0xd9   : > { %p2843_p1 = pneg %p2842_p0 }
  0xdb   : > { %p2848_p2 = pnand %p2846_p3, %p2843_p1 }
  0xdd   : > { %2851 = shalt.err (!%p2848_p2)
}
  0xde   : > { %s2852_s14 = scalar_lea.vmem %s436_s18, 16  ;;  %s2859_s28 = scalar_lea.vmem %s436_s18, 32 }
  0xdf   : > { %p2853_p5 = scmp.ne.s32.totalorder %s436_s18, %s2852_s14  ;;  %p2860_p4 = scmp.lt.s32.totalorder %s436_s18, %s436_s18 }
  0xe0   : > { %p2861_p10 = scmp.lt.s32.totalorder %s2859_s28, %s2852_s14 }
  0xe1   : > { %p2855_p7 = pnand %p2853_p5, %p3292_p8 }
  0xe2   : > { %p2862_p11 = por %p2861_p10, %p2860_p4 }
  0xe3   : > { %p2856_p9 = pneg %p2855_p7 }
  0xe5   : > { %p2863_p12 = pnand %p2862_p11, %p2856_p9 }
  0xe7   : > { %2866 = shalt.err (!%p2863_p12)
}
  0xe8   : > { %2508 = dma.hbm_to_vmem [thread:$0]  (!%p3276_p6), %s3905_s6, 16, %s436_s18, [#allocation12]  }
  0xe9   : > { %s2867_s25 = scalar_lea.hbm %s3866_s8, 512 }
  0xea   : > { %p2868_p13 = scmp.ne.s32.totalorder %s3866_s8, %s2867_s25  ;;  %p2874_p3 = scmp.lt.u32.totalorder %s2867_s25, %s3866_s8 }
  0xec   : > { %p2870_p0 = pnand %p2868_p13, %p3292_p8 }
  0xee   : > { %p2871_p1 = pneg %p2870_p0 }
  0xf0   : > { %p2876_p2 = pnand %p2874_p3, %p2871_p1 }
  0xf2   : > { %2879 = shalt.err (!%p2876_p2)
}
  0xf3   : > { %s2880_s14 = scalar_lea.vmem %s457_s0, 512  ;;  %p2888_p4 = scmp.lt.s32.totalorder %s457_s0, %s457_s0 }
  0xf4   : > { %p2881_p5 = scmp.ne.s32.totalorder %s457_s0, %s2880_s14  ;;  %p2889_p10 = scmp.lt.s32.totalorder %s2880_s14, %s2880_s14 }
  0xf6   : > { %p2883_p7 = pnand %p2881_p5, %p3292_p8  ;;  %p2890_p11 = por %p2889_p10, %p2888_p4 }
  0xf8   : > { %p2884_p9 = pneg %p2883_p7 }
  0xfa   : > { %p2891_p12 = pnand %p2890_p11, %p2884_p9 }
  0xfc   : > { %2894 = shalt.err (!%p2891_p12)
}
  0xfd   : > { %2514 = dma.hbm_to_vmem [thread:$0]  (!%p3276_p6), %s3866_s8, 512, %s457_s0, [#allocation15], %s3904_s26, %s3904_s26, %s3143_s20  }
  0xfe   : > { %s3150_s24 = smov [#allocation19]   ;;  %s3151_s2 = smov [#allocation22]  }
  0xff   : > { %s480_s22 = sshll.u32 %s3150_s24, 4  ;;  %s505_s1 = sshll.u32 %s3151_s2, 4  ;;  %s481_s22 = int_to_ptr.vmem [resolvable:$true] %s480_s22  ;;  %s506_s1 = int_to_ptr.vmem [resolvable:$true] %s505_s1 }
 0x100   : > { %s2895_s29 = scalar_lea.hbm %s3868_s10, 1024 }
 0x101   : > { %p2896_p13 = scmp.ne.s32.totalorder %s3868_s10, %s2895_s29  ;;  %p2902_p3 = scmp.lt.u32.totalorder %s2895_s29, %s3868_s10 }
 0x103   : > { %p2898_p0 = pnand %p2896_p13, %p3292_p8 }
 0x105   : > { %p2899_p1 = pneg %p2898_p0 }
 0x107   : > { %p2904_p2 = pnand %p2902_p3, %p2899_p1 }
 0x109   : > { %2907 = shalt.err (!%p2904_p2)
}
 0x10a   : > { %s2908_s0 = scalar_lea.vmem %s481_s22, 1024  ;;  %p2916_p4 = scmp.lt.s32.totalorder %s481_s22, %s481_s22 }
 0x10b   : > { %p2909_p5 = scmp.ne.s32.totalorder %s481_s22, %s2908_s0  ;;  %p2917_p10 = scmp.lt.s32.totalorder %s2908_s0, %s2908_s0 }
 0x10d   : > { %p2911_p7 = pnand %p2909_p5, %p3292_p8  ;;  %p2918_p11 = por %p2917_p10, %p2916_p4 }
 0x10f   : > { %p2912_p9 = pneg %p2911_p7 }
 0x111   : > { %p2919_p12 = pnand %p2918_p11, %p2912_p9 }
 0x113   : > { %2922 = shalt.err (!%p2919_p12)
}
 0x114   : > { %2520 = dma.hbm_to_vmem [thread:$0]  (!%p3276_p6), %s3868_s10, 1024, %s481_s22, [#allocation18], %s3904_s26, %s3904_s26, %s3143_s20  }
 0x115   : > { %s2923_s27 = scalar_lea.hbm %s3870_s12, 16 }
 0x116   : > { %p2924_p13 = scmp.ne.s32.totalorder %s3870_s12, %s2923_s27  ;;  %p2930_p3 = scmp.lt.u32.totalorder %s2923_s27, %s3870_s12 }
 0x118   : > { %p2926_p0 = pnand %p2924_p13, %p3292_p8 }
 0x11a   : > { %p2927_p1 = pneg %p2926_p0 }
 0x11c   : > { %p2932_p2 = pnand %p2930_p3, %p2927_p1 }
 0x11e   : > { %2935 = shalt.err (!%p2932_p2)
}
 0x11f   : > { %s2936_s18 = scalar_lea.vmem %s506_s1, 16  ;;  %s2943_s20 = scalar_lea.vmem %s506_s1, 32 }
 0x120   : > { %p2937_p5 = scmp.ne.s32.totalorder %s506_s1, %s2936_s18  ;;  %p2944_p4 = scmp.lt.s32.totalorder %s506_s1, %s506_s1 }
 0x121   : > { %p2945_p10 = scmp.lt.s32.totalorder %s2943_s20, %s2936_s18 }
 0x122   : > { %p2939_p7 = pnand %p2937_p5, %p3292_p8 }
 0x123   : > { %p2946_p11 = por %p2945_p10, %p2944_p4 }
 0x124   : > { %p2940_p9 = pneg %p2939_p7 }
 0x126   : > { %p2947_p12 = pnand %p2946_p11, %p2940_p9 }
 0x128   : > { %2950 = shalt.err (!%p2947_p12)
}
 0x129   : > { %2526 = dma.hbm_to_vmem [thread:$0]  (!%p3276_p6), %s3870_s12, 16, %s506_s1, [#allocation21]  }
 0x12a   : > { %s3152_s0 = smov [#allocation23]   ;;  %s2951_s25 = scalar_lea.hbm %s3871_s13, 16 }
 0x12b   : > { %s516_s28 = sshll.u32 %s3152_s0, 4  ;;  %p2952_p13 = scmp.ne.s32.totalorder %s3871_s13, %s2951_s25  ;;  %s517_s28 = int_to_ptr.vmem [resolvable:$true] %s516_s28 }
 0x12c   : > { %p2958_p3 = scmp.lt.u32.totalorder %s2951_s25, %s3871_s13 }
 0x12d   : > { %p2954_p0 = pnand %p2952_p13, %p3292_p8 }
 0x12f   : > { %p2955_p1 = pneg %p2954_p0 }
 0x131   : > { %p2960_p2 = pnand %p2958_p3, %p2955_p1 }
 0x133   : > { %2963 = shalt.err (!%p2960_p2)
}
 0x134   : > { %s2964_s1 = scalar_lea.vmem %s517_s28, 16  ;;  %s2971_s14 = scalar_lea.vmem %s517_s28, 32 }
 0x135   : > { %p2965_p5 = scmp.ne.s32.totalorder %s517_s28, %s2964_s1  ;;  %p2972_p4 = scmp.lt.s32.totalorder %s517_s28, %s517_s28 }
 0x136   : > { %p2973_p10 = scmp.lt.s32.totalorder %s2971_s14, %s2964_s1 }
 0x137   : > { %p2967_p7 = pnand %p2965_p5, %p3292_p8 }
 0x138   : > { %p2974_p11 = por %p2973_p10, %p2972_p4 }
 0x139   : > { %p2968_p9 = pneg %p2967_p7 }
 0x13b   : > { %p2975_p12 = pnand %p2974_p11, %p2968_p9 }
 0x13d   : > { %2978 = shalt.err (!%p2975_p12)
}
 0x13e   : > { %s3906_s21 = sld [smem:[#allocation36_spill]]  ;;  %s3907_s26 = sld [smem:[#allocation37_spill]] }
 0x13f   : > { %2529 = dma.hbm_to_vmem [thread:$0]  (!%p3276_p6), %s3871_s13, 16, %s517_s28, [#allocation24]  }
 0x140   : > { %s2206_s22 = sadd.s32 4294967294, %s3137_s16   ;;  %s3537_s23 = sadd.s32 1, %s3137_s16  }
 0x141   : > { %s43_s0 = ssub.s32 %s3137_s16, %s3537_s23  ;;  %s46_s24 = sadd.s32 1, %s3133_s15 }
 0x142   : > { %p44_p8 = scmp.eq.s32.totalorder %s43_s0, 0  ;;  %p53_p13 = scmp.ne.s32.totalorder %s3133_s15, %s3129_s30 }
 0x143   : > { %p54_p0 = scmp.eq.s32.totalorder %s3137_s16, 0  ;;  %p367_p7 = scmp.eq.s32.totalorder %s2206_s22, 1 }
 0x144   : > { %p59_p1 = scmp.ne.s32.totalorder %s3129_s30, %s3906_s21  ;;  %p3909_p2 = scmp.eq.s32.totalorder %s3907_s26, 0 }
 0x145   : > { %s3548_s2 = scalar_select %p44_p8, %s3133_s15, %s46_s24  }
 0x146   : > { %p3550_p3 = por %p54_p0, %p53_p13  ;;  %p3556_p6 = por %p3909_p2, %p59_p1 }
 0x147   : > { %p361_p5 = scmp.eq.s32.totalorder %s3907_s26, 1  ;;  %p2553_p9 = scmp.lt.s32.totalorder %s3137_s16, 2 }
 0x148   : > { %s3910_s28 = scalar_select %p3556_p6, 1, 0 }
 0x149   : > { %s3563_s27 = sand.u32 1, %s3133_s15   ;;  %p3565_p4 = por %p361_p5, %p53_p13 }
 0x14a   : > { %p3569_p10 = por %p367_p7, %p59_p1  ;;  %s2221_s19 = sshll.u32 %s3563_s27, 3 }
 0x14b   : > { %s3911_s29 = scalar_select %p3565_p4, 1, 0 }
 0x14c   : > { %s3912_s17 = scalar_select %p3569_p10, 1, 0 }
 0x14d   : > { %s2222_s1 = sshll.u32 %s3137_s16, 7  ;;  %s3913_s20 = sld [smem:[#allocation39_spill]] }
 0x14e   : > { %s531_s26 = scalar_lea.vmem [#allocation2], %s2221_s19  ;;  %p3584_p11 = pnand %p2553_p9, %p3550_p3 }
 0x14f   : > { %s538_s22 = sshll.u32 %s531_s26, 4  ;;  %s528_s3 = scalar_lea.sflag [#allocation3], %s3563_s27  ;;  %s3580_s22 = int_to_ptr.vmem [resolvable:$true] %s538_s22 }
 0x150   : > { %p2981_p8 = pneg %p3584_p11 }
 0x153   : > { %s3578_s21 = scalar_lea.hbm %s3913_s20, %s2222_s1  ;;  %s2984_s25 = scalar_lea.hbm %s3913_s20, 256 }
 0x154   : > { %s2979_s14 = scalar_lea.hbm %s3578_s21, 128  ;;  %p2985_p1 = scmp.lt.u32.totalorder %s3578_s21, %s3913_s20 }
 0x155   : > { %p2980_p12 = scmp.ne.s32.totalorder %s3578_s21, %s2979_s14  ;;  %p2986_p3 = scmp.lt.u32.totalorder %s2984_s25, %s2979_s14 }
 0x156   : > { %p2988_p5 = scmp.lt.u32.totalorder %s2979_s14, %s3578_s21 }
 0x157   : > { %p2982_p13 = pnand %p2981_p8, %p2980_p12  ;;  %p2987_p2 = por %p2986_p3, %p2985_p1 }
 0x159   : > { %p2983_p0 = pneg %p2982_p13  ;;  %p2989_p7 = por %p2988_p5, %p2987_p2 }
 0x15b   : > { %p2990_p9 = pnand %p2989_p7, %p2983_p0 }
 0x15d   : > { %2993 = shalt.err (!%p2990_p9)
}
 0x15e   : > { %s2994_s24 = scalar_lea.vmem %s3580_s22, 128  ;;  %s3153_s19 = smov [#allocation2]  }
 0x15f   : > { %p2995_p12 = scmp.ne.s32.totalorder %s3580_s22, %s2994_s24  ;;  %s2999_s1 = sshll.u32 %s3153_s19, 4  ;;  %s3000_s1 = int_to_ptr.vmem [resolvable:$false] %s2999_s1 }
 0x160   : > { %s3001_s18 = scalar_lea.vmem %s3000_s1, 256  ;;  %p3002_p4 = scmp.lt.s32.totalorder %s3580_s22, %s3000_s1 }
 0x161   : > { %p2997_p13 = pnand %p2995_p12, %p2981_p8  ;;  %p3003_p1 = scmp.lt.s32.totalorder %s3001_s18, %s2994_s24 }
 0x163   : > { %p2998_p10 = pneg %p2997_p13  ;;  %p3004_p3 = por %p3003_p1, %p3002_p4 }
 0x165   : > { %p3005_p2 = pnand %p3004_p3, %p2998_p10 }
 0x167   : > { %3008 = shalt.err (!%p3005_p2)
}
 0x168   : > { %2533 = dma.hbm_to_vmem [thread:$0]  (!%p3584_p11), %s3578_s21, 128, %s3580_s22, %s528_s3  }
 0x169   : > { %s2223_s14 = sshll.u32 %s3137_s16, 4  ;;  %s548_s25 = scalar_lea.vmem [#allocation5], %s3563_s27 }
 0x16a   : > { %s555_s26 = sshll.u32 %s548_s25, 4  ;;  %s3915_s5 = sld [smem:[#allocation40_spill]]  ;;  %s556_s26 = int_to_ptr.vmem [resolvable:$true] %s555_s26 }
 0x16b   : > { %s3916_s24 = sand.u32 1, %s3137_s16  }
 0x16c   : > { %s546_s18 = scalar_lea.sflag [#allocation6], %s3916_s24 }
 0x170   : > { %s3620_s1 = scalar_lea.hbm %s3915_s5, %s2223_s14  ;;  %s3014_s21 = scalar_lea.hbm %s3915_s5, 32 }
 0x171   : > { %s3009_s6 = scalar_lea.hbm %s3620_s1, 16  ;;  %p3015_p5 = scmp.lt.u32.totalorder %s3620_s1, %s3915_s5 }
 0x172   : > { %p3010_p4 = scmp.ne.s32.totalorder %s3620_s1, %s3009_s6  ;;  %p3016_p7 = scmp.lt.u32.totalorder %s3014_s21, %s3009_s6 }
 0x173   : > { %p3018_p12 = scmp.lt.u32.totalorder %s3009_s6, %s3620_s1 }
 0x174   : > { %p3012_p10 = pnand %p3010_p4, %p2981_p8  ;;  %p3017_p9 = por %p3016_p7, %p3015_p5 }
 0x176   : > { %p3013_p0 = pneg %p3012_p10  ;;  %p3019_p13 = por %p3018_p12, %p3017_p9 }
 0x178   : > { %p3020_p1 = pnand %p3019_p13, %p3013_p0 }
 0x17a   : > { %3023 = shalt.err (!%p3020_p1)
}
 0x17b   : > { %s3024_s14 = scalar_lea.vmem %s556_s26, 16  ;;  %s3154_s25 = smov [#allocation5]  }
 0x17c   : > { %p3025_p3 = scmp.ne.s32.totalorder %s556_s26, %s3024_s14  ;;  %s3029_s19 = sshll.u32 %s3154_s25, 4  ;;  %s3030_s19 = int_to_ptr.vmem [resolvable:$false] %s3029_s19 }
 0x17d   : > { %s3031_s24 = scalar_lea.vmem %s3030_s19, 32  ;;  %p3032_p10 = scmp.lt.s32.totalorder %s556_s26, %s3030_s19 }
 0x17e   : > { %p3027_p2 = pnand %p3025_p3, %p2981_p8  ;;  %p3033_p6 = scmp.lt.s32.totalorder %s3031_s24, %s3024_s14 }
 0x180   : > { %p3028_p4 = pneg %p3027_p2  ;;  %p3034_p5 = por %p3033_p6, %p3032_p10 }
 0x182   : > { %p3035_p7 = pnand %p3034_p5, %p3028_p4 }
 0x184   : > { %3038 = shalt.err (!%p3035_p7)
}
 0x185   : > { %2536 = dma.hbm_to_vmem [thread:$0]  (!%p3584_p11), %s3620_s1, 16, %s556_s26, %s546_s18  }
 0x186   : > { %s3917_s6 = sld [smem:[#allocation38_spill]] }
 0x18c   : > { %p3918_p0 = scmp.ne.s32.totalorder %s3917_s6, 0 }
 0x18d   : > { %s3646_s3 = sand.u32 (!%p3918_p0), 1, %s3129_s30   ;;  %p3919_p6 = scmp.ne.s32.totalorder (!%p3918_p0), %s3910_s28, 0 }
 0x18e   : > { %564 = sbr.rel (%p3918_p0) target bundleno = 2950 (0xb86), region = 76  ;;  %s2225_s27 = sshll.u32 (!%p3918_p0), %s3646_s3, 3 }
 0x18f   : > { %s567_s21 = scalar_lea.sflag (!%p3918_p0), [#allocation3], %s3646_s3  ;;  %s3652_s4 = scalar_lea.vmem (!%p3918_p0), [#allocation2], %s2225_s27 }
 0x195   : > { %3084 = dma.done.wait (%p3919_p6), %s567_s21, 128  }
 0x196   : > { %3086 = vsyncadd (%p3919_p6), %s567_s21, 4294967168  ;;  %s3920_s0 = sld [smem:[#allocation37_spill]]  ;;  %s578_s18 = scalar_lea.vmem [#allocation5], %s3646_s3 }
 0x19c   : > { %s575_s26 = sand.u32 1, %s3920_s0  }
 0x19d   : > { %s576_s1 = scalar_lea.sflag [#allocation6], %s575_s26 }
 0x19e   : > { %3088 = dma.done.wait (%p3919_p6), %s576_s1, 16  }
 0x19f   : > { %3090 = vsyncadd (%p3919_p6), %s576_s1, 4294967280  ;;  %p3921_p11 = scmp.eq.s32.totalorder %s3920_s0, 0 }
 0x1a1   : > { %3092 = dma.done.wait (%p3921_p11), [#allocation6], 512   ;;  %p3922_p8 = pmov %p3921_p11 }
 0x1a3   : > { %3094 = vsyncadd (%p3922_p8), [#allocation6], 4294966784  ;;  %p3923_p9 = pmov %p3922_p8 }
 0x1a4   : > { %p3924_p12 = pmov %p3922_p8 }
 0x1a5   : > { %3096 = dma.done.wait (%p3923_p9), [#allocation9], 528  }
 0x1a6   : > { %3098 = vsyncadd (%p3924_p12), [#allocation9], 4294966768  ;;  %p3925_p13 = pmov %p3922_p8 }
 0x1a7   : > { %p3926_p1 = pmov %p3922_p8 }
 0x1a8   : > { %3100 = dma.done.wait (%p3925_p13), [#allocation12], 32  }
 0x1a9   : > { %3102 = vsyncadd (%p3926_p1), [#allocation12], 4294967264  ;;  %p3927_p3 = pmov %p3926_p1 }
 0x1aa   : > { %p3928_p2 = pmov %p3926_p1 }
 0x1ab   : > { %3104 = dma.done.wait (%p3927_p3), [#allocation15], 528  }
 0x1ac   : > { %3106 = vsyncadd (%p3928_p2), [#allocation15], 4294966768  ;;  %p3929_p4 = pmov %p3926_p1 }
 0x1ad   : > { %p3930_p10 = pmov %p3926_p1 }
 0x1ae   : > { %3108 = dma.done.wait (%p3929_p4), [#allocation18], 1040  }
 0x1af   : > { %3110 = vsyncadd (%p3930_p10), [#allocation18], 4294966256  ;;  %p3931_p5 = pmov %p3926_p1 }
 0x1b0   : > { %p3932_p7 = pmov %p3926_p1 }
 0x1b1   : > { %3112 = dma.done.wait (%p3931_p5), [#allocation21], 32  }
 0x1b2   : > { %3114 = vsyncadd (%p3932_p7), [#allocation21], 4294967264  ;;  %p3933_p0 = pmov %p3926_p1 }
 0x1b4   : > { %3116 = dma.done.wait (%p3933_p0), [#allocation24], 16   ;;  %p3934_p6 = pmov %p3933_p0 }
 0x1b5   : > { %v3155_v0 = vmov 0.0|0.0   ;;  %vm3156_vm0 = vmmov 0   ;;  %v3157_v1 = vmov 0.0   ;;  %v677_v2 = vld [vmem:[#allocation7] sm:$0xff]  ;;  %v678_v3 = vld [vmem:[#allocation7 + $0x8] sm:$0xff]  ;;  %v679_v4 = vld [vmem:[#allocation7 + $0x10] sm:$0xff] }
 0x1b6   : > { %3118 = vsyncadd (%p3934_p6), [#allocation24], 4294967280  ;;  %2415 = vmatprep.subr.bf16.mxu0 %v3155_v0  ;;  %2322 = vmatprep.mubr.msk.f32.mxu0 %vm3156_vm0, %v3157_v1  ;;  %v2416_v5 = vpack.c.bf16 %v678_v3, %v677_v2  ;;  %v680_v6 = vld [vmem:[#allocation7 + $0x18] sm:$0xff]  ;;  %vm688_vm1 = vcmask 261120   ;;  %v2239_v9 = vld [vmem:[#allocation8] ss:$0 sm:$0xff] }
 0x1b7   : > { %2330 = vmatprep.subr.mxu1 %v3157_v1  ;;  %2332 = vmatprep.mubr.msk.f32.mxu1 %vm3156_vm0, %v3157_v1  ;;  %v2419_v7 = vpack.c.bf16 %v680_v6, %v679_v4  ;;  %v3700_v8 = vld [vmem:[%s3652_s4] sm:$0xff]  ;;  %s3158_s28 = smov 104   ;;  %s3159_s22 = smov 120   ;;  %vm785_vm2 = vcmask 64512   ;;  %vm1883_vm3 = vcmask 523264  }
 0x1b8   : > { %2417 = vmatpush3.bf16.msra.mxu0 %v2416_v5  ;;  %s3160_s14 = smov 96   ;;  %s3161_s25 = smov 112   ;;  %v2241_v24 = vld [vmem:[%s578_s18] ss:$0 sm:$0xff] }
 0x1b9   : > { %2418 = vmatprep.subr.bf16.mxu0 %v3155_v0  ;;  %s3162_s19 = smov 64   ;;  %s2268_s24 = sshll.u32 %s3920_s0, 7 }
 0x1ba   : > { %s674_s6 = scalar_lea.vmem [#allocation25], %s2225_s27  ;;  %s3935_s1 = sld [smem:[#allocation46_spill]] }
 0x1bb   : > { %s2002_s21 = sshll.u32 %s674_s6, 4  ;;  %p3936_p8 = scmp.ne.s32.totalorder %s3911_s29, 0  ;;  %s3815_s21 = int_to_ptr.vmem [resolvable:$true] %s2002_s21 }
 0x1bc   : > { %2420 = vmatpush3.bf16.msra.mxu0 %v2419_v7  ;;  %s3163_s27 = smov [#allocation25]  }
 0x1bd   : > { %2325 = vmatprep.subr.mxu0 %v3157_v1  ;;  %s3043_s0 = sshll.u32 %s3163_s27, 4  ;;  %s3044_s0 = int_to_ptr.vmem [resolvable:$false] %s3043_s0 }
 0x1be   : > { %p3046_p13 = scmp.lt.s32.totalorder %s3815_s21, %s3044_s0 }
 0x1bf   : > { %2323 = vmatmul.mubr.msk.f32.vlgmr.msra.gmra.mrb[0].mxu0 %vm688_vm1, %v3700_v8 }
 0x1c0   : > { %2327 = vmatprep.mubr.msk.f32.mxu0 %vm3156_vm0, %v3157_v1  ;;  %s3813_s18 = scalar_lea.hbm %s3935_s1, %s2268_s24 }
 0x292   : > { %v758_v10 = vpop.f32.mrb[0].mxu0 }
 0x293   : > { %v3707_v11 = vadd.f32 %v2239_v9, %v758_v10  ;;  %v2324_v12 = vpop.f32.mrb[1].mxu0 }
 0x295   : > { %775 = vrot.lane.b32.xlu1 %v3707_v11, %s3158_s28  ;;  %771 = vrot.lane.b32.xlu0 %v3707_v11, %s3159_s22  ;;  %v762_v17 = vmul.f32 0.35355338, %v3707_v11 }
 0x299   : > { %783 = vrot.lane.b32.xlu1 %v3707_v11, %s3160_s14  ;;  %773 = vrot.lane.b32.xlu0 %v3707_v11, %s3161_s25 }
 0x307   : > { %v3713_v13 = vpop.permute.xlu1 %775  ;;  %v3715_v14 = vpop.permute.xlu0 %771 }
 0x308   : > { %860 = vrot.lane.b32.xlu0 %v3715_v14, %s3160_s14 }
 0x30b   : > { %v784_v15 = vpop.permute.xlu1 %783  ;;  %v3718_v16 = vpop.permute.xlu0 %773 }
 0x30c   : > { %2326 = vmatpush3.xpose.msk.msra.mxu0 %vm785_vm2, %v784_v15  ;;  %936 = vrot.lane.b32.xlu1 %v3718_v16, %s3160_s14 }
 0x30d   : > { %764 = vrot.lane.b32.xlu0 %v762_v17, %s3159_s22  ;;  %2335 = vmatprep.subr.mxu0 %v3157_v1  ;;  %s3039_s22 = scalar_lea.vmem %s3815_s21, 128 }
 0x30e   : > { %p3040_p11 = scmp.ne.s32.totalorder %s3815_s21, %s3039_s22 }
 0x30f   : > { %2328 = vmatmul.mubr.msk.f32.vlgmr.msra.gmra.mrb[2].mxu0 %vm785_vm2, %v762_v17 }
 0x310   : > { %1012 = vrot.lane.b32.xlu1 %v3713_v13, %s3160_s14  ;;  %2337 = vmatprep.mubr.msk.f32.mxu0 %vm3156_vm0, %v3157_v1  ;;  %p3041_p9 = pnand %p3040_p11, %p3936_p8  ;;  %s3045_s14 = scalar_lea.vmem %s3044_s0, 256 }
 0x311   : > { %766 = vrot.lane.b32.xlu0 %v762_v17, %s3161_s25  ;;  %p3047_p1 = scmp.lt.s32.totalorder %s3045_s14, %s3039_s22 }
 0x312   : > { %p3042_p12 = pneg %p3041_p9 }
 0x313   : > { %p3048_p3 = por %p3047_p1, %p3046_p13 }
 0x314   : > { %768 = vrot.lane.b32.xlu1 %v762_v17, %s3158_s28  ;;  %v1437_v17 = vld [vmem:[#allocation10 + $0x8] sm:$0xff]  ;;  %s1989_s28 = scalar_lea.sflag [#allocation4], %s3646_s3 }
 0x315   : > { %p3049_p2 = pnand %p3048_p3, %p3042_p12 }
 0x37a   : > { %v861_v18 = vpop.permute.xlu0 %860 }
 0x37b   : > { %2331 = vmatpush3.xpose.msk.msra.mxu1 %vm785_vm2, %v861_v18  ;;  %v1438_v18 = vld [vmem:[#allocation10 + $0x10] sm:$0xff] }
 0x37c   : > { %2340 = vmatprep.subr.mxu1 %v3157_v1 }
 0x37e   : > { %v937_v19 = vpop.permute.xlu1 %936 }
 0x37f   : > { %v765_v20 = vpop.permute.xlu0 %764  ;;  %2336 = vmatpush3.xpose.msk.msra.mxu0 %vm785_vm2, %v937_v19 }
 0x380   : > { %2333 = vmatmul.mubr.msk.f32.vlgmr.msra.gmra.mrb[0].mxu1 %vm785_vm2, %v765_v20  ;;  %2345 = vmatprep.subr.mxu0 %v3157_v1 }
 0x381   : > { %2342 = vmatprep.mubr.msk.f32.mxu1 %vm3156_vm0, %v3157_v1 }
 0x382   : > { %v1013_v21 = vpop.permute.xlu1 %1012 }
 0x383   : > { %v767_v22 = vpop.permute.xlu0 %766  ;;  %2341 = vmatpush3.xpose.msk.msra.mxu1 %vm785_vm2, %v1013_v21  ;;  %v1439_v21 = vld [vmem:[#allocation10 + $0x18] sm:$0xff] }
 0x384   : > { %2338 = vmatmul.mubr.msk.f32.vlgmr.msra.gmra.mrb[4].mxu0 %vm785_vm2, %v767_v22  ;;  %2350 = vmatprep.subr.mxu1 %v3157_v1 }
 0x385   : > { %2347 = vmatprep.mubr.msk.f32.mxu0 %vm3156_vm0, %v3157_v1 }
 0x386   : > { %v769_v23 = vpop.permute.xlu1 %768 }
 0x387   : > { %2343 = vmatmul.mubr.msk.f32.vlgmr.msra.gmra.mrb[2].mxu1 %vm785_vm2, %v769_v23 }
 0x388   : > { %2352 = vmatprep.mubr.msk.f32.mxu1 %vm3156_vm0, %v3157_v1 }
 0x3e2   : > { %v856_v25 = vpop.f32.mrb[2].mxu0 }
 0x3e3   : > { %v857_v26 = vadd.f32 %v2241_v24, %v856_v25  ;;  %v2329_v27 = vpop.f32.mrb[3].mxu0 }
 0x3e5   : > { %v1088_v28 = vsel %vm785_vm2, %v857_v26, -inf }
 0x3e6   : > { %1089 = vmax.xlane.f32.xlu0 %v1088_v28 }
 0x453   : > { %v932_v29 = vpop.f32.mrb[0].mxu1 }
 0x454   : > { %v933_v30 = vadd.f32 %v2241_v24, %v932_v29  ;;  %v2334_v31 = vpop.f32.mrb[1].mxu1 }
 0x456   : > { %v1091_v32 = vsel %vm785_vm2, %v933_v30, -inf }
 0x457   : > { %1092 = vmax.xlane.f32.xlu1 %v1091_v32  ;;  %v1008_v33 = vpop.f32.mrb[4].mxu0 }
 0x458   : > { %v1009_v34 = vadd.f32 %v2241_v24, %v1008_v33  ;;  %v2339_v35 = vpop.f32.mrb[5].mxu0 }
 0x45a   : > { %v1084_v36 = vpop.f32.mrb[2].mxu1  ;;  %v1094_v37 = vsel %vm785_vm2, %v1009_v34, -inf }
 0x45b   : > { %v1085_v38 = vadd.f32 %v2241_v24, %v1084_v36  ;;  %1095 = vmax.xlane.f32.xlu0 %v1094_v37  ;;  %v2344_v39 = vpop.f32.mrb[3].mxu1 }
 0x45d   : > { %v1097_v40 = vsel %vm785_vm2, %v1085_v38, -inf }
 0x45f   : > { %1098 = vmax.xlane.f32.xlu0 %v1097_v40 }
 0x468   : > { %1132 = vrot.lane.b32.xlu1 %v3707_v11, %s3162_s19 }
 0x473   : > { %v1090_v41 = vpop.xlane.xlu0 %1089 }
 0x474   : > { %v1100_v42 = vsub.f32 %v857_v26, %v1090_v41  ;;  %v2258_v41 = vld [vmem:[#allocation11] ss:$0 sm:$0xff] }
 0x476   : > { %v1104_v43 = vmul.f32 1.442695, %v1100_v42 }
 0x478   : > { %2621 = vpow2.f32 %v1104_v43 }
 0x482   : > { %v2622_v44 = vpop.eup %2621 }
 0x483   : > { %v1112_v45 = vsel %vm785_vm2, %v2622_v44, 0.0 }
 0x48c   : > { %1113 = vadd.xlane.f32.xlu1 %v1112_v45 }
 0x4e4   : > { %v1093_v46 = vpop.xlane.xlu1 %1092 }
 0x4e5   : > { %v1101_v47 = vsub.f32 %v933_v30, %v1093_v46 }
 0x4e7   : > { %v1106_v48 = vmul.f32 1.442695, %v1101_v47 }
 0x4e8   : > { %v1133_v49 = vpop.permute.xlu1 %1132  ;;  %v1096_v50 = vpop.xlane.xlu0 %1095 }
 0x4e9   : > { %2623 = vpow2.f32 %v1106_v48  ;;  %v1102_v51 = vsub.f32 %v1009_v34, %v1096_v50  ;;  %2346 = vmatpush3.msra.mxu0 %v1133_v49 }
 0x4ea   : > { %2355 = vmatprep.subr.mxu0 %v3157_v1 }
 0x4eb   : > { %v1108_v52 = vmul.f32 1.442695, %v1102_v51  ;;  %v1778_v51 = vld [vmem:[#allocation16] sm:$0xff] }
 0x4ec   : > { %v1099_v53 = vpop.xlane.xlu0 %1098 }
 0x4ed   : > { %2625 = vpow2.f32 %v1108_v52  ;;  %v1103_v54 = vsub.f32 %v1085_v38, %v1099_v53  ;;  %v1779_v52 = vld [vmem:[#allocation16 + $0x8] sm:$0xff] }
 0x4ee   : > { %v2422_v53 = vpack.c.bf16 %v1779_v52, %v1778_v51 }
 0x4ef   : > { %v1110_v55 = vmul.f32 1.442695, %v1103_v54  ;;  %v1780_v54 = vld [vmem:[#allocation16 + $0x10] sm:$0xff] }
 0x4f1   : > { %2627 = vpow2.f32 %v1110_v55  ;;  %v1781_v55 = vld [vmem:[#allocation16 + $0x18] sm:$0xff] }
 0x4f3   : > { %v2624_v56 = vpop.eup %2623 }
 0x4f4   : > { %v1115_v57 = vsel %vm785_vm2, %v2624_v56, 0.0 }
 0x4f5   : > { %1116 = vadd.xlane.f32.xlu0 %v1115_v57 }
 0x4f7   : > { %v2626_v58 = vpop.eup %2625 }
 0x4f8   : > { %v1118_v59 = vsel %vm785_vm2, %v2626_v58, 0.0 }
 0x4f9   : > { %1119 = vadd.xlane.f32.xlu1 %v1118_v59 }
 0x4fb   : > { %v2628_v60 = vpop.eup %2627 }
 0x4fc   : > { %v1121_v61 = vsel %vm785_vm2, %v2628_v60, 0.0 }
 0x4fd   : > { %1122 = vadd.xlane.f32.xlu0 %v1121_v61 }
 0x50a   : > { %1284 = vrot.lane.b32.xlu1 %v3718_v16, %s3162_s19 }
 0x50e   : > { %1360 = vrot.lane.b32.xlu1 %v3713_v13, %s3162_s19 }
 0x513   : > { %1208 = vrot.lane.b32.xlu0 %v3715_v14, %s3162_s19  ;;  %v1436_v14 = vld [vmem:[#allocation10] sm:$0xff] }
 0x519   : > { %v1114_v62 = vpop.xlane.xlu1 %1113 }
 0x51a   : > { %2629 = vrcp.f32 %v1114_v62  ;;  %v2260_v62 = vld [vmem:[#allocation14] ss:$0 sm:$0xff] }
 0x524   : > { %v2630_v63 = vpop.eup %2629 }
 0x525   : > { %v1128_v2 = vmul.f32 %v2630_v63, %v2622_v44 }
 0x527   : > { %2348 = vmatmul.mubr.msk.f32.vlgmr.msra.gmra.mrb[6].mxu0 %vm785_vm2, %v1128_v2 }
 0x528   : > { %2357 = vmatprep.mubr.msk.f32.mxu0 %vm3156_vm0, %v3157_v1 }
 0x582   : > { %v1117_v3 = vpop.xlane.xlu0 %1116 }
 0x583   : > { %2631 = vrcp.f32 %v1117_v3  ;;  %v1868_v3 = vld [vmem:[#allocation19] sm:$0xff] }
 0x586   : > { %v1120_v4 = vpop.xlane.xlu1 %1119 }
 0x587   : > { %2633 = vrcp.f32 %v1120_v4  ;;  %v1869_v4 = vld [vmem:[#allocation19 + $0x8] sm:$0xff] }
 0x58a   : > { %v1285_v5 = vpop.permute.xlu1 %1284  ;;  %v1123_v6 = vpop.xlane.xlu0 %1122 }
 0x58b   : > { %2635 = vrcp.f32 %v1123_v6  ;;  %2356 = vmatpush3.msra.mxu0 %v1285_v5  ;;  %v2428_v5 = vpack.c.bf16 %v1869_v4, %v1868_v3  ;;  %v1870_v6 = vld [vmem:[#allocation19 + $0x10] sm:$0xff] }
 0x58c   : > { %2365 = vmatprep.subr.mxu0 %v3157_v1 }
 0x58d   : > { %v2632_v7 = vpop.eup %2631 }
 0x58e   : > { %v1129_v9 = vmul.f32 %v2632_v7, %v2624_v56  ;;  %v1209_v10 = vpop.permute.xlu0 %1208  ;;  %v1361_v11 = vpop.permute.xlu1 %1360  ;;  %v2425_v56 = vpack.c.bf16 %v1781_v55, %v1780_v54  ;;  %v1871_v7 = vld [vmem:[#allocation19 + $0x18] sm:$0xff] }
 0x58f   : > { %2351 = vmatpush3.msra.mxu1 %v1209_v10  ;;  %v1872_v10 = vld [vmem:[#allocation19 + $0x20] sm:$0xff] }
 0x590   : > { %2353 = vmatmul.mubr.msk.f32.vlgmr.msra.gmra.mrb[4].mxu1 %vm785_vm2, %v1129_v9  ;;  %2360 = vmatprep.subr.mxu1 %v3157_v1  ;;  %v2431_v9 = vpack.c.bf16 %v1871_v7, %v1870_v6 }
 0x591   : > { %v2634_v12 = vpop.eup %2633  ;;  %2361 = vmatpush3.msra.mxu1 %v1361_v11  ;;  %2362 = vmatprep.mubr.msk.f32.mxu1 %vm3156_vm0, %v3157_v1  ;;  %v1873_v11 = vld [vmem:[#allocation19 + $0x28] sm:$0xff] }
 0x592   : > { %v1130_v13 = vmul.f32 %v2634_v12, %v2626_v58  ;;  %2370 = vmatprep.subr.mxu1 %v3157_v1  ;;  %v2434_v12 = vpack.c.bf16 %v1873_v11, %v1872_v10 }
 0x594   : > { %2358 = vmatmul.mubr.msk.f32.vlgmr.msra.gmra.mrb[8].mxu0 %vm785_vm2, %v1130_v13  ;;  %v1874_v13 = vld [vmem:[#allocation19 + $0x30] sm:$0xff] }
 0x595   : > { %v2636_v15 = vpop.eup %2635  ;;  %2366 = vmatpush3.msra.mxu0 %v1436_v14  ;;  %2367 = vmatprep.mubr.msk.f32.mxu0 %vm3156_vm0, %v3157_v1  ;;  %v1875_v14 = vld [vmem:[#allocation19 + $0x38] sm:$0xff] }
 0x596   : > { %v1131_v16 = vmul.f32 %v2636_v15, %v2628_v60  ;;  %2375 = vmatprep.subr.mxu0 %v3157_v1  ;;  %v2259_v60 = vld [vmem:[#allocation13] ss:$0 sm:$0xff]  ;;  %v2437_v15 = vpack.c.bf16 %v1875_v14, %v1874_v13 }
 0x598   : > { %2363 = vmatmul.mubr.msk.f32.vlgmr.msra.gmra.mrb[6].mxu1 %vm785_vm2, %v1131_v16  ;;  %v2261_v16 = vld [vmem:[#allocation17] ss:$0 sm:$0xff] }
 0x599   : > { %2372 = vmatprep.mubr.msk.f32.mxu1 %vm3156_vm0, %v3157_v1  ;;  %2371 = vmatpush3.msra.mxu1 %v1437_v17 }
 0x59a   : > { %2380 = vmatprep.subr.mxu1 %v3157_v1 }
 0x5fa   : > { %v1204_v19 = vpop.f32.mrb[6].mxu0 }
 0x5fb   : > { %v2349_v20 = vpop.f32.mrb[7].mxu0  ;;  %2368 = vmatmul.mubr.msk.f32.vlgmr.msra.gmra.mrb[10].mxu0 %vm785_vm2, %v1204_v19 }
 0x5fc   : > { %2376 = vmatpush3.msra.mxu0 %v1438_v18  ;;  %2377 = vmatprep.mubr.msk.f32.mxu0 %vm3156_vm0, %v3157_v1 }
 0x5fd   : > { %2421 = vmatprep.subr.bf16.mxu0 %v3155_v0 }
 0x663   : > { %v1280_v22 = vpop.f32.mrb[4].mxu1 }
 0x664   : > { %v2354_v23 = vpop.f32.mrb[5].mxu1  ;;  %2373 = vmatmul.mubr.msk.f32.vlgmr.msra.gmra.mrb[8].mxu1 %vm785_vm2, %v1280_v22 }
 0x665   : > { %2381 = vmatpush3.msra.mxu1 %v1439_v21  ;;  %2382 = vmatprep.mubr.msk.f32.mxu1 %vm3156_vm0, %v3157_v1 }
 0x666   : > { %2427 = vmatprep.subr.bf16.mxu1 %v3155_v0 }
 0x667   : > { %v1356_v24 = vpop.f32.mrb[8].mxu0 }
 0x668   : > { %v2359_v25 = vpop.f32.mrb[9].mxu0  ;;  %2378 = vmatmul.mubr.msk.f32.vlgmr.msra.gmra.mrb[12].mxu0 %vm785_vm2, %v1356_v24 }
 0x669   : > { %2393 = vmatprep.mubr.msk.f32.mxu0 %vm3156_vm0, %v3157_v1  ;;  %2423 = vmatpush3.bf16.msra.mxu0 %v2422_v53  ;;  %v2263_v25 = vld [vmem:[#allocation20] ss:$0 sm:$0xff] }
 0x66a   : > { %2424 = vmatprep.subr.bf16.mxu0 %v3155_v0 }
 0x66b   : > { %v1432_v26 = vpop.f32.mrb[6].mxu1 }
 0x66c   : > { %v2364_v27 = vpop.f32.mrb[7].mxu1  ;;  %2383 = vmatmul.mubr.msk.f32.vlgmr.msra.gmra.mrb[10].mxu1 %vm785_vm2, %v1432_v26 }
 0x66d   : > { %2412 = vmatprep.mubr.msk.f32.mxu1 %vm3156_vm0, %v3157_v1  ;;  %2426 = vmatpush3.bf16.msra.mxu0 %v2425_v56 }
 0x66e   : > { %2429 = vmatpush3.bf16.msra.mxu1 %v2428_v5 }
 0x66f   : > { %2430 = vmatprep.subr.bf16.mxu1 %v3155_v0 }
 0x672   : > { %2432 = vmatpush3.bf16.msra.mxu1 %v2431_v9 }
 0x673   : > { %2433 = vmatprep.subr.bf16.mxu1 %v3155_v0 }
 0x676   : > { %2435 = vmatpush3.bf16.msra.mxu1 %v2434_v12 }
 0x677   : > { %2436 = vmatprep.subr.bf16.mxu1 %v3155_v0 }
 0x67a   : > { %2438 = vmatpush3.bf16.msra.mxu1 %v2437_v15 }
 0x6ce   : > { %v1509_v28 = vpop.f32.mrb[10].mxu0 }
 0x6cf   : > { %v2369_v29 = vpop.f32.mrb[11].mxu0  ;;  %v1732_v31 = vsel %vm688_vm1, %v1509_v28, 0.0 }
 0x737   : > { %v1582_v30 = vpop.f32.mrb[8].mxu1 }
 0x738   : > { %v1733_v32 = vsel %vm688_vm1, %v1582_v30, 0.0  ;;  %v2374_v33 = vpop.f32.mrb[9].mxu1 }
 0x739   : > { %v1734_v34 = vadd.f32 %v1733_v32, %v1732_v31 }
 0x73b   : > { %v1655_v35 = vpop.f32.mrb[12].mxu0 }
 0x73c   : > { %v1735_v36 = vsel %vm688_vm1, %v1655_v35, 0.0  ;;  %v2379_v37 = vpop.f32.mrb[13].mxu0 }
 0x73d   : > { %v1736_v38 = vadd.f32 %v1735_v36, %v1734_v34 }
 0x73f   : > { %v1728_v39 = vpop.f32.mrb[10].mxu1 }
 0x740   : > { %v1737_v40 = vsel %vm688_vm1, %v1728_v39, 0.0  ;;  %v2384_v42 = vpop.f32.mrb[11].mxu1  ;;  %v2265_v39 = vld [vmem:[#allocation22] ss:$0 sm:$0xff] }
 0x741   : > { %v1738_v1 = vadd.f32 %v1737_v40, %v1736_v38 }
 0x743   : > { %v1746_v43 = vadd.f32 %v2258_v41, %v1738_v1  ;;  %v2266_v41 = vld [vmem:[#allocation23] ss:$0 sm:$0xff] }
 0x745   : > { %v1747_v44 = vadd.f32 %v1746_v43, %v3700_v8 }
 0x747   : > { %v1750_v45 = vsel %vm688_vm1, %v1747_v44, 0.0 }
 0x748   : > { %1751 = vadd.xlane.f32.xlu0 %v1750_v45 }
 0x7d5   : > { %v1752_v46 = vpop.xlane.xlu0 %1751 }
 0x7d6   : > { %v1754_v47 = vmul.f32 0.03125, %v1752_v46 }
 0x7d8   : > { %v1755_v48 = vsub.f32 %v1747_v44, %v1754_v47 }
 0x7da   : > { %v1756_v49 = vmul.f32 %v1755_v48, %v1755_v48 }
 0x7dc   : > { %v1757_v50 = vsel %vm688_vm1, %v1756_v49, 0.0 }
 0x7dd   : > { %1758 = vadd.xlane.f32.xlu1 %v1757_v50 }
 0x86a   : > { %v1759_v8 = vpop.xlane.xlu1 %1758 }
 0x86b   : > { %v1760_v57 = vmul.f32 0.03125, %v1759_v8 }
 0x86d   : > { %v1761_v58 = vadd.f32 1e-12, %v1760_v57 }
 0x86f   : > { %2637 = vrsqrt.f32 %v1761_v58 }
 0x879   : > { %v2638_v59 = vpop.eup %2637 }
 0x87a   : > { %v1763_v61 = vmul.f32 %v2638_v59, %v1755_v48 }
 0x87c   : > { %v1770_v63 = vmul.f32 %v2259_v60, %v1763_v61 }
 0x87e   : > { %v1777_v2 = vadd.f32 %v2260_v62, %v1770_v63 }
 0x880   : > { %2394 = vmatmul.mubr.msk.f32.vlgmr.msra.gmra.mrb[14].mxu0 %vm688_vm1, %v1777_v2 }
 0x953   : > { %v1858_v17 = vpop.f32.mrb[14].mxu0 }
 0x954   : > { %v1859_v18 = vadd.f32 %v2261_v16, %v1858_v17  ;;  %v2395_v19 = vpop.f32.mrb[15].mxu0 }
 0x956   : > { %v1864_v20 = vmul.f32 0.70710677, %v1859_v18  ;;  %v1862_v22 = vmul.f32 0.5, %v1859_v18 }
 0x958   : > { %2639 = verf.f32 %v1864_v20 }
 0x962   : > { %v2640_v21 = vpop.eup %2639 }
 0x963   : > { %v1866_v23 = vadd.f32 1.0, %v2640_v21 }
 0x965   : > { %v1867_v24 = vmul.f32 %v1866_v23, %v1862_v22 }
 0x967   : > { %2413 = vmatmul.mubr.msk.f32.vlgmr.msra.gmra.mrb[12].mxu1 %vm1883_vm3, %v1867_v24 }
 0xa3a   : > { %v1953_v26 = vpop.f32.mrb[12].mxu1 }
 0xa3b   : > { %v1954_v27 = vadd.f32 %v2263_v25, %v1953_v26  ;;  %v2414_v0 = vpop.f32.mrb[13].mxu1 }
 0xa3d   : > { %v1957_v28 = vadd.f32 %v1954_v27, %v1777_v2 }
 0xa3f   : > { %v1960_v29 = vsel %vm688_vm1, %v1957_v28, 0.0 }
 0xa40   : > { %1961 = vadd.xlane.f32.xlu0 %v1960_v29 }
 0xacd   : > { %v1962_v30 = vpop.xlane.xlu0 %1961 }
 0xace   : > { %v1963_v31 = vmul.f32 0.03125, %v1962_v30 }
 0xad0   : > { %v1964_v32 = vsub.f32 %v1957_v28, %v1963_v31 }
 0xad2   : > { %v1965_v33 = vmul.f32 %v1964_v32, %v1964_v32 }
 0xad4   : > { %v1966_v34 = vsel %vm688_vm1, %v1965_v33, 0.0 }
 0xad5   : > { %1967 = vadd.xlane.f32.xlu0 %v1966_v34 }
 0xb62   : > { %v1968_v35 = vpop.xlane.xlu0 %1967 }
 0xb63   : > { %v1969_v36 = vmul.f32 0.03125, %v1968_v35 }
 0xb65   : > { %v1970_v37 = vadd.f32 1e-12, %v1969_v36 }
 0xb67   : > { %2641 = vrsqrt.f32 %v1970_v37 }
 0xb71   : > { %v2642_v38 = vpop.eup %2641 }
 0xb72   : > { %v1972_v40 = vmul.f32 %v2642_v38, %v1964_v32 }
 0xb74   : > { %v1979_v42 = vmul.f32 %v2265_v39, %v1972_v40 }
 0xb76   : > { %v1986_v1 = vadd.f32 %v2266_v41, %v1979_v42 }
 0xb78   : > { %1987 = vst.msk [vmem:[%s674_s6] sm:$0xff] %vm688_vm1, %v1986_v1 }
 0xb79   : > { %3052 = shalt.err (!%p3049_p2)
}
 0xb7a   : > { %s3053_s3 = scalar_lea.hbm %s3813_s18, 128  ;;  %s3057_s24 = scalar_lea.hbm %s3935_s1, 256 }
 0xb7b   : > { %p3054_p4 = scmp.ne.s32.totalorder %s3813_s18, %s3053_s3  ;;  %p3058_p7 = scmp.lt.u32.totalorder %s3813_s18, %s3935_s1 }
 0xb7c   : > { %p3059_p0 = scmp.lt.u32.totalorder %s3057_s24, %s3053_s3  ;;  %p3061_p11 = scmp.lt.u32.totalorder %s3053_s3, %s3813_s18 }
 0xb7d   : > { %p3055_p10 = pnand %p3054_p4, %p3936_p8 }
 0xb7e   : > { %p3060_p6 = por %p3059_p0, %p3058_p7 }
 0xb7f   : > { %p3056_p5 = pneg %p3055_p10 }
 0xb80   : > { %p3062_p9 = por %p3061_p11, %p3060_p6 }
 0xb82   : > { %p3063_p12 = pnand %p3062_p9, %p3056_p5 }
 0xb84   : > { %3066 = shalt.err (!%p3063_p12)
}
 0xb85   : > { %2491 = dma.vmem_to_hbm [thread:$0]  (%p3936_p8), %s3815_s21, 128, %s3813_s18, %s1989_s28  }
 0xb86 PF: > { %s3937_s26 = sld [smem:[#allocation36_spill]]  ;;  %p3938_p13 = scmp.ne.s32.totalorder %s3912_s17, 0 }
 0xb87   : > { %p3939_p1 = scmp.ge.s32.totalorder %s3137_s16, 2 }
 0xb89   : > { %p2538_p3 = pnand %p3939_p1, %p3938_p13 }
 0xb8c   : > { %s2014_s22 = sand.u32 1, %s3937_s26  }
 0xb8d   : > { %s2015_s27 = scalar_lea.sflag [#allocation4], %s2014_s22 }
 0xb8e   : > { %3120 = dma.done.wait (!%p2538_p3), %s2015_s27, 128  }
 0xb8f   : > { %3122 = vsyncadd (!%p2538_p3), %s2015_s27, 4294967168  ;;  %p36_p2 = scmp.ge.s32.totalorder %s3537_s23, 4   ;;  %s3940_s29 = smov %s3129_s30 }
 0xb90   : > { %s3941_s30 = smov %s3133_s15  ;;  %s3942_s15 = smov %s3548_s2 }
 0xb91   : > { %s3943_s16 = smov %s3537_s23  ;;  %38 = sbr.rel (!%p36_p2) target bundleno = 22 (0x16), region = 182 }
 0xb98   :  { %2020 = vsyncpa [#allocation3], 1 }
 0xb99   :  { %2022 = vsyncpa [#allocation3 + $0x1], 1 }
 0xb9a   :  { %2023 = vsyncpa [#allocation6], 1 }
 0xb9b   :  { %2025 = vsyncpa [#allocation6 + $0x1], 1 }
 0xb9c   :  { %2026 = vsyncpa [#allocation9], 1 }
 0xb9d   :  { %2027 = vsyncpa [#allocation12], 1 }
 0xb9e   :  { %2028 = vsyncpa [#allocation15], 1 }
 0xb9f   :  { %2029 = vsyncpa [#allocation18], 1 }
 0xba0   :  { %2030 = vsyncpa [#allocation21], 1 }
 0xba1   :  { %2031 = vsyncpa [#allocation24], 1 }
 0xba2   :  { %2032 = vsyncpa [#allocation4], 1 }
 0xba3   :  { %2034 = vsyncpa [#allocation4 + $0x1], 1 }

// kernel: tpu_custom_call.1
= control target key start
LH: loop header
LB: loop body
LE: loop exit
PB: predicated region body
PF: predicated region fallthrough
CT: control target
= control target key end

     0   :  { %s3858_s0 = inlined_call_operand.hbm [shape: f32[2,8,32], index: 0, kind: input, shape index: {}]   ;;  %s3859_s1 = inlined_call_operand.hbm [shape: f32[2,1,8], index: 1, kind: input, shape index: {}]   ;;  %s3860_s2 = inlined_call_operand.hbm [shape: f32[32,96], index: 2, kind: input, shape index: {}]   ;;  %s3861_s3 = inlined_call_operand.hbm [shape: f32[1,96], index: 3, kind: input, shape index: {}]   ;;  %s3862_s4 = inlined_call_operand.hbm [shape: f32[4,8,32], index: 4, kind: input, shape index: {}]   ;;  %s3863_s5 = inlined_call_operand.hbm [shape: f32[1,32], index: 5, kind: input, shape index: {}]   ;;  %s3864_s6 = inlined_call_operand.hbm [shape: f32[1,32], index: 6, kind: input, shape index: {}]   ;;  %s3865_s7 = inlined_call_operand.hbm [shape: f32[1,32], index: 7, kind: input, shape index: {}]   ;;  %s3866_s8 = inlined_call_operand.hbm [shape: f32[32,64], index: 8, kind: input, shape index: {}]   ;;  %s3867_s9 = inlined_call_operand.hbm [shape: f32[1,64], index: 9, kind: input, shape index: {}]   ;;  %s3868_s10 = inlined_call_operand.hbm [shape: f32[64,32], index: 10, kind: input, shape index: {}]   ;;  %s3869_s11 = inlined_call_operand.hbm [shape: f32[1,32], index: 11, kind: input, shape index: {}]   ;;  %s3870_s12 = inlined_call_operand.hbm [shape: f32[1,32], index: 12, kind: input, shape index: {}]   ;;  %s3871_s13 = inlined_call_operand.hbm [shape: f32[1,32], index: 13, kind: input, shape index: {}]   ;;  %s3872_s14 = inlined_call_operand.hbm [shape: f32[2,8,32], index: 14, kind: output, shape index: {}]  }
   0x1   :  { %3886 = sst [smem:[#allocation39_spill]] %s3858_s0 }
   0x2   :  { %3887 = sst [smem:[#allocation40_spill]] %s3859_s1 }
   0x3   :  { %3888 = sst [smem:[#allocation41_spill]] %s3860_s2 }
   0x4   :  { %3889 = sst [smem:[#allocation42_spill]] %s3861_s3 }
   0x5   :  { %3890 = sst [smem:[#allocation43_spill]] %s3862_s4 }
   0x6   :  { %3891 = sst [smem:[#allocation44_spill]] %s3863_s5 }
   0x7   :  { %3892 = sst [smem:[#allocation45_spill]] %s3864_s6 }
   0x8   :  { %3893 = sst [smem:[#allocation46_spill]] %s3872_s14 }
   0x9   :  { %19 = vsyncpa [#allocation3], 0 }
   0xa   :  { %21 = vsyncpa [#allocation3 + $0x1], 0 }
   0xb   :  { %22 = vsyncpa [#allocation6], 0 }
   0xc   :  { %24 = vsyncpa [#allocation6 + $0x1], 0 }
   0xd   :  { %25 = vsyncpa [#allocation9], 0 }
   0xe   :  { %26 = vsyncpa [#allocation12], 0 }
   0xf   :  { %27 = vsyncpa [#allocation15], 0 }
  0x10   :  { %28 = vsyncpa [#allocation18], 0 }
  0x11   :  { %29 = vsyncpa [#allocation21], 0 }
  0x12   :  { %30 = vsyncpa [#allocation24], 0 }
  0x13   :  { %31 = vsyncpa [#allocation4], 0 }
  0x14   :  { %33 = vsyncpa [#allocation4 + $0x1], 0  ;;  %s3239_s29 = smov 0   ;;  %s3241_s30 = smov 0  }
  0x15   :  { %s3243_s15 = smov 0   ;;  %s3245_s16 = smov 0  }
  0x16 LB: > { %3894 = sst [smem:[#allocation36_spill]] %s3125_s29  ;;  %s3139_s17 = smov [#allocation7]   ;;  %s3137_s16 = sphi %s3245_s16, %s3943_s16   ;;  %s3133_s15 = sphi %s3243_s15, %s3942_s15   ;;  %s3129_s30 = sphi %s3241_s30, %s3941_s30   ;;  %s3125_s29 = sphi %s3239_s29, %s3940_s29  }
  0x17   : > { %s386_s18 = sshll.u32 %s3139_s17, 4  ;;  %s3260_s19 = sadd.s32 4294967295, %s3137_s16   ;;  %s3265_s18 = int_to_ptr.vmem [resolvable:$true] %s386_s18 }
  0x18   : > { %3895 = sst [smem:[#allocation37_spill]] %s3260_s19  ;;  %p2207_p0 = scmp.ge.s32.totalorder %s3137_s16, 1 }
  0x19   : > { %p3882_p1 = scmp.eq.s32.totalorder %s3260_s19, 0  ;;  %p374_p2 = scmp.lt.s32.totalorder %s3137_s16, 3 }
  0x1a   : > { %s3140_s21 = smov [#allocation8]   ;;  %s3141_s24 = smov [#allocation11]  }
  0x1b   : > { %p3267_p3 = pnand %p2207_p0, %p374_p2  ;;  %s400_s22 = sshll.u32 %s3140_s21, 4  ;;  %s3280_s22 = int_to_ptr.vmem [resolvable:$true] %s400_s22 }
  0x1c   : > { %s424_s25 = sshll.u32 %s3141_s24, 4  ;;  %s3899_s2 = sld [smem:[#allocation41_spill]]  ;;  %s3282_s25 = int_to_ptr.vmem [resolvable:$true] %s424_s25 }
  0x1d   : > { %s3896_s20 = scalar_select %p3267_p3, 1, 0 }
  0x1e   : > { %p2493_p5 = pneg %p3267_p3 }
  0x1f   : > { %3897 = sst [smem:[#allocation38_spill]] %s3896_s20 }
  0x20   : > { %p3276_p6 = pnand %p2493_p5, %p3882_p1 }
  0x22   : > { %s2643_s28 = scalar_lea.hbm %s3899_s2, 512  ;;  %p3292_p8 = pneg %p3276_p6 }
  0x23   : > { %p2644_p7 = scmp.ne.s32.totalorder %s3899_s2, %s2643_s28  ;;  %p2650_p11 = scmp.lt.u32.totalorder %s2643_s28, %s3899_s2 }
  0x25   : > { %p2646_p9 = pnand %p3292_p8, %p2644_p7 }
  0x27   : > { %p2647_p10 = pneg %p2646_p9 }
  0x29   : > { %p2652_p12 = pnand %p2650_p11, %p2647_p10 }
  0x2b   : > { %2655 = shalt.err (!%p2652_p12)
}
  0x2c   : > { %s2656_s14 = scalar_lea.vmem %s3265_s18, 512  ;;  %p2664_p5 = scmp.lt.s32.totalorder %s3265_s18, %s3265_s18 }
  0x2d   : > { %p2657_p13 = scmp.ne.s32.totalorder %s3265_s18, %s2656_s14  ;;  %p2665_p4 = scmp.lt.s32.totalorder %s2656_s14, %s2656_s14 }
  0x2f   : > { %p2659_p0 = pnand %p2657_p13, %p3292_p8  ;;  %p2666_p7 = por %p2665_p4, %p2664_p5 }
  0x31   : > { %p2660_p2 = pneg %p2659_p0 }
  0x33   : > { %p2667_p9 = pnand %p2666_p7, %p2660_p2 }
  0x35   : > { %2670 = shalt.err (!%p2667_p9)
}
  0x36   : > { %s3880_s26 = smov 128   ;;  %s3143_s20 = smov 8  }
  0x37   : > { %2496 = dma.hbm_to_vmem [thread:$0]  (!%p3276_p6), %s3899_s2, 512, %s3265_s18, [#allocation6], %s3880_s26, %s3880_s26, %s3143_s20  }
  0x38   : > { %s3901_s3 = sld [smem:[#allocation42_spill]] }
  0x3e   : > { %s2671_s14 = scalar_lea.hbm %s3901_s3, 16 }
  0x3f   : > { %p2672_p4 = scmp.ne.s32.totalorder %s3901_s3, %s2671_s14  ;;  %p2678_p12 = scmp.lt.u32.totalorder %s2671_s14, %s3901_s3 }
  0x41   : > { %p2674_p10 = pnand %p2672_p4, %p3292_p8 }
  0x43   : > { %p2675_p11 = pneg %p2674_p10 }
  0x45   : > { %p2680_p13 = pnand %p2678_p12, %p2675_p11 }
  0x47   : > { %2683 = shalt.err (!%p2680_p13)
}
  0x48   : > { %s2684_s18 = scalar_lea.vmem %s3280_s22, 16  ;;  %s2691_s0 = scalar_lea.vmem %s3280_s22, 32 }
  0x49   : > { %p2685_p0 = scmp.ne.s32.totalorder %s3280_s22, %s2684_s18  ;;  %p2692_p7 = scmp.lt.s32.totalorder %s3280_s22, %s3280_s22 }
  0x4a   : > { %p2693_p9 = scmp.lt.s32.totalorder %s2691_s0, %s2684_s18 }
  0x4b   : > { %p2687_p2 = pnand %p2685_p0, %p3292_p8 }
  0x4c   : > { %p2694_p4 = por %p2693_p9, %p2692_p7 }
  0x4d   : > { %p2688_p5 = pneg %p2687_p2 }
  0x4f   : > { %p2695_p10 = pnand %p2694_p4, %p2688_p5 }
  0x51   : > { %2698 = shalt.err (!%p2695_p10)
}
  0x52   : > { %2499 = dma.hbm_to_vmem [thread:$0]  (!%p3276_p6), %s3901_s3, 16, %s3280_s22, [#allocation9]  }
  0x53   : > { %s3902_s5 = sld [smem:[#allocation44_spill]] }
  0x59   : > { %s2699_s28 = scalar_lea.hbm %s3902_s5, 16 }
  0x5a   : > { %p2700_p11 = scmp.ne.s32.totalorder %s3902_s5, %s2699_s28  ;;  %p2706_p0 = scmp.lt.u32.totalorder %s2699_s28, %s3902_s5 }
  0x5c   : > { %p2702_p12 = pnand %p2700_p11, %p3292_p8 }
  0x5e   : > { %p2703_p13 = pneg %p2702_p12 }
  0x60   : > { %p2708_p2 = pnand %p2706_p0, %p2703_p13 }
  0x62   : > { %2711 = shalt.err (!%p2708_p2)
}
  0x63   : > { %s2712_s22 = scalar_lea.vmem %s3282_s25, 16  ;;  %s2719_s0 = scalar_lea.vmem %s3282_s25, 32 }
  0x64   : > { %p2713_p5 = scmp.ne.s32.totalorder %s3282_s25, %s2712_s22  ;;  %p2720_p4 = scmp.lt.s32.totalorder %s3282_s25, %s3282_s25 }
  0x65   : > { %p2721_p10 = scmp.lt.s32.totalorder %s2719_s0, %s2712_s22 }
  0x66   : > { %p2715_p7 = pnand %p2713_p5, %p3292_p8 }
  0x67   : > { %p2722_p11 = por %p2721_p10, %p2720_p4 }
  0x68   : > { %p2716_p9 = pneg %p2715_p7 }
  0x6a   : > { %p2723_p12 = pnand %p2722_p11, %p2716_p9 }
  0x6c   : > { %2726 = shalt.err (!%p2723_p12)
}
  0x6d   : > { %2505 = dma.hbm_to_vmem [thread:$0]  (!%p3276_p6), %s3902_s5, 16, %s3282_s25, [#allocation12]  }
  0x6e   : > { %s3144_s19 = smov [#allocation14]   ;;  %s3145_s28 = smov [#allocation17]  }
  0x6f   : > { %s446_s27 = sshll.u32 %s3144_s19, 4  ;;  %s470_s17 = sshll.u32 %s3145_s28, 4  ;;  %s447_s27 = int_to_ptr.vmem [resolvable:$true] %s446_s27  ;;  %s471_s17 = int_to_ptr.vmem [resolvable:$true] %s470_s17 }
  0x70   : > { %s2727_s18 = scalar_lea.hbm %s3865_s7, 16 }
  0x71   : > { %p2728_p13 = scmp.ne.s32.totalorder %s3865_s7, %s2727_s18  ;;  %p2734_p5 = scmp.lt.u32.totalorder %s2727_s18, %s3865_s7 }
  0x73   : > { %p2730_p0 = pnand %p2728_p13, %p3292_p8 }
  0x75   : > { %p2731_p2 = pneg %p2730_p0 }
  0x77   : > { %p2736_p7 = pnand %p2734_p5, %p2731_p2 }
  0x79   : > { %2739 = shalt.err (!%p2736_p7)
}
  0x7a   : > { %s2740_s25 = scalar_lea.vmem %s447_s27, 16  ;;  %s2747_s29 = scalar_lea.vmem %s447_s27, 32 }
  0x7b   : > { %p2741_p9 = scmp.ne.s32.totalorder %s447_s27, %s2740_s25  ;;  %p2748_p11 = scmp.lt.s32.totalorder %s447_s27, %s447_s27 }
  0x7c   : > { %p2749_p12 = scmp.lt.s32.totalorder %s2747_s29, %s2740_s25 }
  0x7d   : > { %p2743_p4 = pnand %p2741_p9, %p3292_p8 }
  0x7e   : > { %p2750_p1 = por %p2749_p12, %p2748_p11 }
  0x7f   : > { %p2744_p10 = pneg %p2743_p4 }
  0x81   : > { %p2751_p3 = pnand %p2750_p1, %p2744_p10 }
  0x83   : > { %2754 = shalt.err (!%p2751_p3)
}
  0x84   : > { %2511 = dma.hbm_to_vmem [thread:$0]  (!%p3276_p6), %s3865_s7, 16, %s447_s27, [#allocation15]  }
  0x85   : > { %s2755_s14 = scalar_lea.hbm %s3867_s9, 16 }
  0x86   : > { %p2756_p13 = scmp.ne.s32.totalorder %s3867_s9, %s2755_s14  ;;  %p2762_p3 = scmp.lt.u32.totalorder %s2755_s14, %s3867_s9 }
  0x88   : > { %p2758_p0 = pnand %p2756_p13, %p3292_p8 }
  0x8a   : > { %p2759_p1 = pneg %p2758_p0 }
  0x8c   : > { %p2764_p2 = pnand %p2762_p3, %p2759_p1 }
  0x8e   : > { %2767 = shalt.err (!%p2764_p2)
}
  0x8f   : > { %s2768_s25 = scalar_lea.vmem %s471_s17, 16  ;;  %s2775_s27 = scalar_lea.vmem %s471_s17, 32 }
  0x90   : > { %p2769_p5 = scmp.ne.s32.totalorder %s471_s17, %s2768_s25  ;;  %p2776_p4 = scmp.lt.s32.totalorder %s471_s17, %s471_s17 }
  0x91   : > { %p2777_p10 = scmp.lt.s32.totalorder %s2775_s27, %s2768_s25 }
  0x92   : > { %p2771_p7 = pnand %p2769_p5, %p3292_p8 }
  0x93   : > { %p2778_p11 = por %p2777_p10, %p2776_p4 }
  0x94   : > { %p2772_p9 = pneg %p2771_p7 }
  0x96   : > { %p2779_p12 = pnand %p2778_p11, %p2772_p9 }
  0x98   : > { %2782 = shalt.err (!%p2779_p12)
}
  0x99   : > { %2517 = dma.hbm_to_vmem [thread:$0]  (!%p3276_p6), %s3867_s9, 16, %s471_s17, [#allocation18]  }
  0x9a   : > { %s3146_s28 = smov [#allocation20]   ;;  %s3147_s24 = smov [#allocation10]  }
  0x9b   : > { %s494_s26 = sshll.u32 %s3146_s28, 4  ;;  %s410_s14 = sshll.u32 %s3147_s24, 4  ;;  %s495_s26 = int_to_ptr.vmem [resolvable:$true] %s494_s26  ;;  %s411_s14 = int_to_ptr.vmem [resolvable:$true] %s410_s14 }
  0x9c   : > { %s2783_s0 = scalar_lea.hbm %s3869_s11, 16 }
  0x9d   : > { %p2784_p13 = scmp.ne.s32.totalorder %s3869_s11, %s2783_s0  ;;  %p2790_p3 = scmp.lt.u32.totalorder %s2783_s0, %s3869_s11 }
  0x9f   : > { %p2786_p0 = pnand %p2784_p13, %p3292_p8 }
  0xa1   : > { %p2787_p1 = pneg %p2786_p0 }
  0xa3   : > { %p2792_p2 = pnand %p2790_p3, %p2787_p1 }
  0xa5   : > { %2795 = shalt.err (!%p2792_p2)
}
  0xa6   : > { %s2796_s17 = scalar_lea.vmem %s495_s26, 16  ;;  %s2803_s19 = scalar_lea.vmem %s495_s26, 32 }
  0xa7   : > { %p2797_p5 = scmp.ne.s32.totalorder %s495_s26, %s2796_s17  ;;  %p2804_p4 = scmp.lt.s32.totalorder %s495_s26, %s495_s26 }
  0xa8   : > { %p2805_p10 = scmp.lt.s32.totalorder %s2803_s19, %s2796_s17 }
  0xa9   : > { %p2799_p7 = pnand %p2797_p5, %p3292_p8 }
  0xaa   : > { %p2806_p11 = por %p2805_p10, %p2804_p4 }
  0xab   : > { %p2800_p9 = pneg %p2799_p7 }
  0xad   : > { %p2807_p12 = pnand %p2806_p11, %p2800_p9 }
  0xaf   : > { %2810 = shalt.err (!%p2807_p12)
}
  0xb0   : > { %2523 = dma.hbm_to_vmem [thread:$0]  (!%p3276_p6), %s3869_s11, 16, %s495_s26, [#allocation21]  }
  0xb1   : > { %s3903_s4 = sld [smem:[#allocation43_spill]] }
  0xb7   : > { %s2811_s0 = scalar_lea.hbm %s3903_s4, 512 }
  0xb8   : > { %p2812_p13 = scmp.ne.s32.totalorder %s3903_s4, %s2811_s0  ;;  %p2818_p3 = scmp.lt.u32.totalorder %s2811_s0, %s3903_s4 }
  0xba   : > { %p2814_p0 = pnand %p2812_p13, %p3292_p8 }
  0xbc   : > { %p2815_p1 = pneg %p2814_p0 }
  0xbe   : > { %p2820_p2 = pnand %p2818_p3, %p2815_p1 }
  0xc0   : > { %2823 = shalt.err (!%p2820_p2)
}
  0xc1   : > { %s2824_s17 = scalar_lea.vmem %s411_s14, 512  ;;  %p2832_p4 = scmp.lt.s32.totalorder %s411_s14, %s411_s14 }
  0xc2   : > { %p2825_p5 = scmp.ne.s32.totalorder %s411_s14, %s2824_s17  ;;  %p2833_p10 = scmp.lt.s32.totalorder %s2824_s17, %s2824_s17 }
  0xc4   : > { %p2827_p7 = pnand %p2825_p5, %p3292_p8  ;;  %p2834_p11 = por %p2833_p10, %p2832_p4 }
  0xc6   : > { %p2828_p9 = pneg %p2827_p7 }
  0xc8   : > { %p2835_p12 = pnand %p2834_p11, %p2828_p9 }
  0xca   : > { %2838 = shalt.err (!%p2835_p12)
}
  0xcb   : > { %s3904_s26 = smov 128   ;;  %s3148_s24 = smov [#allocation13]  }
  0xcc   : > { %2502 = dma.hbm_to_vmem [thread:$0]  (!%p3276_p6), %s3903_s4, 512, %s411_s14, [#allocation9], %s3904_s26, %s3904_s26, %s3143_s20  }
  0xcd   : > { %s435_s18 = sshll.u32 %s3148_s24, 4  ;;  %s3149_s22 = smov [#allocation16]   ;;  %s436_s18 = int_to_ptr.vmem [resolvable:$true] %s435_s18 }
  0xce   : > { %s456_s0 = sshll.u32 %s3149_s22, 4  ;;  %s3905_s6 = sld [smem:[#allocation45_spill]]  ;;  %s457_s0 = int_to_ptr.vmem [resolvable:$true] %s456_s0 }
  0xd4   : > { %s2839_s27 = scalar_lea.hbm %s3905_s6, 16 }
  0xd5   : > { %p2840_p13 = scmp.ne.s32.totalorder %s3905_s6, %s2839_s27  ;;  %p2846_p3 = scmp.lt.u32.totalorder %s2839_s27, %s3905_s6 }
  0xd7   : > { %p2842_p0 = pnand %p2840_p13, %p3292_p8 }
  0xd9   : > { %p2843_p1 = pneg %p2842_p0 }
  0xdb   : > { %p2848_p2 = pnand %p2846_p3, %p2843_p1 }
  0xdd   : > { %2851 = shalt.err (!%p2848_p2)
}
  0xde   : > { %s2852_s14 = scalar_lea.vmem %s436_s18, 16  ;;  %s2859_s28 = scalar_lea.vmem %s436_s18, 32 }
  0xdf   : > { %p2853_p5 = scmp.ne.s32.totalorder %s436_s18, %s2852_s14  ;;  %p2860_p4 = scmp.lt.s32.totalorder %s436_s18, %s436_s18 }
  0xe0   : > { %p2861_p10 = scmp.lt.s32.totalorder %s2859_s28, %s2852_s14 }
  0xe1   : > { %p2855_p7 = pnand %p2853_p5, %p3292_p8 }
  0xe2   : > { %p2862_p11 = por %p2861_p10, %p2860_p4 }
  0xe3   : > { %p2856_p9 = pneg %p2855_p7 }
  0xe5   : > { %p2863_p12 = pnand %p2862_p11, %p2856_p9 }
  0xe7   : > { %2866 = shalt.err (!%p2863_p12)
}
  0xe8   : > { %2508 = dma.hbm_to_vmem [thread:$0]  (!%p3276_p6), %s3905_s6, 16, %s436_s18, [#allocation12]  }
  0xe9   : > { %s2867_s25 = scalar_lea.hbm %s3866_s8, 512 }
  0xea   : > { %p2868_p13 = scmp.ne.s32.totalorder %s3866_s8, %s2867_s25  ;;  %p2874_p3 = scmp.lt.u32.totalorder %s2867_s25, %s3866_s8 }
  0xec   : > { %p2870_p0 = pnand %p2868_p13, %p3292_p8 }
  0xee   : > { %p2871_p1 = pneg %p2870_p0 }
  0xf0   : > { %p2876_p2 = pnand %p2874_p3, %p2871_p1 }
  0xf2   : > { %2879 = shalt.err (!%p2876_p2)
}
  0xf3   : > { %s2880_s14 = scalar_lea.vmem %s457_s0, 512  ;;  %p2888_p4 = scmp.lt.s32.totalorder %s457_s0, %s457_s0 }
  0xf4   : > { %p2881_p5 = scmp.ne.s32.totalorder %s457_s0, %s2880_s14  ;;  %p2889_p10 = scmp.lt.s32.totalorder %s2880_s14, %s2880_s14 }
  0xf6   : > { %p2883_p7 = pnand %p2881_p5, %p3292_p8  ;;  %p2890_p11 = por %p2889_p10, %p2888_p4 }
  0xf8   : > { %p2884_p9 = pneg %p2883_p7 }
  0xfa   : > { %p2891_p12 = pnand %p2890_p11, %p2884_p9 }
  0xfc   : > { %2894 = shalt.err (!%p2891_p12)
}
  0xfd   : > { %2514 = dma.hbm_to_vmem [thread:$0]  (!%p3276_p6), %s3866_s8, 512, %s457_s0, [#allocation15], %s3904_s26, %s3904_s26, %s3143_s20  }
  0xfe   : > { %s3150_s24 = smov [#allocation19]   ;;  %s3151_s2 = smov [#allocation22]  }
  0xff   : > { %s480_s22 = sshll.u32 %s3150_s24, 4  ;;  %s505_s1 = sshll.u32 %s3151_s2, 4  ;;  %s481_s22 = int_to_ptr.vmem [resolvable:$true] %s480_s22  ;;  %s506_s1 = int_to_ptr.vmem [resolvable:$true] %s505_s1 }
 0x100   : > { %s2895_s29 = scalar_lea.hbm %s3868_s10, 1024 }
 0x101   : > { %p2896_p13 = scmp.ne.s32.totalorder %s3868_s10, %s2895_s29  ;;  %p2902_p3 = scmp.lt.u32.totalorder %s2895_s29, %s3868_s10 }
 0x103   : > { %p2898_p0 = pnand %p2896_p13, %p3292_p8 }
 0x105   : > { %p2899_p1 = pneg %p2898_p0 }
 0x107   : > { %p2904_p2 = pnand %p2902_p3, %p2899_p1 }
 0x109   : > { %2907 = shalt.err (!%p2904_p2)
}
 0x10a   : > { %s2908_s0 = scalar_lea.vmem %s481_s22, 1024  ;;  %p2916_p4 = scmp.lt.s32.totalorder %s481_s22, %s481_s22 }
 0x10b   : > { %p2909_p5 = scmp.ne.s32.totalorder %s481_s22, %s2908_s0  ;;  %p2917_p10 = scmp.lt.s32.totalorder %s2908_s0, %s2908_s0 }
 0x10d   : > { %p2911_p7 = pnand %p2909_p5, %p3292_p8  ;;  %p2918_p11 = por %p2917_p10, %p2916_p4 }
 0x10f   : > { %p2912_p9 = pneg %p2911_p7 }
 0x111   : > { %p2919_p12 = pnand %p2918_p11, %p2912_p9 }
 0x113   : > { %2922 = shalt.err (!%p2919_p12)
}
 0x114   : > { %2520 = dma.hbm_to_vmem [thread:$0]  (!%p3276_p6), %s3868_s10, 1024, %s481_s22, [#allocation18], %s3904_s26, %s3904_s26, %s3143_s20  }
 0x115   : > { %s2923_s27 = scalar_lea.hbm %s3870_s12, 16 }
 0x116   : > { %p2924_p13 = scmp.ne.s32.totalorder %s3870_s12, %s2923_s27  ;;  %p2930_p3 = scmp.lt.u32.totalorder %s2923_s27, %s3870_s12 }
 0x118   : > { %p2926_p0 = pnand %p2924_p13, %p3292_p8 }
 0x11a   : > { %p2927_p1 = pneg %p2926_p0 }
 0x11c   : > { %p2932_p2 = pnand %p2930_p3, %p2927_p1 }
 0x11e   : > { %2935 = shalt.err (!%p2932_p2)
}
 0x11f   : > { %s2936_s18 = scalar_lea.vmem %s506_s1, 16  ;;  %s2943_s20 = scalar_lea.vmem %s506_s1, 32 }
 0x120   : > { %p2937_p5 = scmp.ne.s32.totalorder %s506_s1, %s2936_s18  ;;  %p2944_p4 = scmp.lt.s32.totalorder %s506_s1, %s506_s1 }
 0x121   : > { %p2945_p10 = scmp.lt.s32.totalorder %s2943_s20, %s2936_s18 }
 0x122   : > { %p2939_p7 = pnand %p2937_p5, %p3292_p8 }
 0x123   : > { %p2946_p11 = por %p2945_p10, %p2944_p4 }
 0x124   : > { %p2940_p9 = pneg %p2939_p7 }
 0x126   : > { %p2947_p12 = pnand %p2946_p11, %p2940_p9 }
 0x128   : > { %2950 = shalt.err (!%p2947_p12)
}
 0x129   : > { %2526 = dma.hbm_to_vmem [thread:$0]  (!%p3276_p6), %s3870_s12, 16, %s506_s1, [#allocation21]  }
 0x12a   : > { %s3152_s0 = smov [#allocation23]   ;;  %s2951_s25 = scalar_lea.hbm %s3871_s13, 16 }
 0x12b   : > { %s516_s28 = sshll.u32 %s3152_s0, 4  ;;  %p2952_p13 = scmp.ne.s32.totalorder %s3871_s13, %s2951_s25  ;;  %s517_s28 = int_to_ptr.vmem [resolvable:$true] %s516_s28 }
 0x12c   : > { %p2958_p3 = scmp.lt.u32.totalorder %s2951_s25, %s3871_s13 }
 0x12d   : > { %p2954_p0 = pnand %p2952_p13, %p3292_p8 }
 0x12f   : > { %p2955_p1 = pneg %p2954_p0 }
 0x131   : > { %p2960_p2 = pnand %p2958_p3, %p2955_p1 }
 0x133   : > { %2963 = shalt.err (!%p2960_p2)
}
 0x134   : > { %s2964_s1 = scalar_lea.vmem %s517_s28, 16  ;;  %s2971_s14 = scalar_lea.vmem %s517_s28, 32 }
 0x135   : > { %p2965_p5 = scmp.ne.s32.totalorder %s517_s28, %s2964_s1  ;;  %p2972_p4 = scmp.lt.s32.totalorder %s517_s28, %s517_s28 }
 0x136   : > { %p2973_p10 = scmp.lt.s32.totalorder %s2971_s14, %s2964_s1 }
 0x137   : > { %p2967_p7 = pnand %p2965_p5, %p3292_p8 }
 0x138   : > { %p2974_p11 = por %p2973_p10, %p2972_p4 }
 0x139   : > { %p2968_p9 = pneg %p2967_p7 }
 0x13b   : > { %p2975_p12 = pnand %p2974_p11, %p2968_p9 }
 0x13d   : > { %2978 = shalt.err (!%p2975_p12)
}
 0x13e   : > { %s3906_s21 = sld [smem:[#allocation36_spill]]  ;;  %s3907_s26 = sld [smem:[#allocation37_spill]] }
 0x13f   : > { %2529 = dma.hbm_to_vmem [thread:$0]  (!%p3276_p6), %s3871_s13, 16, %s517_s28, [#allocation24]  }
 0x140   : > { %s2206_s22 = sadd.s32 4294967294, %s3137_s16   ;;  %s3537_s23 = sadd.s32 1, %s3137_s16  }
 0x141   : > { %s43_s0 = ssub.s32 %s3137_s16, %s3537_s23  ;;  %s46_s24 = sadd.s32 1, %s3133_s15 }
 0x142   : > { %p44_p8 = scmp.eq.s32.totalorder %s43_s0, 0  ;;  %p53_p13 = scmp.ne.s32.totalorder %s3133_s15, %s3129_s30 }
 0x143   : > { %p54_p0 = scmp.eq.s32.totalorder %s3137_s16, 0  ;;  %p367_p7 = scmp.eq.s32.totalorder %s2206_s22, 1 }
 0x144   : > { %p59_p1 = scmp.ne.s32.totalorder %s3129_s30, %s3906_s21  ;;  %p3909_p2 = scmp.eq.s32.totalorder %s3907_s26, 0 }
 0x145   : > { %s3548_s2 = scalar_select %p44_p8, %s3133_s15, %s46_s24  }
 0x146   : > { %p3550_p3 = por %p54_p0, %p53_p13  ;;  %p3556_p6 = por %p3909_p2, %p59_p1 }
 0x147   : > { %p361_p5 = scmp.eq.s32.totalorder %s3907_s26, 1  ;;  %p2553_p9 = scmp.lt.s32.totalorder %s3137_s16, 2 }
 0x148   : > { %s3910_s28 = scalar_select %p3556_p6, 1, 0 }
 0x149   : > { %s3563_s27 = sand.u32 1, %s3133_s15   ;;  %p3565_p4 = por %p361_p5, %p53_p13 }
 0x14a   : > { %p3569_p10 = por %p367_p7, %p59_p1  ;;  %s2221_s19 = sshll.u32 %s3563_s27, 3 }
 0x14b   : > { %s3911_s29 = scalar_select %p3565_p4, 1, 0 }
 0x14c   : > { %s3912_s17 = scalar_select %p3569_p10, 1, 0 }
 0x14d   : > { %s2222_s1 = sshll.u32 %s3137_s16, 7  ;;  %s3913_s20 = sld [smem:[#allocation39_spill]] }
 0x14e   : > { %s531_s26 = scalar_lea.vmem [#allocation2], %s2221_s19  ;;  %p3584_p11 = pnand %p2553_p9, %p3550_p3 }
 0x14f   : > { %s538_s22 = sshll.u32 %s531_s26, 4  ;;  %s528_s3 = scalar_lea.sflag [#allocation3], %s3563_s27  ;;  %s3580_s22 = int_to_ptr.vmem [resolvable:$true] %s538_s22 }
 0x150   : > { %p2981_p8 = pneg %p3584_p11 }
 0x153   : > { %s3578_s21 = scalar_lea.hbm %s3913_s20, %s2222_s1  ;;  %s2984_s25 = scalar_lea.hbm %s3913_s20, 256 }
 0x154   : > { %s2979_s14 = scalar_lea.hbm %s3578_s21, 128  ;;  %p2985_p1 = scmp.lt.u32.totalorder %s3578_s21, %s3913_s20 }
 0x155   : > { %p2980_p12 = scmp.ne.s32.totalorder %s3578_s21, %s2979_s14  ;;  %p2986_p3 = scmp.lt.u32.totalorder %s2984_s25, %s2979_s14 }
 0x156   : > { %p2988_p5 = scmp.lt.u32.totalorder %s2979_s14, %s3578_s21 }
 0x157   : > { %p2982_p13 = pnand %p2981_p8, %p2980_p12  ;;  %p2987_p2 = por %p2986_p3, %p2985_p1 }
 0x159   : > { %p2983_p0 = pneg %p2982_p13  ;;  %p2989_p7 = por %p2988_p5, %p2987_p2 }
 0x15b   : > { %p2990_p9 = pnand %p2989_p7, %p2983_p0 }
 0x15d   : > { %2993 = shalt.err (!%p2990_p9)
}
 0x15e   : > { %s2994_s24 = scalar_lea.vmem %s3580_s22, 128  ;;  %s3153_s19 = smov [#allocation2]  }
 0x15f   : > { %p2995_p12 = scmp.ne.s32.totalorder %s3580_s22, %s2994_s24  ;;  %s2999_s1 = sshll.u32 %s3153_s19, 4  ;;  %s3000_s1 = int_to_ptr.vmem [resolvable:$false] %s2999_s1 }
 0x160   : > { %s3001_s18 = scalar_lea.vmem %s3000_s1, 256  ;;  %p3002_p4 = scmp.lt.s32.totalorder %s3580_s22, %s3000_s1 }
 0x161   : > { %p2997_p13 = pnand %p2995_p12, %p2981_p8  ;;  %p3003_p1 = scmp.lt.s32.totalorder %s3001_s18, %s2994_s24 }
 0x163   : > { %p2998_p10 = pneg %p2997_p13  ;;  %p3004_p3 = por %p3003_p1, %p3002_p4 }
 0x165   : > { %p3005_p2 = pnand %p3004_p3, %p2998_p10 }
 0x167   : > { %3008 = shalt.err (!%p3005_p2)
}
 0x168   : > { %2533 = dma.hbm_to_vmem [thread:$0]  (!%p3584_p11), %s3578_s21, 128, %s3580_s22, %s528_s3  }
 0x169   : > { %s2223_s14 = sshll.u32 %s3137_s16, 4  ;;  %s548_s25 = scalar_lea.vmem [#allocation5], %s3563_s27 }
 0x16a   : > { %s555_s26 = sshll.u32 %s548_s25, 4  ;;  %s3915_s5 = sld [smem:[#allocation40_spill]]  ;;  %s556_s26 = int_to_ptr.vmem [resolvable:$true] %s555_s26 }
 0x16b   : > { %s3916_s24 = sand.u32 1, %s3137_s16  }
 0x16c   : > { %s546_s18 = scalar_lea.sflag [#allocation6], %s3916_s24 }
 0x170   : > { %s3620_s1 = scalar_lea.hbm %s3915_s5, %s2223_s14  ;;  %s3014_s21 = scalar_lea.hbm %s3915_s5, 32 }
 0x171   : > { %s3009_s6 = scalar_lea.hbm %s3620_s1, 16  ;;  %p3015_p5 = scmp.lt.u32.totalorder %s3620_s1, %s3915_s5 }
 0x172   : > { %p3010_p4 = scmp.ne.s32.totalorder %s3620_s1, %s3009_s6  ;;  %p3016_p7 = scmp.lt.u32.totalorder %s3014_s21, %s3009_s6 }
 0x173   : > { %p3018_p12 = scmp.lt.u32.totalorder %s3009_s6, %s3620_s1 }
 0x174   : > { %p3012_p10 = pnand %p3010_p4, %p2981_p8  ;;  %p3017_p9 = por %p3016_p7, %p3015_p5 }
 0x176   : > { %p3013_p0 = pneg %p3012_p10  ;;  %p3019_p13 = por %p3018_p12, %p3017_p9 }
 0x178   : > { %p3020_p1 = pnand %p3019_p13, %p3013_p0 }
 0x17a   : > { %3023 = shalt.err (!%p3020_p1)
}
 0x17b   : > { %s3024_s14 = scalar_lea.vmem %s556_s26, 16  ;;  %s3154_s25 = smov [#allocation5]  }
 0x17c   : > { %p3025_p3 = scmp.ne.s32.totalorder %s556_s26, %s3024_s14  ;;  %s3029_s19 = sshll.u32 %s3154_s25, 4  ;;  %s3030_s19 = int_to_ptr.vmem [resolvable:$false] %s3029_s19 }
 0x17d   : > { %s3031_s24 = scalar_lea.vmem %s3030_s19, 32  ;;  %p3032_p10 = scmp.lt.s32.totalorder %s556_s26, %s3030_s19 }
 0x17e   : > { %p3027_p2 = pnand %p3025_p3, %p2981_p8  ;;  %p3033_p6 = scmp.lt.s32.totalorder %s3031_s24, %s3024_s14 }
 0x180   : > { %p3028_p4 = pneg %p3027_p2  ;;  %p3034_p5 = por %p3033_p6, %p3032_p10 }
 0x182   : > { %p3035_p7 = pnand %p3034_p5, %p3028_p4 }
 0x184   : > { %3038 = shalt.err (!%p3035_p7)
}
 0x185   : > { %2536 = dma.hbm_to_vmem [thread:$0]  (!%p3584_p11), %s3620_s1, 16, %s556_s26, %s546_s18  }
 0x186   : > { %s3917_s6 = sld [smem:[#allocation38_spill]] }
 0x18c   : > { %p3918_p0 = scmp.ne.s32.totalorder %s3917_s6, 0 }
 0x18d   : > { %s3646_s3 = sand.u32 (!%p3918_p0), 1, %s3129_s30   ;;  %p3919_p6 = scmp.ne.s32.totalorder (!%p3918_p0), %s3910_s28, 0 }
 0x18e   : > { %564 = sbr.rel (%p3918_p0) target bundleno = 2950 (0xb86), region = 76  ;;  %s2225_s27 = sshll.u32 (!%p3918_p0), %s3646_s3, 3 }
 0x18f   : > { %s567_s21 = scalar_lea.sflag (!%p3918_p0), [#allocation3], %s3646_s3  ;;  %s3652_s4 = scalar_lea.vmem (!%p3918_p0), [#allocation2], %s2225_s27 }
 0x195   : > { %3084 = dma.done.wait (%p3919_p6), %s567_s21, 128  }
 0x196   : > { %3086 = vsyncadd (%p3919_p6), %s567_s21, 4294967168  ;;  %s3920_s0 = sld [smem:[#allocation37_spill]]  ;;  %s578_s18 = scalar_lea.vmem [#allocation5], %s3646_s3 }
 0x19c   : > { %s575_s26 = sand.u32 1, %s3920_s0  }
 0x19d   : > { %s576_s1 = scalar_lea.sflag [#allocation6], %s575_s26 }
 0x19e   : > { %3088 = dma.done.wait (%p3919_p6), %s576_s1, 16  }
 0x19f   : > { %3090 = vsyncadd (%p3919_p6), %s576_s1, 4294967280  ;;  %p3921_p11 = scmp.eq.s32.totalorder %s3920_s0, 0 }
 0x1a1   : > { %3092 = dma.done.wait (%p3921_p11), [#allocation6], 512   ;;  %p3922_p8 = pmov %p3921_p11 }
 0x1a3   : > { %3094 = vsyncadd (%p3922_p8), [#allocation6], 4294966784  ;;  %p3923_p9 = pmov %p3922_p8 }
 0x1a4   : > { %p3924_p12 = pmov %p3922_p8 }
 0x1a5   : > { %3096 = dma.done.wait (%p3923_p9), [#allocation9], 528  }
 0x1a6   : > { %3098 = vsyncadd (%p3924_p12), [#allocation9], 4294966768  ;;  %p3925_p13 = pmov %p3922_p8 }
 0x1a7   : > { %p3926_p1 = pmov %p3922_p8 }
 0x1a8   : > { %3100 = dma.done.wait (%p3925_p13), [#allocation12], 32  }
 0x1a9   : > { %3102 = vsyncadd (%p3926_p1), [#allocation12], 4294967264  ;;  %p3927_p3 = pmov %p3926_p1 }
 0x1aa   : > { %p3928_p2 = pmov %p3926_p1 }
 0x1ab   : > { %3104 = dma.done.wait (%p3927_p3), [#allocation15], 528  }
 0x1ac   : > { %3106 = vsyncadd (%p3928_p2), [#allocation15], 4294966768  ;;  %p3929_p4 = pmov %p3926_p1 }
 0x1ad   : > { %p3930_p10 = pmov %p3926_p1 }
 0x1ae   : > { %3108 = dma.done.wait (%p3929_p4), [#allocation18], 1040  }
 0x1af   : > { %3110 = vsyncadd (%p3930_p10), [#allocation18], 4294966256  ;;  %p3931_p5 = pmov %p3926_p1 }
 0x1b0   : > { %p3932_p7 = pmov %p3926_p1 }
 0x1b1   : > { %3112 = dma.done.wait (%p3931_p5), [#allocation21], 32  }
 0x1b2   : > { %3114 = vsyncadd (%p3932_p7), [#allocation21], 4294967264  ;;  %p3933_p0 = pmov %p3926_p1 }
 0x1b4   : > { %3116 = dma.done.wait (%p3933_p0), [#allocation24], 16   ;;  %p3934_p6 = pmov %p3933_p0 }
 0x1b5   : > { %v3155_v0 = vmov 0.0|0.0   ;;  %vm3156_vm0 = vmmov 0   ;;  %v3157_v1 = vmov 0.0   ;;  %v677_v2 = vld [vmem:[#allocation7] sm:$0xff]  ;;  %v678_v3 = vld [vmem:[#allocation7 + $0x8] sm:$0xff]  ;;  %v679_v4 = vld [vmem:[#allocation7 + $0x10] sm:$0xff] }
 0x1b6   : > { %3118 = vsyncadd (%p3934_p6), [#allocation24], 4294967280  ;;  %2415 = vmatprep.subr.bf16.mxu0 %v3155_v0  ;;  %2322 = vmatprep.mubr.msk.f32.mxu0 %vm3156_vm0, %v3157_v1  ;;  %v2416_v5 = vpack.c.bf16 %v678_v3, %v677_v2  ;;  %v680_v6 = vld [vmem:[#allocation7 + $0x18] sm:$0xff]  ;;  %vm688_vm1 = vcmask 261120   ;;  %v2239_v9 = vld [vmem:[#allocation8] ss:$0 sm:$0xff] }
 0x1b7   : > { %2330 = vmatprep.subr.mxu1 %v3157_v1  ;;  %2332 = vmatprep.mubr.msk.f32.mxu1 %vm3156_vm0, %v3157_v1  ;;  %v2419_v7 = vpack.c.bf16 %v680_v6, %v679_v4  ;;  %v3700_v8 = vld [vmem:[%s3652_s4] sm:$0xff]  ;;  %s3158_s28 = smov 104   ;;  %s3159_s22 = smov 120   ;;  %vm785_vm2 = vcmask 64512   ;;  %vm1883_vm3 = vcmask 523264  }
 0x1b8   : > { %2417 = vmatpush3.bf16.msra.mxu0 %v2416_v5  ;;  %s3160_s14 = smov 96   ;;  %s3161_s25 = smov 112   ;;  %v2241_v24 = vld [vmem:[%s578_s18] ss:$0 sm:$0xff] }
 0x1b9   : > { %2418 = vmatprep.subr.bf16.mxu0 %v3155_v0  ;;  %s3162_s19 = smov 64   ;;  %s2268_s24 = sshll.u32 %s3920_s0, 7 }
 0x1ba   : > { %s674_s6 = scalar_lea.vmem [#allocation25], %s2225_s27  ;;  %s3935_s1 = sld [smem:[#allocation46_spill]] }
 0x1bb   : > { %s2002_s21 = sshll.u32 %s674_s6, 4  ;;  %p3936_p8 = scmp.ne.s32.totalorder %s3911_s29, 0  ;;  %s3815_s21 = int_to_ptr.vmem [resolvable:$true] %s2002_s21 }
 0x1bc   : > { %2420 = vmatpush3.bf16.msra.mxu0 %v2419_v7  ;;  %s3163_s27 = smov [#allocation25]  }
 0x1bd   : > { %2325 = vmatprep.subr.mxu0 %v3157_v1  ;;  %s3043_s0 = sshll.u32 %s3163_s27, 4  ;;  %s3044_s0 = int_to_ptr.vmem [resolvable:$false] %s3043_s0 }
 0x1be   : > { %p3046_p13 = scmp.lt.s32.totalorder %s3815_s21, %s3044_s0 }
 0x1bf   : > { %2323 = vmatmul.mubr.msk.f32.vlgmr.msra.gmra.mrb[0].mxu0 %vm688_vm1, %v3700_v8 }
 0x1c0   : > { %2327 = vmatprep.mubr.msk.f32.mxu0 %vm3156_vm0, %v3157_v1  ;;  %s3813_s18 = scalar_lea.hbm %s3935_s1, %s2268_s24 }
 0x292   : > { %v758_v10 = vpop.f32.mrb[0].mxu0 }
 0x293   : > { %v3707_v11 = vadd.f32 %v2239_v9, %v758_v10  ;;  %v2324_v12 = vpop.f32.mrb[1].mxu0 }
 0x295   : > { %775 = vrot.lane.b32.xlu1 %v3707_v11, %s3158_s28  ;;  %771 = vrot.lane.b32.xlu0 %v3707_v11, %s3159_s22  ;;  %v762_v17 = vmul.f32 0.35355338, %v3707_v11 }
 0x299   : > { %783 = vrot.lane.b32.xlu1 %v3707_v11, %s3160_s14  ;;  %773 = vrot.lane.b32.xlu0 %v3707_v11, %s3161_s25 }
 0x307   : > { %v3713_v13 = vpop.permute.xlu1 %775  ;;  %v3715_v14 = vpop.permute.xlu0 %771 }
 0x308   : > { %860 = vrot.lane.b32.xlu0 %v3715_v14, %s3160_s14 }
 0x30b   : > { %v784_v15 = vpop.permute.xlu1 %783  ;;  %v3718_v16 = vpop.permute.xlu0 %773 }
 0x30c   : > { %2326 = vmatpush3.xpose.msk.msra.mxu0 %vm785_vm2, %v784_v15  ;;  %936 = vrot.lane.b32.xlu1 %v3718_v16, %s3160_s14 }
 0x30d   : > { %764 = vrot.lane.b32.xlu0 %v762_v17, %s3159_s22  ;;  %2335 = vmatprep.subr.mxu0 %v3157_v1  ;;  %s3039_s22 = scalar_lea.vmem %s3815_s21, 128 }
 0x30e   : > { %p3040_p11 = scmp.ne.s32.totalorder %s3815_s21, %s3039_s22 }
 0x30f   : > { %2328 = vmatmul.mubr.msk.f32.vlgmr.msra.gmra.mrb[2].mxu0 %vm785_vm2, %v762_v17 }
 0x310   : > { %1012 = vrot.lane.b32.xlu1 %v3713_v13, %s3160_s14  ;;  %2337 = vmatprep.mubr.msk.f32.mxu0 %vm3156_vm0, %v3157_v1  ;;  %p3041_p9 = pnand %p3040_p11, %p3936_p8  ;;  %s3045_s14 = scalar_lea.vmem %s3044_s0, 256 }
 0x311   : > { %766 = vrot.lane.b32.xlu0 %v762_v17, %s3161_s25  ;;  %p3047_p1 = scmp.lt.s32.totalorder %s3045_s14, %s3039_s22 }
 0x312   : > { %p3042_p12 = pneg %p3041_p9 }
 0x313   : > { %p3048_p3 = por %p3047_p1, %p3046_p13 }
 0x314   : > { %768 = vrot.lane.b32.xlu1 %v762_v17, %s3158_s28  ;;  %v1437_v17 = vld [vmem:[#allocation10 + $0x8] sm:$0xff]  ;;  %s1989_s28 = scalar_lea.sflag [#allocation4], %s3646_s3 }
 0x315   : > { %p3049_p2 = pnand %p3048_p3, %p3042_p12 }
 0x37a   : > { %v861_v18 = vpop.permute.xlu0 %860 }
 0x37b   : > { %2331 = vmatpush3.xpose.msk.msra.mxu1 %vm785_vm2, %v861_v18  ;;  %v1438_v18 = vld [vmem:[#allocation10 + $0x10] sm:$0xff] }
 0x37c   : > { %2340 = vmatprep.subr.mxu1 %v3157_v1 }
 0x37e   : > { %v937_v19 = vpop.permute.xlu1 %936 }
 0x37f   : > { %v765_v20 = vpop.permute.xlu0 %764  ;;  %2336 = vmatpush3.xpose.msk.msra.mxu0 %vm785_vm2, %v937_v19 }
 0x380   : > { %2333 = vmatmul.mubr.msk.f32.vlgmr.msra.gmra.mrb[0].mxu1 %vm785_vm2, %v765_v20  ;;  %2345 = vmatprep.subr.mxu0 %v3157_v1 }
 0x381   : > { %2342 = vmatprep.mubr.msk.f32.mxu1 %vm3156_vm0, %v3157_v1 }
 0x382   : > { %v1013_v21 = vpop.permute.xlu1 %1012 }
 0x383   : > { %v767_v22 = vpop.permute.xlu0 %766  ;;  %2341 = vmatpush3.xpose.msk.msra.mxu1 %vm785_vm2, %v1013_v21  ;;  %v1439_v21 = vld [vmem:[#allocation10 + $0x18] sm:$0xff] }
 0x384   : > { %2338 = vmatmul.mubr.msk.f32.vlgmr.msra.gmra.mrb[4].mxu0 %vm785_vm2, %v767_v22  ;;  %2350 = vmatprep.subr.mxu1 %v3157_v1 }
 0x385   : > { %2347 = vmatprep.mubr.msk.f32.mxu0 %vm3156_vm0, %v3157_v1 }
 0x386   : > { %v769_v23 = vpop.permute.xlu1 %768 }
 0x387   : > { %2343 = vmatmul.mubr.msk.f32.vlgmr.msra.gmra.mrb[2].mxu1 %vm785_vm2, %v769_v23 }
 0x388   : > { %2352 = vmatprep.mubr.msk.f32.mxu1 %vm3156_vm0, %v3157_v1 }
 0x3e2   : > { %v856_v25 = vpop.f32.mrb[2].mxu0 }
 0x3e3   : > { %v857_v26 = vadd.f32 %v2241_v24, %v856_v25  ;;  %v2329_v27 = vpop.f32.mrb[3].mxu0 }
 0x3e5   : > { %v1088_v28 = vsel %vm785_vm2, %v857_v26, -inf }
 0x3e6   : > { %1089 = vmax.xlane.f32.xlu0 %v1088_v28 }
 0x453   : > { %v932_v29 = vpop.f32.mrb[0].mxu1 }
 0x454   : > { %v933_v30 = vadd.f32 %v2241_v24, %v932_v29  ;;  %v2334_v31 = vpop.f32.mrb[1].mxu1 }
 0x456   : > { %v1091_v32 = vsel %vm785_vm2, %v933_v30, -inf }
 0x457   : > { %1092 = vmax.xlane.f32.xlu1 %v1091_v32  ;;  %v1008_v33 = vpop.f32.mrb[4].mxu0 }
 0x458   : > { %v1009_v34 = vadd.f32 %v2241_v24, %v1008_v33  ;;  %v2339_v35 = vpop.f32.mrb[5].mxu0 }
 0x45a   : > { %v1084_v36 = vpop.f32.mrb[2].mxu1  ;;  %v1094_v37 = vsel %vm785_vm2, %v1009_v34, -inf }
 0x45b   : > { %v1085_v38 = vadd.f32 %v2241_v24, %v1084_v36  ;;  %1095 = vmax.xlane.f32.xlu0 %v1094_v37  ;;  %v2344_v39 = vpop.f32.mrb[3].mxu1 }
 0x45d   : > { %v1097_v40 = vsel %vm785_vm2, %v1085_v38, -inf }
 0x45f   : > { %1098 = vmax.xlane.f32.xlu0 %v1097_v40 }
 0x468   : > { %1132 = vrot.lane.b32.xlu1 %v3707_v11, %s3162_s19 }
 0x473   : > { %v1090_v41 = vpop.xlane.xlu0 %1089 }
 0x474   : > { %v1100_v42 = vsub.f32 %v857_v26, %v1090_v41  ;;  %v2258_v41 = vld [vmem:[#allocation11] ss:$0 sm:$0xff] }
 0x476   : > { %v1104_v43 = vmul.f32 1.442695, %v1100_v42 }
 0x478   : > { %2621 = vpow2.f32 %v1104_v43 }
 0x482   : > { %v2622_v44 = vpop.eup %2621 }
 0x483   : > { %v1112_v45 = vsel %vm785_vm2, %v2622_v44, 0.0 }
 0x48c   : > { %1113 = vadd.xlane.f32.xlu1 %v1112_v45 }
 0x4e4   : > { %v1093_v46 = vpop.xlane.xlu1 %1092 }
 0x4e5   : > { %v1101_v47 = vsub.f32 %v933_v30, %v1093_v46 }
 0x4e7   : > { %v1106_v48 = vmul.f32 1.442695, %v1101_v47 }
 0x4e8   : > { %v1133_v49 = vpop.permute.xlu1 %1132  ;;  %v1096_v50 = vpop.xlane.xlu0 %1095 }
 0x4e9   : > { %2623 = vpow2.f32 %v1106_v48  ;;  %v1102_v51 = vsub.f32 %v1009_v34, %v1096_v50  ;;  %2346 = vmatpush3.msra.mxu0 %v1133_v49 }
 0x4ea   : > { %2355 = vmatprep.subr.mxu0 %v3157_v1 }
 0x4eb   : > { %v1108_v52 = vmul.f32 1.442695, %v1102_v51  ;;  %v1778_v51 = vld [vmem:[#allocation16] sm:$0xff] }
 0x4ec   : > { %v1099_v53 = vpop.xlane.xlu0 %1098 }
 0x4ed   : > { %2625 = vpow2.f32 %v1108_v52  ;;  %v1103_v54 = vsub.f32 %v1085_v38, %v1099_v53  ;;  %v1779_v52 = vld [vmem:[#allocation16 + $0x8] sm:$0xff] }
 0x4ee   : > { %v2422_v53 = vpack.c.bf16 %v1779_v52, %v1778_v51 }
 0x4ef   : > { %v1110_v55 = vmul.f32 1.442695, %v1103_v54  ;;  %v1780_v54 = vld [vmem:[#allocation16 + $0x10] sm:$0xff] }
 0x4f1   : > { %2627 = vpow2.f32 %v1110_v55  ;;  %v1781_v55 = vld [vmem:[#allocation16 + $0x18] sm:$0xff] }
 0x4f3   : > { %v2624_v56 = vpop.eup %2623 }
 0x4f4   : > { %v1115_v57 = vsel %vm785_vm2, %v2624_v56, 0.0 }
 0x4f5   : > { %1116 = vadd.xlane.f32.xlu0 %v1115_v57 }
 0x4f7   : > { %v2626_v58 = vpop.eup %2625 }
 0x4f8   : > { %v1118_v59 = vsel %vm785_vm2, %v2626_v58, 0.0 }
 0x4f9   : > { %1119 = vadd.xlane.f32.xlu1 %v1118_v59 }
 0x4fb   : > { %v2628_v60 = vpop.eup %2627 }
 0x4fc   : > { %v1121_v61 = vsel %vm785_vm2, %v2628_v60, 0.0 }
 0x4fd   : > { %1122 = vadd.xlane.f32.xlu0 %v1121_v61 }
 0x50a   : > { %1284 = vrot.lane.b32.xlu1 %v3718_v16, %s3162_s19 }
 0x50e   : > { %1360 = vrot.lane.b32.xlu1 %v3713_v13, %s3162_s19 }
 0x513   : > { %1208 = vrot.lane.b32.xlu0 %v3715_v14, %s3162_s19  ;;  %v1436_v14 = vld [vmem:[#allocation10] sm:$0xff] }
 0x519   : > { %v1114_v62 = vpop.xlane.xlu1 %1113 }
 0x51a   : > { %2629 = vrcp.f32 %v1114_v62  ;;  %v2260_v62 = vld [vmem:[#allocation14] ss:$0 sm:$0xff] }
 0x524   : > { %v2630_v63 = vpop.eup %2629 }
 0x525   : > { %v1128_v2 = vmul.f32 %v2630_v63, %v2622_v44 }
 0x527   : > { %2348 = vmatmul.mubr.msk.f32.vlgmr.msra.gmra.mrb[6].mxu0 %vm785_vm2, %v1128_v2 }
 0x528   : > { %2357 = vmatprep.mubr.msk.f32.mxu0 %vm3156_vm0, %v3157_v1 }
 0x582   : > { %v1117_v3 = vpop.xlane.xlu0 %1116 }
 0x583   : > { %2631 = vrcp.f32 %v1117_v3  ;;  %v1868_v3 = vld [vmem:[#allocation19] sm:$0xff] }
 0x586   : > { %v1120_v4 = vpop.xlane.xlu1 %1119 }
 0x587   : > { %2633 = vrcp.f32 %v1120_v4  ;;  %v1869_v4 = vld [vmem:[#allocation19 + $0x8] sm:$0xff] }
 0x58a   : > { %v1285_v5 = vpop.permute.xlu1 %1284  ;;  %v1123_v6 = vpop.xlane.xlu0 %1122 }
 0x58b   : > { %2635 = vrcp.f32 %v1123_v6  ;;  %2356 = vmatpush3.msra.mxu0 %v1285_v5  ;;  %v2428_v5 = vpack.c.bf16 %v1869_v4, %v1868_v3  ;;  %v1870_v6 = vld [vmem:[#allocation19 + $0x10] sm:$0xff] }
 0x58c   : > { %2365 = vmatprep.subr.mxu0 %v3157_v1 }
 0x58d   : > { %v2632_v7 = vpop.eup %2631 }
 0x58e   : > { %v1129_v9 = vmul.f32 %v2632_v7, %v2624_v56  ;;  %v1209_v10 = vpop.permute.xlu0 %1208  ;;  %v1361_v11 = vpop.permute.xlu1 %1360  ;;  %v2425_v56 = vpack.c.bf16 %v1781_v55, %v1780_v54  ;;  %v1871_v7 = vld [vmem:[#allocation19 + $0x18] sm:$0xff] }
 0x58f   : > { %2351 = vmatpush3.msra.mxu1 %v1209_v10  ;;  %v1872_v10 = vld [vmem:[#allocation19 + $0x20] sm:$0xff] }
 0x590   : > { %2353 = vmatmul.mubr.msk.f32.vlgmr.msra.gmra.mrb[4].mxu1 %vm785_vm2, %v1129_v9  ;;  %2360 = vmatprep.subr.mxu1 %v3157_v1  ;;  %v2431_v9 = vpack.c.bf16 %v1871_v7, %v1870_v6 }
 0x591   : > { %v2634_v12 = vpop.eup %2633  ;;  %2361 = vmatpush3.msra.mxu1 %v1361_v11  ;;  %2362 = vmatprep.mubr.msk.f32.mxu1 %vm3156_vm0, %v3157_v1  ;;  %v1873_v11 = vld [vmem:[#allocation19 + $0x28] sm:$0xff] }
 0x592   : > { %v1130_v13 = vmul.f32 %v2634_v12, %v2626_v58  ;;  %2370 = vmatprep.subr.mxu1 %v3157_v1  ;;  %v2434_v12 = vpack.c.bf16 %v1873_v11, %v1872_v10 }
 0x594   : > { %2358 = vmatmul.mubr.msk.f32.vlgmr.msra.gmra.mrb[8].mxu0 %vm785_vm2, %v1130_v13  ;;  %v1874_v13 = vld [vmem:[#allocation19 + $0x30] sm:$0xff] }
 0x595   : > { %v2636_v15 = vpop.eup %2635  ;;  %2366 = vmatpush3.msra.mxu0 %v1436_v14  ;;  %2367 = vmatprep.mubr.msk.f32.mxu0 %vm3156_vm0, %v3157_v1  ;;  %v1875_v14 = vld [vmem:[#allocation19 + $0x38] sm:$0xff] }
 0x596   : > { %v1131_v16 = vmul.f32 %v2636_v15, %v2628_v60  ;;  %2375 = vmatprep.subr.mxu0 %v3157_v1  ;;  %v2259_v60 = vld [vmem:[#allocation13] ss:$0 sm:$0xff]  ;;  %v2437_v15 = vpack.c.bf16 %v1875_v14, %v1874_v13 }
 0x598   : > { %2363 = vmatmul.mubr.msk.f32.vlgmr.msra.gmra.mrb[6].mxu1 %vm785_vm2, %v1131_v16  ;;  %v2261_v16 = vld [vmem:[#allocation17] ss:$0 sm:$0xff] }
 0x599   : > { %2372 = vmatprep.mubr.msk.f32.mxu1 %vm3156_vm0, %v3157_v1  ;;  %2371 = vmatpush3.msra.mxu1 %v1437_v17 }
 0x59a   : > { %2380 = vmatprep.subr.mxu1 %v3157_v1 }
 0x5fa   : > { %v1204_v19 = vpop.f32.mrb[6].mxu0 }
 0x5fb   : > { %v2349_v20 = vpop.f32.mrb[7].mxu0  ;;  %2368 = vmatmul.mubr.msk.f32.vlgmr.msra.gmra.mrb[10].mxu0 %vm785_vm2, %v1204_v19 }
 0x5fc   : > { %2376 = vmatpush3.msra.mxu0 %v1438_v18  ;;  %2377 = vmatprep.mubr.msk.f32.mxu0 %vm3156_vm0, %v3157_v1 }
 0x5fd   : > { %2421 = vmatprep.subr.bf16.mxu0 %v3155_v0 }
 0x663   : > { %v1280_v22 = vpop.f32.mrb[4].mxu1 }
 0x664   : > { %v2354_v23 = vpop.f32.mrb[5].mxu1  ;;  %2373 = vmatmul.mubr.msk.f32.vlgmr.msra.gmra.mrb[8].mxu1 %vm785_vm2, %v1280_v22 }
 0x665   : > { %2381 = vmatpush3.msra.mxu1 %v1439_v21  ;;  %2382 = vmatprep.mubr.msk.f32.mxu1 %vm3156_vm0, %v3157_v1 }
 0x666   : > { %2427 = vmatprep.subr.bf16.mxu1 %v3155_v0 }
 0x667   : > { %v1356_v24 = vpop.f32.mrb[8].mxu0 }
 0x668   : > { %v2359_v25 = vpop.f32.mrb[9].mxu0  ;;  %2378 = vmatmul.mubr.msk.f32.vlgmr.msra.gmra.mrb[12].mxu0 %vm785_vm2, %v1356_v24 }
 0x669   : > { %2393 = vmatprep.mubr.msk.f32.mxu0 %vm3156_vm0, %v3157_v1  ;;  %2423 = vmatpush3.bf16.msra.mxu0 %v2422_v53  ;;  %v2263_v25 = vld [vmem:[#allocation20] ss:$0 sm:$0xff] }
 0x66a   : > { %2424 = vmatprep.subr.bf16.mxu0 %v3155_v0 }
 0x66b   : > { %v1432_v26 = vpop.f32.mrb[6].mxu1 }
 0x66c   : > { %v2364_v27 = vpop.f32.mrb[7].mxu1  ;;  %2383 = vmatmul.mubr.msk.f32.vlgmr.msra.gmra.mrb[10].mxu1 %vm785_vm2, %v1432_v26 }
 0x66d   : > { %2412 = vmatprep.mubr.msk.f32.mxu1 %vm3156_vm0, %v3157_v1  ;;  %2426 = vmatpush3.bf16.msra.mxu0 %v2425_v56 }
 0x66e   : > { %2429 = vmatpush3.bf16.msra.mxu1 %v2428_v5 }
 0x66f   : > { %2430 = vmatprep.subr.bf16.mxu1 %v3155_v0 }
 0x672   : > { %2432 = vmatpush3.bf16.msra.mxu1 %v2431_v9 }
 0x673   : > { %2433 = vmatprep.subr.bf16.mxu1 %v3155_v0 }
 0x676   : > { %2435 = vmatpush3.bf16.msra.mxu1 %v2434_v12 }
 0x677   : > { %2436 = vmatprep.subr.bf16.mxu1 %v3155_v0 }
 0x67a   : > { %2438 = vmatpush3.bf16.msra.mxu1 %v2437_v15 }
 0x6ce   : > { %v1509_v28 = vpop.f32.mrb[10].mxu0 }
 0x6cf   : > { %v2369_v29 = vpop.f32.mrb[11].mxu0  ;;  %v1732_v31 = vsel %vm688_vm1, %v1509_v28, 0.0 }
 0x737   : > { %v1582_v30 = vpop.f32.mrb[8].mxu1 }
 0x738   : > { %v1733_v32 = vsel %vm688_vm1, %v1582_v30, 0.0  ;;  %v2374_v33 = vpop.f32.mrb[9].mxu1 }
 0x739   : > { %v1734_v34 = vadd.f32 %v1733_v32, %v1732_v31 }
 0x73b   : > { %v1655_v35 = vpop.f32.mrb[12].mxu0 }
 0x73c   : > { %v1735_v36 = vsel %vm688_vm1, %v1655_v35, 0.0  ;;  %v2379_v37 = vpop.f32.mrb[13].mxu0 }
 0x73d   : > { %v1736_v38 = vadd.f32 %v1735_v36, %v1734_v34 }
 0x73f   : > { %v1728_v39 = vpop.f32.mrb[10].mxu1 }
 0x740   : > { %v1737_v40 = vsel %vm688_vm1, %v1728_v39, 0.0  ;;  %v2384_v42 = vpop.f32.mrb[11].mxu1  ;;  %v2265_v39 = vld [vmem:[#allocation22] ss:$0 sm:$0xff] }
 0x741   : > { %v1738_v1 = vadd.f32 %v1737_v40, %v1736_v38 }
 0x743   : > { %v1746_v43 = vadd.f32 %v2258_v41, %v1738_v1  ;;  %v2266_v41 = vld [vmem:[#allocation23] ss:$0 sm:$0xff] }
 0x745   : > { %v1747_v44 = vadd.f32 %v1746_v43, %v3700_v8 }
 0x747   : > { %v1750_v45 = vsel %vm688_vm1, %v1747_v44, 0.0 }
 0x748   : > { %1751 = vadd.xlane.f32.xlu0 %v1750_v45 }
 0x7d5   : > { %v1752_v46 = vpop.xlane.xlu0 %1751 }
 0x7d6   : > { %v1754_v47 = vmul.f32 0.03125, %v1752_v46 }
 0x7d8   : > { %v1755_v48 = vsub.f32 %v1747_v44, %v1754_v47 }
 0x7da   : > { %v1756_v49 = vmul.f32 %v1755_v48, %v1755_v48 }
 0x7dc   : > { %v1757_v50 = vsel %vm688_vm1, %v1756_v49, 0.0 }
 0x7dd   : > { %1758 = vadd.xlane.f32.xlu1 %v1757_v50 }
 0x86a   : > { %v1759_v8 = vpop.xlane.xlu1 %1758 }
 0x86b   : > { %v1760_v57 = vmul.f32 0.03125, %v1759_v8 }
 0x86d   : > { %v1761_v58 = vadd.f32 1e-12, %v1760_v57 }
 0x86f   : > { %2637 = vrsqrt.f32 %v1761_v58 }
 0x879   : > { %v2638_v59 = vpop.eup %2637 }
 0x87a   : > { %v1763_v61 = vmul.f32 %v2638_v59, %v1755_v48 }
 0x87c   : > { %v1770_v63 = vmul.f32 %v2259_v60, %v1763_v61 }
 0x87e   : > { %v1777_v2 = vadd.f32 %v2260_v62, %v1770_v63 }
 0x880   : > { %2394 = vmatmul.mubr.msk.f32.vlgmr.msra.gmra.mrb[14].mxu0 %vm688_vm1, %v1777_v2 }
 0x953   : > { %v1858_v17 = vpop.f32.mrb[14].mxu0 }
 0x954   : > { %v1859_v18 = vadd.f32 %v2261_v16, %v1858_v17  ;;  %v2395_v19 = vpop.f32.mrb[15].mxu0 }
 0x956   : > { %v1864_v20 = vmul.f32 0.70710677, %v1859_v18  ;;  %v1862_v22 = vmul.f32 0.5, %v1859_v18 }
 0x958   : > { %2639 = verf.f32 %v1864_v20 }
 0x962   : > { %v2640_v21 = vpop.eup %2639 }
 0x963   : > { %v1866_v23 = vadd.f32 1.0, %v2640_v21 }
 0x965   : > { %v1867_v24 = vmul.f32 %v1866_v23, %v1862_v22 }
 0x967   : > { %2413 = vmatmul.mubr.msk.f32.vlgmr.msra.gmra.mrb[12].mxu1 %vm1883_vm3, %v1867_v24 }
 0xa3a   : > { %v1953_v26 = vpop.f32.mrb[12].mxu1 }
 0xa3b   : > { %v1954_v27 = vadd.f32 %v2263_v25, %v1953_v26  ;;  %v2414_v0 = vpop.f32.mrb[13].mxu1 }
 0xa3d   : > { %v1957_v28 = vadd.f32 %v1954_v27, %v1777_v2 }
 0xa3f   : > { %v1960_v29 = vsel %vm688_vm1, %v1957_v28, 0.0 }
 0xa40   : > { %1961 = vadd.xlane.f32.xlu0 %v1960_v29 }
 0xacd   : > { %v1962_v30 = vpop.xlane.xlu0 %1961 }
 0xace   : > { %v1963_v31 = vmul.f32 0.03125, %v1962_v30 }
 0xad0   : > { %v1964_v32 = vsub.f32 %v1957_v28, %v1963_v31 }
 0xad2   : > { %v1965_v33 = vmul.f32 %v1964_v32, %v1964_v32 }
 0xad4   : > { %v1966_v34 = vsel %vm688_vm1, %v1965_v33, 0.0 }
 0xad5   : > { %1967 = vadd.xlane.f32.xlu0 %v1966_v34 }
 0xb62   : > { %v1968_v35 = vpop.xlane.xlu0 %1967 }
 0xb63   : > { %v1969_v36 = vmul.f32 0.03125, %v1968_v35 }
 0xb65   : > { %v1970_v37 = vadd.f32 1e-12, %v1969_v36 }
 0xb67   : > { %2641 = vrsqrt.f32 %v1970_v37 }
 0xb71   : > { %v2642_v38 = vpop.eup %2641 }
 0xb72   : > { %v1972_v40 = vmul.f32 %v2642_v38, %v1964_v32 }
 0xb74   : > { %v1979_v42 = vmul.f32 %v2265_v39, %v1972_v40 }
 0xb76   : > { %v1986_v1 = vadd.f32 %v2266_v41, %v1979_v42 }
 0xb78   : > { %1987 = vst.msk [vmem:[%s674_s6] sm:$0xff] %vm688_vm1, %v1986_v1 }
 0xb79   : > { %3052 = shalt.err (!%p3049_p2)
}
 0xb7a   : > { %s3053_s3 = scalar_lea.hbm %s3813_s18, 128  ;;  %s3057_s24 = scalar_lea.hbm %s3935_s1, 256 }
 0xb7b   : > { %p3054_p4 = scmp.ne.s32.totalorder %s3813_s18, %s3053_s3  ;;  %p3058_p7 = scmp.lt.u32.totalorder %s3813_s18, %s3935_s1 }
 0xb7c   : > { %p3059_p0 = scmp.lt.u32.totalorder %s3057_s24, %s3053_s3  ;;  %p3061_p11 = scmp.lt.u32.totalorder %s3053_s3, %s3813_s18 }
 0xb7d   : > { %p3055_p10 = pnand %p3054_p4, %p3936_p8 }
 0xb7e   : > { %p3060_p6 = por %p3059_p0, %p3058_p7 }
 0xb7f   : > { %p3056_p5 = pneg %p3055_p10 }
 0xb80   : > { %p3062_p9 = por %p3061_p11, %p3060_p6 }
 0xb82   : > { %p3063_p12 = pnand %p3062_p9, %p3056_p5 }
 0xb84   : > { %3066 = shalt.err (!%p3063_p12)
}
 0xb85   : > { %2491 = dma.vmem_to_hbm [thread:$0]  (%p3936_p8), %s3815_s21, 128, %s3813_s18, %s1989_s28  }
 0xb86 PF: > { %s3937_s26 = sld [smem:[#allocation36_spill]]  ;;  %p3938_p13 = scmp.ne.s32.totalorder %s3912_s17, 0 }
 0xb87   : > { %p3939_p1 = scmp.ge.s32.totalorder %s3137_s16, 2 }
 0xb89   : > { %p2538_p3 = pnand %p3939_p1, %p3938_p13 }
 0xb8c   : > { %s2014_s22 = sand.u32 1, %s3937_s26  }
 0xb8d   : > { %s2015_s27 = scalar_lea.sflag [#allocation4], %s2014_s22 }
 0xb8e   : > { %3120 = dma.done.wait (!%p2538_p3), %s2015_s27, 128  }
 0xb8f   : > { %3122 = vsyncadd (!%p2538_p3), %s2015_s27, 4294967168  ;;  %p36_p2 = scmp.ge.s32.totalorder %s3537_s23, 4   ;;  %s3940_s29 = smov %s3129_s30 }
 0xb90   : > { %s3941_s30 = smov %s3133_s15  ;;  %s3942_s15 = smov %s3548_s2 }
 0xb91   : > { %s3943_s16 = smov %s3537_s23  ;;  %38 = sbr.rel (!%p36_p2) target bundleno = 22 (0x16), region = 182 }
 0xb98   :  { %2020 = vsyncpa [#allocation3], 1 }
 0xb99   :  { %2022 = vsyncpa [#allocation3 + $0x1], 1 }
 0xb9a   :  { %2023 = vsyncpa [#allocation6], 1 }
 0xb9b   :  { %2025 = vsyncpa [#allocation6 + $0x1], 1 }
 0xb9c   :  { %2026 = vsyncpa [#allocation9], 1 }
 0xb9d   :  { %2027 = vsyncpa [#allocation12], 1 }
 0xb9e   :  { %2028 = vsyncpa [#allocation15], 1 }
 0xb9f   :  { %2029 = vsyncpa [#allocation18], 1 }
 0xba0   :  { %2030 = vsyncpa [#allocation21], 1 }
 0xba1   :  { %2031 = vsyncpa [#allocation24], 1 }
 0xba2   :  { %2032 = vsyncpa [#allocation4], 1 }
 0xba3   :  { %2034 = vsyncpa [#allocation4 + $0x1], 1 }

</bundles_post_ra>
